<compile_context>
chip_gen: v5e
topology: v5e:2x2
jax: 0.10.0
libtpu: 0.0.40
codegen_flags: <defaults>
</compile_context>

<pallas_src>
import functools

import jax
import jax.numpy as jnp
from jax.experimental import pallas as pl
from jax.experimental.pallas import tpu as pltpu


# -----------------------------------------------------------------------------
# Generation-aware tiling configuration (v5e/v6e: 128 MiB VMEM; v7x: 64 MiB/TC)
# -----------------------------------------------------------------------------
def _get_tile_config():
    vmem_bytes = None
    try:
        info = pltpu.get_tpu_info()
        vmem_bytes = int(getattr(info, "vmem_capacity_bytes", 0)) or None
    except Exception:
        vmem_bytes = None
    if vmem_bytes is None:
        vmem_bytes = 64 * 1024 * 1024          # conservative default (v7x-like)
    if vmem_bytes >= 100 * 1024 * 1024:        # v5e / v6e (128 MiB physical)
        return {"vmem_limit": 96 * 1024 * 1024, "row_tile": 512,
                "k_tile": 1024, "user_tile": 1024}
    # v7x (64 MiB per TensorCore) or unknown generation
    return {"vmem_limit": 48 * 1024 * 1024, "row_tile": 256,
            "k_tile": 512, "user_tile": 1024}


_CFG = _get_tile_config()


def _round_up(x, m):
    return ((x + m - 1) // m) * m


def _largest_divisor_tile(dim, target, align):
    """Largest multiple of `align` dividing `dim` (a multiple of align), <= target."""
    t = (min(target, dim) // align) * align
    while t > align:
        if dim % t == 0:
            return t
        t -= align
    return align


def _pad2d(x, rows, cols):
    r, c = x.shape
    if r == rows and c == cols:
        return x
    return jnp.pad(x, ((0, rows - r), (0, cols - c)))


def _pad_adj(adj, e_pad):
    _, e, _ = adj.shape
    if e == e_pad:
        return adj
    return jnp.pad(adj, ((0, 0), (0, e_pad - e), (0, e_pad - e)))


# -----------------------------------------------------------------------------
# Kernel 1: Edge_Encoder — per-relation mean aggregation of feature slices,
# produced directly as a lane-dense (E, C) slab (no HBM transposes).
#   out[:, r*d:(r+1)*d] = A_r @ X[:, r*d:(r+1)*d]
# implemented as out = sum_r A_r @ (X * colmask_r)   (exact: masked cols are 0)
# -----------------------------------------------------------------------------
def _edge_encoder_kernel(adj_ref, x_ref, mask_ref, out_ref, *, n_relations):
    @pl.when(pl.program_id(1) == 0)
    def _():
        out_ref[...] = jnp.zeros_like(out_ref)

    x = x_ref[...]
    acc = jnp.dot(adj_ref[0], x * mask_ref[0:1, :],
                  preferred_element_type=jnp.float32)
    for r in range(1, n_relations):  # static unroll, R is small
        acc = acc + jnp.dot(adj_ref[r], x * mask_ref[r:r + 1, :],
                            preferred_element_type=jnp.float32)
    out_ref[...] += acc


def edge_encode(adj_bf16, x_bf16, rel_mask_bf16, *, n_relations, tm, tk):
    R, e_pad, _ = adj_bf16.shape
    C = x_bf16.shape[-1]
    kernel = functools.partial(_edge_encoder_kernel, n_relations=n_relations)
    return pl.pallas_call(
        kernel,
        out_shape=jax.ShapeDtypeStruct((e_pad, C), jnp.float32),
        grid=(e_pad // tm, e_pad // tk),
        in_specs=[
            pl.BlockSpec((R, tm, tk), lambda i, k: (0, i, k)),
            pl.BlockSpec((tk, C), lambda i, k: (k, 0)),
            pl.BlockSpec((R, C), lambda i, k: (0, 0)),
        ],
        out_specs=pl.BlockSpec((tm, C), lambda i, k: (i, 0)),
        compiler_params=pltpu.CompilerParams(
            dimension_semantics=("parallel", "arbitrary"),
            vmem_limit_bytes=_CFG["vmem_limit"]),
    )(adj_bf16, x_bf16, rel_mask_bf16)


# -----------------------------------------------------------------------------
# Kernel 2: Neighbor_Ecoder hop — x_new = sum_r A_r @ x  (R folded into the adj
# block, static-unrolled dots) with the residual add fused:
#   res_out = res_in + x_new   and   x_new is emitted in bf16 for the next hop.
# Accumulation over the contraction grid axis happens in a f32 VMEM scratch.
# -----------------------------------------------------------------------------
def _neighbor_hop_kernel(adj_ref, emb_ref, res_in_ref, xnew_ref, res_out_ref,
                         acc_ref, *, n_relations):
    k = pl.program_id(1)

    @pl.when(k == 0)
    def _():
        acc_ref[...] = jnp.zeros_like(acc_ref)

    x = emb_ref[...]
    acc = jnp.dot(adj_ref[0], x, preferred_element_type=jnp.float32)
    for r in range(1, n_relations):  # static unroll
        acc = acc + jnp.dot(adj_ref[r], x, preferred_element_type=jnp.float32)
    acc_ref[...] += acc

    @pl.when(k == pl.num_programs(1) - 1)
    def _():
        xnew_ref[...] = acc_ref[...].astype(xnew_ref.dtype)
        res_out_ref[...] = res_in_ref[...] + acc_ref[...]


def neighbor_hop(adj_bf16, emb_bf16, res_f32, *, n_relations, tm, tk):
    R, e_pad, _ = adj_bf16.shape
    C = emb_bf16.shape[-1]
    kernel = functools.partial(_neighbor_hop_kernel, n_relations=n_relations)
    return pl.pallas_call(
        kernel,
        out_shape=(jax.ShapeDtypeStruct((e_pad, C), jnp.bfloat16),
                   jax.ShapeDtypeStruct((e_pad, C), jnp.float32)),
        grid=(e_pad // tm, e_pad // tk),
        in_specs=[
            pl.BlockSpec((R, tm, tk), lambda i, k: (0, i, k)),
            pl.BlockSpec((tk, C), lambda i, k: (k, 0)),
            pl.BlockSpec((tm, C), lambda i, k: (i, 0)),
        ],
        out_specs=(pl.BlockSpec((tm, C), lambda i, k: (i, 0)),
                   pl.BlockSpec((tm, C), lambda i, k: (i, 0))),
        scratch_shapes=[pltpu.VMEM((tm, C), jnp.float32)],
        compiler_params=pltpu.CompilerParams(
            dimension_semantics=("parallel", "arbitrary"),
            vmem_limit_bytes=_CFG["vmem_limit"]),
    )(adj_bf16, emb_bf16, res_f32)


# -----------------------------------------------------------------------------
# Kernel 3: hoisted hop-invariant user aggregation  user_agg = interact_mat @ E
# (computed exactly once instead of once per Aggregator hop).
# -----------------------------------------------------------------------------
def _matmul_acc_kernel(a_ref, b_ref, out_ref):
    @pl.when(pl.program_id(1) == 0)
    def _():
        out_ref[...] = jnp.zeros_like(out_ref)

    out_ref[...] += jnp.dot(a_ref[...], b_ref[...],
                            preferred_element_type=jnp.float32)


def user_aggregate(inter_bf16, entity_emb_f32, *, tu, tk):
    u_pad, e_pad = inter_bf16.shape
    C = entity_emb_f32.shape[-1]
    b = entity_emb_f32.astype(jnp.bfloat16)
    return pl.pallas_call(
        _matmul_acc_kernel,
        out_shape=jax.ShapeDtypeStruct((u_pad, C), jnp.float32),
        grid=(u_pad // tu, e_pad // tk),
        in_specs=[
            pl.BlockSpec((tu, tk), lambda i, k: (i, k)),
            pl.BlockSpec((tk, C), lambda i, k: (k, 0)),
        ],
        out_specs=pl.BlockSpec((tu, C), lambda i, k: (i, 0)),
        compiler_params=pltpu.CompilerParams(
            dimension_semantics=("parallel", "arbitrary"),
            vmem_limit_bytes=_CFG["vmem_limit"]),
    )(inter_bf16, b)


# -----------------------------------------------------------------------------
# Kernel 4: fused Aggregator hops.
# Per hop h:  score = softmax(user @ latent^T, dim=1)
#             user  = F.normalize(user_agg * (score @ weight) + user_agg)
#             res  += user
# grid = (user tiles [parallel], n_hops [arbitrary]); user state carried in a
# VMEM scratch; latent/weight stay resident.  Logits go to the MXU; the tiny-F
# score->mix expansion stays on the VPU; softmax denom via the EUP reciprocal.
# -----------------------------------------------------------------------------
def _aggregator_hops_kernel(user0_ref, uagg_ref, latent_t_ref, weight_ref,
                            res_ref, cur_ref, *, n_factors):
    h = pl.program_id(1)

    @pl.when(h == 0)
    def _():
        cur_ref[...] = user0_ref[...]
        res_ref[...] = user0_ref[...]

    user = cur_ref[...]                      # (tu, C) f32, carried across hops
    uagg = uagg_ref[...]                     # (tu, C) f32, hop-invariant

    # user -> latent factor attention logits on the MXU: (tu,C) x (C,F) -> (tu,F)
    logits = jnp.dot(user, latent_t_ref[...], preferred_element_type=jnp.float32)

    cols = [logits[:, f:f + 1] for f in range(n_factors)]
    m = cols[0]
    for f in range(1, n_factors):
        m = jnp.maximum(m, cols[f])
    exps = [jnp.exp(c - m) for c in cols]
    denom = exps[0]
    for f in range(1, n_factors):
        denom = denom + exps[f]
    inv_denom = pl.reciprocal(denom, approx=True)        # EUP, not VALU divide

    # (score @ weight) as a VPU broadcast multiply-accumulate over tiny F
    mix = (exps[0] * inv_denom) * weight_ref[0:1, :]
    for f in range(1, n_factors):
        mix = mix + (exps[f] * inv_denom) * weight_ref[f:f + 1, :]

    ua = uagg * mix + uagg

    # F.normalize(dim=1): x / max(||x||, 1e-12) == x * rsqrt(max(||x||^2, 1e-24))
    sumsq = jnp.sum(ua * ua, axis=1, keepdims=True)
    new_user = ua * jax.lax.rsqrt(jnp.maximum(sumsq, 1e-24))

    cur_ref[...] = new_user
    res_ref[...] = res_ref[...] + new_user


def aggregator_hops(user_emb0, user_agg, latent_t, weight, *, n_hops, n_factors, tu):
    u_pad, C = user_emb0.shape
    F_ = weight.shape[0]
    kernel = functools.partial(_aggregator_hops_kernel, n_factors=n_factors)
    return pl.pallas_call(
        kernel,
        out_shape=jax.ShapeDtypeStruct((u_pad, C), jnp.float32),
        grid=(u_pad // tu, n_hops),
        in_specs=[
            pl.BlockSpec((tu, C), lambda i, h: (i, 0)),
            pl.BlockSpec((tu, C), lambda i, h: (i, 0)),
            pl.BlockSpec((C, F_), lambda i, h: (0, 0)),
            pl.BlockSpec((F_, C), lambda i, h: (0, 0)),
        ],
        out_specs=pl.BlockSpec((tu, C), lambda i, h: (i, 0)),
        scratch_shapes=[pltpu.VMEM((tu, C), jnp.float32)],
        compiler_params=pltpu.CompilerParams(
            dimension_semantics=("parallel", "arbitrary"),
            vmem_limit_bytes=_CFG["vmem_limit"]),
    )(user_emb0, user_agg, latent_t, weight)


# -----------------------------------------------------------------------------
# Kernel 5: BPR loss partial sums
#   out[0] = sum( logsigmoid(pos_scores - neg_scores) )
#   out[1] = ||users||^2 , out[2] = ||pos||^2 , out[3] = ||neg||^2
# TODO(synk): for production batch sizes, tile over row blocks and gather the
# user/item rows in-kernel (scalar prefetch + pl.Element) instead of XLA gathers.
# -----------------------------------------------------------------------------
def _bpr_kernel(u_ref, p_ref, n_ref, out_ref):
    u = u_ref[...]
    p = p_ref[...]
    n = n_ref[...]
    pos = jnp.sum(u * p, axis=1, keepdims=True)
    neg = jnp.sum(u * n, axis=1, keepdims=True)
    x = pos - neg
    logsig = jnp.minimum(x, 0.0) - jnp.log1p(jnp.exp(-jnp.abs(x)))
    out_ref[0] = jnp.sum(logsig)
    out_ref[1] = jnp.sum(u * u)
    out_ref[2] = jnp.sum(p * p)
    out_ref[3] = jnp.sum(n * n)


def bpr_sums(u_e, pos_e, neg_e):
    vmem = pl.BlockSpec(memory_space=pltpu.MemorySpace.VMEM)
    return pl.pallas_call(
        _bpr_kernel,
        out_shape=jax.ShapeDtypeStruct((4,), jnp.float32),
        in_specs=[vmem, vmem, vmem],
        out_specs=pl.BlockSpec(memory_space=pltpu.MemorySpace.SMEM),
    )(u_e, pos_e, neg_e)


# -----------------------------------------------------------------------------
# JAX glue pieces (no clean Pallas hot path / trivially small)
# -----------------------------------------------------------------------------
def xavier_uniform(key, shape, gain=1.0):
    fan_out, fan_in = shape[0], shape[1]
    bound = gain * jnp.sqrt(6.0 / (fan_in + fan_out))
    return jax.random.uniform(key, shape, jnp.float32, -bound, bound)


def distance_correlation(t1, t2):
    # Mirrors GraphConv._cul_cor DistanceCorrelation (ind == 'distance').
    channel = t1.shape[0]
    t1 = t1[:, None]
    t2 = t2[:, None]
    a_ = t1 @ t1.T * 2.0
    b_ = t2 @ t2.T * 2.0
    t1sq, t2sq = t1 ** 2, t2 ** 2
    a = jnp.sqrt(jnp.maximum(t1sq - a_ + t1sq.T, 0.0) + 1e-8)
    b = jnp.sqrt(jnp.maximum(t2sq - b_ + t2sq.T, 0.0) + 1e-8)
    A = a - a.mean(0, keepdims=True) - a.mean(1, keepdims=True) + a.mean()
    B = b - b.mean(0, keepdims=True) - b.mean(1, keepdims=True) + b.mean()
    dcov_AB = jnp.sqrt(jnp.maximum((A * B).sum() / channel ** 2, 0.0) + 1e-8)
    dcov_AA = jnp.sqrt(jnp.maximum((A * A).sum() / channel ** 2, 0.0) + 1e-8)
    dcov_BB = jnp.sqrt(jnp.maximum((B * B).sum() / channel ** 2, 0.0) + 1e-8)
    return dcov_AB / jnp.sqrt(dcov_AA * dcov_BB + 1e-8)


def cul_cor(centroids, n_factors):
    cor = jnp.float32(0.0)
    for i in range(n_factors):
        for j in range(i + 1, n_factors):
            cor = cor + distance_correlation(centroids[i], centroids[j])
    return cor


# -----------------------------------------------------------------------------
# Full forward (Recommender.forward semantics, dropout disabled)
# -----------------------------------------------------------------------------
def recommender_forward(params, adj_AK, interact_mat, batch, cfg):
    R, E, F_, C = cfg["n_relations"], cfg["n_entities"], cfg["n_factors"], cfg["dim_f"]
    n_hops, d_rel = cfg["n_hops"], cfg["d_rel"]
    U = params["all_embed"].shape[0]

    row_tile = _CFG["row_tile"]
    k_tile = _CFG["k_tile"]
    user_tile = _CFG["user_tile"]

    # --- tiling + explicit zero-padding (no whole-axis fallback) ---------------
    # Keep the double-buffered adjacency block under ~half the scoped VMEM budget.
    adj_tk_cap = max(128, (_CFG["vmem_limit"] // (8 * max(R, 1) * row_tile)) // 128 * 128)
    tk = min(k_tile, adj_tk_cap, _round_up(E, 128))
    e_pad = _round_up(E, tk)
    tm = _largest_divisor_tile(e_pad, row_tile, 16)     # bf16 sublane packing: 16-aligned
    tu = min(user_tile, _round_up(U, 16))
    u_pad = _round_up(U, tu)

    adj_p = _pad_adj(adj_AK, e_pad).astype(jnp.bfloat16)
    x_ak_p = _pad2d(params["all_embed_ak"], e_pad, C).astype(jnp.bfloat16)
    inter_p = _pad2d(interact_mat, u_pad, e_pad).astype(jnp.bfloat16)
    user0_p = _pad2d(params["all_embed"], u_pad, C)
    latent_emb = params["latent_emb"]                   # (F, C)

    # Per-relation feature-column indicator mask (the W_R / dim_flag1 slicing).
    col = jnp.arange(C)[None, :]
    lo = (jnp.arange(R) * d_rel)[:, None]
    rel_mask = ((col >= lo) & (col < lo + d_rel)).astype(jnp.bfloat16)   # (R, C)

    # --- Edge_Encoder: lane-dense (E_pad, C) output, no HBM transposes ---------
    entity_embed0 = edge_encode(adj_p, x_ak_p, rel_mask,
                                n_relations=R, tm=tm, tk=tk)

    # --- Neighbor_Ecoder hops with fused residual ------------------------------
    entity_res_emb = entity_embed0
    x_bf = entity_embed0.astype(jnp.bfloat16)
    for _ in range(n_hops):
        x_bf, entity_res_emb = neighbor_hop(adj_p, x_bf, entity_res_emb,
                                            n_relations=R, tm=tm, tk=tk)

    # --- k-means / faiss replacement (deterministic) ---------------------------
    # TODO(synk): faiss KMeans + IndexFlatL2 replaced by chunk-mean centroids
    # and a brute-force L2 nearest-neighbour search (JAX side path).
    e0 = entity_embed0[:E]
    edge_emb = jnp.transpose(e0.reshape(E, R, d_rel), (1, 0, 2))         # (R,E,d)
    new_train = edge_emb.reshape(R * E, d_rel)
    centroids = new_train.reshape(F_, -1, d_rel).mean(axis=1)            # (F, d)
    cor = cul_cor(centroids, F_)

    d2 = jnp.sum((centroids[:, None, :] - new_train[None, :, :]) ** 2, axis=-1)
    nn_idx = jnp.argsort(d2, axis=1)[:, :R]                              # (F, R)
    weight = new_train[nn_idx].reshape(F_, R * d_rel)                    # (F, C)

    # --- Aggregator hops: user_agg hoisted (hop-invariant), hops fused ---------
    user_agg = user_aggregate(inter_p, entity_res_emb, tu=tu, tk=tk)     # (U_pad, C)
    if n_hops > 0:
        user_res_emb = aggregator_hops(user0_p, user_agg, latent_emb.T, weight,
                                       n_hops=n_hops, n_factors=F_, tu=tu)
    else:
        user_res_emb = user0_p

    # --- BPR loss ---------------------------------------------------------------
    users = batch["users"]
    pos_items = batch["pos_items"]
    neg_items = batch["neg_items"]
    u_e = user_res_emb[users]
    pos_e = entity_res_emb[pos_items]
    neg_e = entity_res_emb[neg_items]

    sums = bpr_sums(u_e, pos_e, neg_e)
    batch_size = u_e.shape[0]
    mf_loss = -1.0 * (sums[0] / batch_size)
    regularizer = (sums[1] + sums[2] + sums[3]) / 2.0
    emb_loss = cfg["decay"] * regularizer / batch_size
    cor_loss = cfg["sim_decay"] * cor
    total = mf_loss + emb_loss + cor_loss
    return total, mf_loss, emb_loss, cor


# -----------------------------------------------------------------------------
# Main
# -----------------------------------------------------------------------------
if __name__ == "__main__":
    key = jax.random.PRNGKey(0)
    k1, k2, k3, k4, k5 = jax.random.split(key, 5)

    # Small, self-consistent configuration.
    n_users = 8
    n_entities = 16
    n_relations = 4
    n_factors = 4
    d_rel = 40                       # hard-coded 40-dim per relation in the module
    dim_f = n_relations * d_rel      # 160
    n_hops = 2
    batch_size = 4

    cfg = dict(n_relations=n_relations, n_entities=n_entities, n_factors=n_factors,
               dim_f=dim_f, d_rel=d_rel, n_hops=n_hops,
               decay=1e-5, sim_decay=1e-4)

    # Parameters (xavier_uniform, matching _init_weight).
    params = {
        "all_embed_ak": xavier_uniform(k1, (n_entities, dim_f), gain=1.414),
        "all_embed": xavier_uniform(k2, (n_users, dim_f), gain=1.0),
        "latent_emb": xavier_uniform(k3, (n_factors, dim_f), gain=1.0),
    }

    # Dense row-normalized relation adjacencies (mean aggregation semantics).
    adj_raw = (jax.random.uniform(k4, (n_relations, n_entities, n_entities)) < 0.3
               ).astype(jnp.float32)
    deg = jnp.sum(adj_raw, axis=-1, keepdims=True)
    adj_AK = jnp.where(deg > 0, adj_raw / jnp.maximum(deg, 1.0), 0.0)

    # Dense user-entity interaction matrix (stand-in for sparse interact_mat).
    inter_raw = (jax.random.uniform(k5, (n_users, n_entities)) < 0.4
                 ).astype(jnp.float32)
    ideg = jnp.sum(inter_raw, axis=-1, keepdims=True)
    interact_mat = jnp.where(ideg > 0, inter_raw / jnp.maximum(ideg, 1.0), 0.0)

    batch = {
        "users": jnp.array([0, 1, 2, 3], dtype=jnp.int32),
        "pos_items": jnp.array([1, 2, 3, 4], dtype=jnp.int32),
        "neg_items": jnp.array([5, 6, 7, 8], dtype=jnp.int32),
    }

    fwd = jax.jit(functools.partial(recommender_forward, cfg=cfg))
    total, mf_loss, emb_loss, cor = fwd(params, adj_AK, interact_mat, batch)
    jax.block_until_ready((total, mf_loss, emb_loss, cor))
    print("KERNEL_OK")
</pallas_src>

<mosaic_0001>
module attributes {stable_mosaic.version = 11 : i64} {
  func.func @_edge_encoder_kernel(%arg0: i32, %arg1: i32, %arg2: memref<4x128x128xbf16, #tpu.memory_space<vmem>>, %arg3: memref<128x160xbf16, #tpu.memory_space<vmem>>, %arg4: memref<4x160xbf16, #tpu.memory_space<vmem>>, %arg5: memref<128x160xf32, #tpu.memory_space<vmem>>) attributes {dimension_semantics = [#tpu.dimension_semantics<parallel>, #tpu.dimension_semantics<arbitrary>], iteration_bounds = array<i64: 1, 1>, scalar_prefetch = 0 : i64, scratch_operands = 0 : i64, tpu.core_type = #tpu.core_type<tc>, window_params = [{transform_indices = @transform_0, window_bounds = array<i64: 4, 128, 128>}, {transform_indices = @transform_1, window_bounds = array<i64: 128, 160>}, {pipeline_mode = #tpu.pipeline_mode<synchronous>, transform_indices = @transform_2, window_bounds = array<i64: 4, 160>}, {transform_indices = @transform_3, window_bounds = array<i64: 128, 160>}]} {
    %c0_i32 = arith.constant 0 : i32
    %0 = arith.cmpi eq, %arg1, %c0_i32 : i32
    %1 = arith.extui %0 : i1 to i32
    %c0_i32_0 = arith.constant 0 : i32
    %2 = arith.cmpi ne, %1, %c0_i32_0 : i32
    scf.if %2 {
      %cst_26 = arith.constant 0.000000e+00 : f32
      %34 = vector.broadcast %cst_26 : f32 to vector<128x160xf32>
      %c0_27 = arith.constant 0 : index
      %c0_28 = arith.constant 0 : index
      %35 = vector.load %arg5[%c0_27, %c0_28] : memref<128x160xf32, #tpu.memory_space<vmem>>, vector<128x160xf32>
      tpu.vector_store %arg5[%c0_27, %c0_28], %34 {strides = array<i32>} : memref<128x160xf32, #tpu.memory_space<vmem>>, vector<128x160xf32>,
    } else {
    }
    %c0 = arith.constant 0 : index
    %c0_1 = arith.constant 0 : index
    %3 = vector.load %arg3[%c0, %c0_1] : memref<128x160xbf16, #tpu.memory_space<vmem>>, vector<128x160xbf16>
    %c0_2 = arith.constant 0 : index
    %c0_3 = arith.constant 0 : index
    %c0_4 = arith.constant 0 : index
    %4 = vector.load %arg2[%c0_2, %c0_3, %c0_4] : memref<4x128x128xbf16, #tpu.memory_space<vmem>>, vector<1x128x128xbf16>
    %5 = vector.shape_cast %4 : vector<1x128x128xbf16> to vector<128x128xbf16>
    %c0_5 = arith.constant 0 : index
    %c0_6 = arith.constant 0 : index
    %6 = vector.load %arg4[%c0_5, %c0_6] : memref<4x160xbf16, #tpu.memory_space<vmem>>, vector<1x160xbf16>
    %7 = vector.broadcast %6 : vector<1x160xbf16> to vector<128x160xbf16>
    %8 = arith.mulf %3, %7 : vector<128x160xbf16>
    %cst = arith.constant dense<0.000000e+00> : vector<128x160xf32>
    %9 = tpu.matmul %5, %8, %cst {dimension_numbers = #tpu.dot_dimension_numbers<[1], [0], [0], [1], [0, 0, 1, 1], [], []>} : vector<128x128xbf16>, vector<128x160xbf16>, vector<128x160xf32> -> vector<128x160xf32>
    %c1 = arith.constant 1 : index
    %c0_7 = arith.constant 0 : index
    %c0_8 = arith.constant 0 : index
    %10 = vector.load %arg2[%c1, %c0_7, %c0_8] : memref<4x128x128xbf16, #tpu.memory_space<vmem>>, vector<1x128x128xbf16>
    %11 = vector.shape_cast %10 : vector<1x128x128xbf16> to vector<128x128xbf16>
    %c1_9 = arith.constant 1 : index
    %c0_10 = arith.constant 0 : index
    %12 = vector.load %arg4[%c1_9, %c0_10] : memref<4x160xbf16, #tpu.memory_space<vmem>>, vector<1x160xbf16>
    %13 = vector.broadcast %12 : vector<1x160xbf16> to vector<128x160xbf16>
    %14 = arith.mulf %3, %13 : vector<128x160xbf16>
    %cst_11 = arith.constant dense<0.000000e+00> : vector<128x160xf32>
    %15 = tpu.matmul %11, %14, %cst_11 {dimension_numbers = #tpu.dot_dimension_numbers<[1], [0], [0], [1], [0, 0, 1, 1], [], []>} : vector<128x128xbf16>, vector<128x160xbf16>, vector<128x160xf32> -> vector<128x160xf32>
    %16 = arith.addf %9, %15 : vector<128x160xf32>
    %c2 = arith.constant 2 : index
    %c0_12 = arith.constant 0 : index
    %c0_13 = arith.constant 0 : index
    %17 = vector.load %arg2[%c2, %c0_12, %c0_13] : memref<4x128x128xbf16, #tpu.memory_space<vmem>>, vector<1x128x128xbf16>
    %18 = vector.shape_cast %17 : vector<1x128x128xbf16> to vector<128x128xbf16>
    %c2_14 = arith.constant 2 : index
    %c0_15 = arith.constant 0 : index
    %19 = vector.load %arg4[%c2_14, %c0_15] : memref<4x160xbf16, #tpu.memory_space<vmem>>, vector<1x160xbf16>
    %20 = vector.broadcast %19 : vector<1x160xbf16> to vector<128x160xbf16>
    %21 = arith.mulf %3, %20 : vector<128x160xbf16>
    %cst_16 = arith.constant dense<0.000000e+00> : vector<128x160xf32>
    %22 = tpu.matmul %18, %21, %cst_16 {dimension_numbers = #tpu.dot_dimension_numbers<[1], [0], [0], [1], [0, 0, 1, 1], [], []>} : vector<128x128xbf16>, vector<128x160xbf16>, vector<128x160xf32> -> vector<128x160xf32>
    %23 = arith.addf %16, %22 : vector<128x160xf32>
    %c3 = arith.constant 3 : index
    %c0_17 = arith.constant 0 : index
    %c0_18 = arith.constant 0 : index
    %24 = vector.load %arg2[%c3, %c0_17, %c0_18] : memref<4x128x128xbf16, #tpu.memory_space<vmem>>, vector<1x128x128xbf16>
    %25 = vector.shape_cast %24 : vector<1x128x128xbf16> to vector<128x128xbf16>
    %c3_19 = arith.constant 3 : index
    %c0_20 = arith.constant 0 : index
    %26 = vector.load %arg4[%c3_19, %c0_20] : memref<4x160xbf16, #tpu.memory_space<vmem>>, vector<1x160xbf16>
    %27 = vector.broadcast %26 : vector<1x160xbf16> to vector<128x160xbf16>
    %28 = arith.mulf %3, %27 : vector<128x160xbf16>
    %cst_21 = arith.constant dense<0.000000e+00> : vector<128x160xf32>
    %29 = tpu.matmul %25, %28, %cst_21 {dimension_numbers = #tpu.dot_dimension_numbers<[1], [0], [0], [1], [0, 0, 1, 1], [], []>} : vector<128x128xbf16>, vector<128x160xbf16>, vector<128x160xf32> -> vector<128x160xf32>
    %30 = arith.addf %23, %29 : vector<128x160xf32>
    %c0_22 = arith.constant 0 : index
    %c0_23 = arith.constant 0 : index
    %31 = vector.load %arg5[%c0_22, %c0_23] : memref<128x160xf32, #tpu.memory_space<vmem>>, vector<128x160xf32>
    %32 = arith.addf %31, %30 : vector<128x160xf32>
    %c0_24 = arith.constant 0 : index
    %c0_25 = arith.constant 0 : index
    %33 = vector.load %arg5[%c0_24, %c0_25] : memref<128x160xf32, #tpu.memory_space<vmem>>, vector<128x160xf32>
    tpu.vector_store %arg5[%c0_24, %c0_25], %32 {strides = array<i32>} : memref<128x160xf32, #tpu.memory_space<vmem>>, vector<128x160xf32>,
    return
  }
  func.func @transform_0(%arg0: i32, %arg1: i32) -> (i32, i32, i32) {
    %c0_i32 = arith.constant 0 : i32
    %c0_i32_0 = arith.constant 0 : i32
    return %c0_i32, %arg0, %arg1 : i32, i32, i32
  }
  func.func @transform_1(%arg0: i32, %arg1: i32) -> (i32, i32) {
    %c0_i32 = arith.constant 0 : i32
    %c0_i32_0 = arith.constant 0 : i32
    return %arg1, %c0_i32 : i32, i32
  }
  func.func @transform_2(%arg0: i32, %arg1: i32) -> (i32, i32) {
    %c0_i32 = arith.constant 0 : i32
    %c0_i32_0 = arith.constant 0 : i32
    %c0_i32_1 = arith.constant 0 : i32
    return %c0_i32, %c0_i32_0 : i32, i32
  }
  func.func @transform_3(%arg0: i32, %arg1: i32) -> (i32, i32) {
    %c0_i32 = arith.constant 0 : i32
    %c0_i32_0 = arith.constant 0 : i32
    return %arg0, %c0_i32 : i32, i32
  }
}

module attributes {stable_mosaic.version = 11 : i64} {
  func.func @_neighbor_hop_kernel(%arg0: i32, %arg1: i32, %arg2: memref<4x128x128xbf16, #tpu.memory_space<vmem>>, %arg3: memref<128x160xbf16, #tpu.memory_space<vmem>>, %arg4: memref<128x160xf32, #tpu.memory_space<vmem>>, %arg5: memref<128x160xbf16, #tpu.memory_space<vmem>>, %arg6: memref<128x160xf32, #tpu.memory_space<vmem>>, %arg7: memref<128x160xf32, #tpu.memory_space<vmem>>) attributes {dimension_semantics = [#tpu.dimension_semantics<parallel>, #tpu.dimension_semantics<arbitrary>], iteration_bounds = array<i64: 1, 1>, scalar_prefetch = 0 : i64, scratch_operands = 1 : i64, tpu.core_type = #tpu.core_type<tc>, window_params = [{transform_indices = @transform_0, window_bounds = array<i64: 4, 128, 128>}, {transform_indices = @transform_1, window_bounds = array<i64: 128, 160>}, {transform_indices = @transform_2, window_bounds = array<i64: 128, 160>}, {transform_indices = @transform_3, window_bounds = array<i64: 128, 160>}, {transform_indices = @transform_4, window_bounds = array<i64: 128, 160>}]} {
    %c0_i32 = arith.constant 0 : i32
    %0 = arith.cmpi eq, %arg1, %c0_i32 : i32
    %1 = arith.extui %0 : i1 to i32
    %c0_i32_0 = arith.constant 0 : i32
    %2 = arith.cmpi ne, %1, %c0_i32_0 : i32
    scf.if %2 {
      %cst_20 = arith.constant 0.000000e+00 : f32
      %25 = vector.broadcast %cst_20 : f32 to vector<128x160xf32>
      %c0_21 = arith.constant 0 : index
      %c0_22 = arith.constant 0 : index
      %26 = vector.load %arg7[%c0_21, %c0_22] : memref<128x160xf32, #tpu.memory_space<vmem>>, vector<128x160xf32>
      tpu.vector_store %arg7[%c0_21, %c0_22], %25 {strides = array<i32>} : memref<128x160xf32, #tpu.memory_space<vmem>>, vector<128x160xf32>,
    } else {
    }
    %c0 = arith.constant 0 : index
    %c0_1 = arith.constant 0 : index
    %3 = vector.load %arg3[%c0, %c0_1] : memref<128x160xbf16, #tpu.memory_space<vmem>>, vector<128x160xbf16>
    %c0_2 = arith.constant 0 : index
    %c0_3 = arith.constant 0 : index
    %c0_4 = arith.constant 0 : index
    %4 = vector.load %arg2[%c0_2, %c0_3, %c0_4] : memref<4x128x128xbf16, #tpu.memory_space<vmem>>, vector<1x128x128xbf16>
    %5 = vector.shape_cast %4 : vector<1x128x128xbf16> to vector<128x128xbf16>
    %cst = arith.constant dense<0.000000e+00> : vector<128x160xf32>
    %6 = tpu.matmul %5, %3, %cst {dimension_numbers = #tpu.dot_dimension_numbers<[1], [0], [0], [1], [0, 0, 1, 1], [], []>} : vector<128x128xbf16>, vector<128x160xbf16>, vector<128x160xf32> -> vector<128x160xf32>
    %c1 = arith.constant 1 : index
    %c0_5 = arith.constant 0 : index
    %c0_6 = arith.constant 0 : index
    %7 = vector.load %arg2[%c1, %c0_5, %c0_6] : memref<4x128x128xbf16, #tpu.memory_space<vmem>>, vector<1x128x128xbf16>
    %8 = vector.shape_cast %7 : vector<1x128x128xbf16> to vector<128x128xbf16>
    %cst_7 = arith.constant dense<0.000000e+00> : vector<128x160xf32>
    %9 = tpu.matmul %8, %3, %cst_7 {dimension_numbers = #tpu.dot_dimension_numbers<[1], [0], [0], [1], [0, 0, 1, 1], [], []>} : vector<128x128xbf16>, vector<128x160xbf16>, vector<128x160xf32> -> vector<128x160xf32>
    %10 = arith.addf %6, %9 : vector<128x160xf32>
    %c2 = arith.constant 2 : index
    %c0_8 = arith.constant 0 : index
    %c0_9 = arith.constant 0 : index
    %11 = vector.load %arg2[%c2, %c0_8, %c0_9] : memref<4x128x128xbf16, #tpu.memory_space<vmem>>, vector<1x128x128xbf16>
    %12 = vector.shape_cast %11 : vector<1x128x128xbf16> to vector<128x128xbf16>
    %cst_10 = arith.constant dense<0.000000e+00> : vector<128x160xf32>
    %13 = tpu.matmul %12, %3, %cst_10 {dimension_numbers = #tpu.dot_dimension_numbers<[1], [0], [0], [1], [0, 0, 1, 1], [], []>} : vector<128x128xbf16>, vector<128x160xbf16>, vector<128x160xf32> -> vector<128x160xf32>
    %14 = arith.addf %10, %13 : vector<128x160xf32>
    %c3 = arith.constant 3 : index
    %c0_11 = arith.constant 0 : index
    %c0_12 = arith.constant 0 : index
    %15 = vector.load %arg2[%c3, %c0_11, %c0_12] : memref<4x128x128xbf16, #tpu.memory_space<vmem>>, vector<1x128x128xbf16>
    %16 = vector.shape_cast %15 : vector<1x128x128xbf16> to vector<128x128xbf16>
    %cst_13 = arith.constant dense<0.000000e+00> : vector<128x160xf32>
    %17 = tpu.matmul %16, %3, %cst_13 {dimension_numbers = #tpu.dot_dimension_numbers<[1], [0], [0], [1], [0, 0, 1, 1], [], []>} : vector<128x128xbf16>, vector<128x160xbf16>, vector<128x160xf32> -> vector<128x160xf32>
    %18 = arith.addf %14, %17 : vector<128x160xf32>
    %c0_14 = arith.constant 0 : index
    %c0_15 = arith.constant 0 : index
    %19 = vector.load %arg7[%c0_14, %c0_15] : memref<128x160xf32, #tpu.memory_space<vmem>>, vector<128x160xf32>
    %20 = arith.addf %19, %18 : vector<128x160xf32>
    %c0_16 = arith.constant 0 : index
    %c0_17 = arith.constant 0 : index
    %21 = vector.load %arg7[%c0_16, %c0_17] : memref<128x160xf32, #tpu.memory_space<vmem>>, vector<128x160xf32>
    tpu.vector_store %arg7[%c0_16, %c0_17], %20 {strides = array<i32>} : memref<128x160xf32, #tpu.memory_space<vmem>>, vector<128x160xf32>,
    %c0_i32_18 = arith.constant 0 : i32
    %22 = arith.cmpi eq, %arg1, %c0_i32_18 : i32
    %23 = arith.extui %22 : i1 to i32
    %c0_i32_19 = arith.constant 0 : i32
    %24 = arith.cmpi ne, %23, %c0_i32_19 : i32
    scf.if %24 {
      %c0_20 = arith.constant 0 : index
      %c0_21 = arith.constant 0 : index
      %25 = vector.load %arg7[%c0_20, %c0_21] : memref<128x160xf32, #tpu.memory_space<vmem>>, vector<128x160xf32>
      %26 = arith.truncf %25 : vector<128x160xf32> to vector<128x160xbf16>
      %c0_22 = arith.constant 0 : index
      %c0_23 = arith.constant 0 : index
      %27 = vector.load %arg5[%c0_22, %c0_23] : memref<128x160xbf16, #tpu.memory_space<vmem>>, vector<128x160xbf16>
      tpu.vector_store %arg5[%c0_22, %c0_23], %26 {strides = array<i32>} : memref<128x160xbf16, #tpu.memory_space<vmem>>, vector<128x160xbf16>,
      %c0_24 = arith.constant 0 : index
      %c0_25 = arith.constant 0 : index
      %28 = vector.load %arg4[%c0_24, %c0_25] : memref<128x160xf32, #tpu.memory_space<vmem>>, vector<128x160xf32>
      %c0_26 = arith.constant 0 : index
      %c0_27 = arith.constant 0 : index
      %29 = vector.load %arg7[%c0_26, %c0_27] : memref<128x160xf32, #tpu.memory_space<vmem>>, vector<128x160xf32>
      %30 = arith.addf %28, %29 : vector<128x160xf32>
      %c0_28 = arith.constant 0 : index
      %c0_29 = arith.constant 0 : index
      %31 = vector.load %arg6[%c0_28, %c0_29] : memref<128x160xf32, #tpu.memory_space<vmem>>, vector<128x160xf32>
      tpu.vector_store %arg6[%c0_28, %c0_29], %30 {strides = array<i32>} : memref<128x160xf32, #tpu.memory_space<vmem>>, vector<128x160xf32>,
    } else {
    }
    return
  }
  func.func @transform_0(%arg0: i32, %arg1: i32) -> (i32, i32, i32) {
    %c0_i32 = arith.constant 0 : i32
    %c0_i32_0 = arith.constant 0 : i32
    return %c0_i32, %arg0, %arg1 : i32, i32, i32
  }
  func.func @transform_1(%arg0: i32, %arg1: i32) -> (i32, i32) {
    %c0_i32 = arith.constant 0 : i32
    %c0_i32_0 = arith.constant 0 : i32
    return %arg1, %c0_i32 : i32, i32
  }
  func.func @transform_2(%arg0: i32, %arg1: i32) -> (i32, i32) {
    %c0_i32 = arith.constant 0 : i32
    %c0_i32_0 = arith.constant 0 : i32
    return %arg0, %c0_i32 : i32, i32
  }
  func.func @transform_3(%arg0: i32, %arg1: i32) -> (i32, i32) {
    %c0_i32 = arith.constant 0 : i32
    %c0_i32_0 = arith.constant 0 : i32
    return %arg0, %c0_i32 : i32, i32
  }
  func.func @transform_4(%arg0: i32, %arg1: i32) -> (i32, i32) {
    %c0_i32 = arith.constant 0 : i32
    %c0_i32_0 = arith.constant 0 : i32
    return %arg0, %c0_i32 : i32, i32
  }
}

module attributes {stable_mosaic.version = 11 : i64} {
  func.func @_neighbor_hop_kernel(%arg0: i32, %arg1: i32, %arg2: memref<4x128x128xbf16, #tpu.memory_space<vmem>>, %arg3: memref<128x160xbf16, #tpu.memory_space<vmem>>, %arg4: memref<128x160xf32, #tpu.memory_space<vmem>>, %arg5: memref<128x160xbf16, #tpu.memory_space<vmem>>, %arg6: memref<128x160xf32, #tpu.memory_space<vmem>>, %arg7: memref<128x160xf32, #tpu.memory_space<vmem>>) attributes {dimension_semantics = [#tpu.dimension_semantics<parallel>, #tpu.dimension_semantics<arbitrary>], iteration_bounds = array<i64: 1, 1>, scalar_prefetch = 0 : i64, scratch_operands = 1 : i64, tpu.core_type = #tpu.core_type<tc>, window_params = [{transform_indices = @transform_0, window_bounds = array<i64: 4, 128, 128>}, {transform_indices = @transform_1, window_bounds = array<i64: 128, 160>}, {transform_indices = @transform_2, window_bounds = array<i64: 128, 160>}, {transform_indices = @transform_3, window_bounds = array<i64: 128, 160>}, {transform_indices = @transform_4, window_bounds = array<i64: 128, 160>}]} {
    %c0_i32 = arith.constant 0 : i32
    %0 = arith.cmpi eq, %arg1, %c0_i32 : i32
    %1 = arith.extui %0 : i1 to i32
    %c0_i32_0 = arith.constant 0 : i32
    %2 = arith.cmpi ne, %1, %c0_i32_0 : i32
    scf.if %2 {
      %cst_20 = arith.constant 0.000000e+00 : f32
      %25 = vector.broadcast %cst_20 : f32 to vector<128x160xf32>
      %c0_21 = arith.constant 0 : index
      %c0_22 = arith.constant 0 : index
      %26 = vector.load %arg7[%c0_21, %c0_22] : memref<128x160xf32, #tpu.memory_space<vmem>>, vector<128x160xf32>
      tpu.vector_store %arg7[%c0_21, %c0_22], %25 {strides = array<i32>} : memref<128x160xf32, #tpu.memory_space<vmem>>, vector<128x160xf32>,
    } else {
    }
    %c0 = arith.constant 0 : index
    %c0_1 = arith.constant 0 : index
    %3 = vector.load %arg3[%c0, %c0_1] : memref<128x160xbf16, #tpu.memory_space<vmem>>, vector<128x160xbf16>
    %c0_2 = arith.constant 0 : index
    %c0_3 = arith.constant 0 : index
    %c0_4 = arith.constant 0 : index
    %4 = vector.load %arg2[%c0_2, %c0_3, %c0_4] : memref<4x128x128xbf16, #tpu.memory_space<vmem>>, vector<1x128x128xbf16>
    %5 = vector.shape_cast %4 : vector<1x128x128xbf16> to vector<128x128xbf16>
    %cst = arith.constant dense<0.000000e+00> : vector<128x160xf32>
    %6 = tpu.matmul %5, %3, %cst {dimension_numbers = #tpu.dot_dimension_numbers<[1], [0], [0], [1], [0, 0, 1, 1], [], []>} : vector<128x128xbf16>, vector<128x160xbf16>, vector<128x160xf32> -> vector<128x160xf32>
    %c1 = arith.constant 1 : index
    %c0_5 = arith.constant 0 : index
    %c0_6 = arith.constant 0 : index
    %7 = vector.load %arg2[%c1, %c0_5, %c0_6] : memref<4x128x128xbf16, #tpu.memory_space<vmem>>, vector<1x128x128xbf16>
    %8 = vector.shape_cast %7 : vector<1x128x128xbf16> to vector<128x128xbf16>
    %cst_7 = arith.constant dense<0.000000e+00> : vector<128x160xf32>
    %9 = tpu.matmul %8, %3, %cst_7 {dimension_numbers = #tpu.dot_dimension_numbers<[1], [0], [0], [1], [0, 0, 1, 1], [], []>} : vector<128x128xbf16>, vector<128x160xbf16>, vector<128x160xf32> -> vector<128x160xf32>
    %10 = arith.addf %6, %9 : vector<128x160xf32>
    %c2 = arith.constant 2 : index
    %c0_8 = arith.constant 0 : index
    %c0_9 = arith.constant 0 : index
    %11 = vector.load %arg2[%c2, %c0_8, %c0_9] : memref<4x128x128xbf16, #tpu.memory_space<vmem>>, vector<1x128x128xbf16>
    %12 = vector.shape_cast %11 : vector<1x128x128xbf16> to vector<128x128xbf16>
    %cst_10 = arith.constant dense<0.000000e+00> : vector<128x160xf32>
    %13 = tpu.matmul %12, %3, %cst_10 {dimension_numbers = #tpu.dot_dimension_numbers<[1], [0], [0], [1], [0, 0, 1, 1], [], []>} : vector<128x128xbf16>, vector<128x160xbf16>, vector<128x160xf32> -> vector<128x160xf32>
    %14 = arith.addf %10, %13 : vector<128x160xf32>
    %c3 = arith.constant 3 : index
    %c0_11 = arith.constant 0 : index
    %c0_12 = arith.constant 0 : index
    %15 = vector.load %arg2[%c3, %c0_11, %c0_12] : memref<4x128x128xbf16, #tpu.memory_space<vmem>>, vector<1x128x128xbf16>
    %16 = vector.shape_cast %15 : vector<1x128x128xbf16> to vector<128x128xbf16>
    %cst_13 = arith.constant dense<0.000000e+00> : vector<128x160xf32>
    %17 = tpu.matmul %16, %3, %cst_13 {dimension_numbers = #tpu.dot_dimension_numbers<[1], [0], [0], [1], [0, 0, 1, 1], [], []>} : vector<128x128xbf16>, vector<128x160xbf16>, vector<128x160xf32> -> vector<128x160xf32>
    %18 = arith.addf %14, %17 : vector<128x160xf32>
    %c0_14 = arith.constant 0 : index
    %c0_15 = arith.constant 0 : index
    %19 = vector.load %arg7[%c0_14, %c0_15] : memref<128x160xf32, #tpu.memory_space<vmem>>, vector<128x160xf32>
    %20 = arith.addf %19, %18 : vector<128x160xf32>
    %c0_16 = arith.constant 0 : index
    %c0_17 = arith.constant 0 : index
    %21 = vector.load %arg7[%c0_16, %c0_17] : memref<128x160xf32, #tpu.memory_space<vmem>>, vector<128x160xf32>
    tpu.vector_store %arg7[%c0_16, %c0_17], %20 {strides = array<i32>} : memref<128x160xf32, #tpu.memory_space<vmem>>, vector<128x160xf32>,
    %c0_i32_18 = arith.constant 0 : i32
    %22 = arith.cmpi eq, %arg1, %c0_i32_18 : i32
    %23 = arith.extui %22 : i1 to i32
    %c0_i32_19 = arith.constant 0 : i32
    %24 = arith.cmpi ne, %23, %c0_i32_19 : i32
    scf.if %24 {
      %c0_20 = arith.constant 0 : index
      %c0_21 = arith.constant 0 : index
      %25 = vector.load %arg7[%c0_20, %c0_21] : memref<128x160xf32, #tpu.memory_space<vmem>>, vector<128x160xf32>
      %26 = arith.truncf %25 : vector<128x160xf32> to vector<128x160xbf16>
      %c0_22 = arith.constant 0 : index
      %c0_23 = arith.constant 0 : index
      %27 = vector.load %arg5[%c0_22, %c0_23] : memref<128x160xbf16, #tpu.memory_space<vmem>>, vector<128x160xbf16>
      tpu.vector_store %arg5[%c0_22, %c0_23], %26 {strides = array<i32>} : memref<128x160xbf16, #tpu.memory_space<vmem>>, vector<128x160xbf16>,
      %c0_24 = arith.constant 0 : index
      %c0_25 = arith.constant 0 : index
      %28 = vector.load %arg4[%c0_24, %c0_25] : memref<128x160xf32, #tpu.memory_space<vmem>>, vector<128x160xf32>
      %c0_26 = arith.constant 0 : index
      %c0_27 = arith.constant 0 : index
      %29 = vector.load %arg7[%c0_26, %c0_27] : memref<128x160xf32, #tpu.memory_space<vmem>>, vector<128x160xf32>
      %30 = arith.addf %28, %29 : vector<128x160xf32>
      %c0_28 = arith.constant 0 : index
      %c0_29 = arith.constant 0 : index
      %31 = vector.load %arg6[%c0_28, %c0_29] : memref<128x160xf32, #tpu.memory_space<vmem>>, vector<128x160xf32>
      tpu.vector_store %arg6[%c0_28, %c0_29], %30 {strides = array<i32>} : memref<128x160xf32, #tpu.memory_space<vmem>>, vector<128x160xf32>,
    } else {
    }
    return
  }
  func.func @transform_0(%arg0: i32, %arg1: i32) -> (i32, i32, i32) {
    %c0_i32 = arith.constant 0 : i32
    %c0_i32_0 = arith.constant 0 : i32
    return %c0_i32, %arg0, %arg1 : i32, i32, i32
  }
  func.func @transform_1(%arg0: i32, %arg1: i32) -> (i32, i32) {
    %c0_i32 = arith.constant 0 : i32
    %c0_i32_0 = arith.constant 0 : i32
    return %arg1, %c0_i32 : i32, i32
  }
  func.func @transform_2(%arg0: i32, %arg1: i32) -> (i32, i32) {
    %c0_i32 = arith.constant 0 : i32
    %c0_i32_0 = arith.constant 0 : i32
    return %arg0, %c0_i32 : i32, i32
  }
  func.func @transform_3(%arg0: i32, %arg1: i32) -> (i32, i32) {
    %c0_i32 = arith.constant 0 : i32
    %c0_i32_0 = arith.constant 0 : i32
    return %arg0, %c0_i32 : i32, i32
  }
  func.func @transform_4(%arg0: i32, %arg1: i32) -> (i32, i32) {
    %c0_i32 = arith.constant 0 : i32
    %c0_i32_0 = arith.constant 0 : i32
    return %arg0, %c0_i32 : i32, i32
  }
}

module attributes {stable_mosaic.version = 11 : i64} {
  func.func @_matmul_acc_kernel(%arg0: i32, %arg1: i32, %arg2: memref<16x128xbf16, #tpu.memory_space<vmem>>, %arg3: memref<128x160xbf16, #tpu.memory_space<vmem>>, %arg4: memref<16x160xf32, #tpu.memory_space<vmem>>) attributes {dimension_semantics = [#tpu.dimension_semantics<parallel>, #tpu.dimension_semantics<arbitrary>], iteration_bounds = array<i64: 1, 1>, scalar_prefetch = 0 : i64, scratch_operands = 0 : i64, tpu.core_type = #tpu.core_type<tc>, window_params = [{transform_indices = @transform_0, window_bounds = array<i64: 16, 128>}, {transform_indices = @transform_1, window_bounds = array<i64: 128, 160>}, {transform_indices = @transform_2, window_bounds = array<i64: 16, 160>}]} {
    %c0_i32 = arith.constant 0 : i32
    %0 = arith.cmpi eq, %arg1, %c0_i32 : i32
    %1 = arith.extui %0 : i1 to i32
    %c0_i32_0 = arith.constant 0 : i32
    %2 = arith.cmpi ne, %1, %c0_i32_0 : i32
    scf.if %2 {
      %cst_8 = arith.constant 0.000000e+00 : f32
      %9 = vector.broadcast %cst_8 : f32 to vector<16x160xf32>
      %c0_9 = arith.constant 0 : index
      %c0_10 = arith.constant 0 : index
      %10 = vector.load %arg4[%c0_9, %c0_10] : memref<16x160xf32, #tpu.memory_space<vmem>>, vector<16x160xf32>
      tpu.vector_store %arg4[%c0_9, %c0_10], %9 {strides = array<i32>} : memref<16x160xf32, #tpu.memory_space<vmem>>, vector<16x160xf32>,
    } else {
    }
    %c0 = arith.constant 0 : index
    %c0_1 = arith.constant 0 : index
    %3 = vector.load %arg4[%c0, %c0_1] : memref<16x160xf32, #tpu.memory_space<vmem>>, vector<16x160xf32>
    %c0_2 = arith.constant 0 : index
    %c0_3 = arith.constant 0 : index
    %4 = vector.load %arg2[%c0_2, %c0_3] : memref<16x128xbf16, #tpu.memory_space<vmem>>, vector<16x128xbf16>
    %c0_4 = arith.constant 0 : index
    %c0_5 = arith.constant 0 : index
    %5 = vector.load %arg3[%c0_4, %c0_5] : memref<128x160xbf16, #tpu.memory_space<vmem>>, vector<128x160xbf16>
    %cst = arith.constant dense<0.000000e+00> : vector<16x160xf32>
    %6 = tpu.matmul %4, %5, %cst {dimension_numbers = #tpu.dot_dimension_numbers<[1], [0], [0], [1], [0, 0, 1, 1], [], []>} : vector<16x128xbf16>, vector<128x160xbf16>, vector<16x160xf32> -> vector<16x160xf32>
    %7 = arith.addf %3, %6 : vector<16x160xf32>
    %c0_6 = arith.constant 0 : index
    %c0_7 = arith.constant 0 : index
    %8 = vector.load %arg4[%c0_6, %c0_7] : memref<16x160xf32, #tpu.memory_space<vmem>>, vector<16x160xf32>
    tpu.vector_store %arg4[%c0_6, %c0_7], %7 {strides = array<i32>} : memref<16x160xf32, #tpu.memory_space<vmem>>, vector<16x160xf32>,
    return
  }
  func.func @transform_0(%arg0: i32, %arg1: i32) -> (i32, i32) {
    %c0_i32 = arith.constant 0 : i32
    return %arg0, %arg1 : i32, i32
  }
  func.func @transform_1(%arg0: i32, %arg1: i32) -> (i32, i32) {
    %c0_i32 = arith.constant 0 : i32
    %c0_i32_0 = arith.constant 0 : i32
    return %arg1, %c0_i32 : i32, i32
  }
  func.func @transform_2(%arg0: i32, %arg1: i32) -> (i32, i32) {
    %c0_i32 = arith.constant 0 : i32
    %c0_i32_0 = arith.constant 0 : i32
    return %arg0, %c0_i32 : i32, i32
  }
}

module attributes {stable_mosaic.version = 11 : i64} {
  func.func @_aggregator_hops_kernel(%arg0: i32, %arg1: i32, %arg2: memref<16x160xf32, #tpu.memory_space<vmem>>, %arg3: memref<16x160xf32, #tpu.memory_space<vmem>>, %arg4: memref<160x4xf32, #tpu.memory_space<vmem>>, %arg5: memref<4x160xf32, #tpu.memory_space<vmem>>, %arg6: memref<16x160xf32, #tpu.memory_space<vmem>>, %arg7: memref<16x160xf32, #tpu.memory_space<vmem>>) attributes {dimension_semantics = [#tpu.dimension_semantics<parallel>, #tpu.dimension_semantics<arbitrary>], iteration_bounds = array<i64: 1, 2>, scalar_prefetch = 0 : i64, scratch_operands = 1 : i64, tpu.core_type = #tpu.core_type<tc>, window_params = [{transform_indices = @transform_0, window_bounds = array<i64: 16, 160>}, {transform_indices = @transform_1, window_bounds = array<i64: 16, 160>}, {pipeline_mode = #tpu.pipeline_mode<synchronous>, transform_indices = @transform_2, window_bounds = array<i64: 160, 4>}, {pipeline_mode = #tpu.pipeline_mode<synchronous>, transform_indices = @transform_3, window_bounds = array<i64: 4, 160>}, {transform_indices = @transform_4, window_bounds = array<i64: 16, 160>}]} {
    %c0_i32 = arith.constant 0 : i32
    %0 = arith.cmpi eq, %arg1, %c0_i32 : i32
    %1 = arith.extui %0 : i1 to i32
    %c0_i32_0 = arith.constant 0 : i32
    %2 = arith.cmpi ne, %1, %c0_i32_0 : i32
    scf.if %2 {
      %c0_19 = arith.constant 0 : index
      %c0_20 = arith.constant 0 : index
      %63 = vector.load %arg2[%c0_19, %c0_20] : memref<16x160xf32, #tpu.memory_space<vmem>>, vector<16x160xf32>
      %c0_21 = arith.constant 0 : index
      %c0_22 = arith.constant 0 : index
      %64 = vector.load %arg7[%c0_21, %c0_22] : memref<16x160xf32, #tpu.memory_space<vmem>>, vector<16x160xf32>
      tpu.vector_store %arg7[%c0_21, %c0_22], %63 {strides = array<i32>} : memref<16x160xf32, #tpu.memory_space<vmem>>, vector<16x160xf32>,
      %c0_23 = arith.constant 0 : index
      %c0_24 = arith.constant 0 : index
      %65 = vector.load %arg2[%c0_23, %c0_24] : memref<16x160xf32, #tpu.memory_space<vmem>>, vector<16x160xf32>
      %c0_25 = arith.constant 0 : index
      %c0_26 = arith.constant 0 : index
      %66 = vector.load %arg6[%c0_25, %c0_26] : memref<16x160xf32, #tpu.memory_space<vmem>>, vector<16x160xf32>
      tpu.vector_store %arg6[%c0_25, %c0_26], %65 {strides = array<i32>} : memref<16x160xf32, #tpu.memory_space<vmem>>, vector<16x160xf32>,
    } else {
    }
    %c0 = arith.constant 0 : index
    %c0_1 = arith.constant 0 : index
    %3 = vector.load %arg7[%c0, %c0_1] : memref<16x160xf32, #tpu.memory_space<vmem>>, vector<16x160xf32>
    %c0_2 = arith.constant 0 : index
    %c0_3 = arith.constant 0 : index
    %4 = vector.load %arg3[%c0_2, %c0_3] : memref<16x160xf32, #tpu.memory_space<vmem>>, vector<16x160xf32>
    %c0_4 = arith.constant 0 : index
    %c0_5 = arith.constant 0 : index
    %5 = vector.load %arg4[%c0_4, %c0_5] : memref<160x4xf32, #tpu.memory_space<vmem>>, vector<160x4xf32>
    %cst = arith.constant dense<0.000000e+00> : vector<16x4xf32>
    %6 = tpu.matmul %3, %5, %cst {dimension_numbers = #tpu.dot_dimension_numbers<[1], [0], [0], [1], [0, 0, 1, 1], [], []>} : vector<16x160xf32>, vector<160x4xf32>, vector<16x4xf32> -> vector<16x4xf32>
    %7 = vector.extract_strided_slice %6 {offsets = [0, 0], sizes = [16, 1], strides = [1, 1]} : vector<16x4xf32> to vector<16x1xf32>
    %8 = vector.extract_strided_slice %6 {offsets = [0, 1], sizes = [16, 1], strides = [1, 1]} : vector<16x4xf32> to vector<16x1xf32>
    %9 = vector.extract_strided_slice %6 {offsets = [0, 2], sizes = [16, 1], strides = [1, 1]} : vector<16x4xf32> to vector<16x1xf32>
    %10 = vector.extract_strided_slice %6 {offsets = [0, 3], sizes = [16, 1], strides = [1, 1]} : vector<16x4xf32> to vector<16x1xf32>
    %11 = arith.maximumf %7, %8 : vector<16x1xf32>
    %12 = arith.maximumf %11, %9 : vector<16x1xf32>
    %13 = arith.maximumf %12, %10 : vector<16x1xf32>
    %14 = arith.subf %7, %13 : vector<16x1xf32>
    %15 = math.exp %14 : vector<16x1xf32>
    %16 = arith.subf %8, %13 : vector<16x1xf32>
    %17 = math.exp %16 : vector<16x1xf32>
    %18 = arith.subf %9, %13 : vector<16x1xf32>
    %19 = math.exp %18 : vector<16x1xf32>
    %20 = arith.subf %10, %13 : vector<16x1xf32>
    %21 = math.exp %20 : vector<16x1xf32>
    %22 = arith.addf %15, %17 : vector<16x1xf32>
    %23 = arith.addf %22, %19 : vector<16x1xf32>
    %24 = arith.addf %23, %21 : vector<16x1xf32>
    %25 = tpu.reciprocal %24 {approx = true} : vector<16x1xf32> -> vector<16x1xf32>
    %26 = arith.mulf %15, %25 : vector<16x1xf32>
    %c0_6 = arith.constant 0 : index
    %c0_7 = arith.constant 0 : index
    %27 = vector.load %arg5[%c0_6, %c0_7] : memref<4x160xf32, #tpu.memory_space<vmem>>, vector<1x160xf32>
    %28 = vector.broadcast %26 : vector<16x1xf32> to vector<16x160xf32>
    %29 = vector.broadcast %27 : vector<1x160xf32> to vector<16x160xf32>
    %30 = arith.mulf %28, %29 : vector<16x160xf32>
    %31 = arith.mulf %17, %25 : vector<16x1xf32>
    %c1 = arith.constant 1 : index
    %c0_8 = arith.constant 0 : index
    %32 = vector.load %arg5[%c1, %c0_8] : memref<4x160xf32, #tpu.memory_space<vmem>>, vector<1x160xf32>
    %33 = vector.broadcast %31 : vector<16x1xf32> to vector<16x160xf32>
    %34 = vector.broadcast %32 : vector<1x160xf32> to vector<16x160xf32>
    %35 = arith.mulf %33, %34 : vector<16x160xf32>
    %36 = arith.addf %30, %35 : vector<16x160xf32>
    %37 = arith.mulf %19, %25 : vector<16x1xf32>
    %c2 = arith.constant 2 : index
    %c0_9 = arith.constant 0 : index
    %38 = vector.load %arg5[%c2, %c0_9] : memref<4x160xf32, #tpu.memory_space<vmem>>, vector<1x160xf32>
    %39 = vector.broadcast %37 : vector<16x1xf32> to vector<16x160xf32>
    %40 = vector.broadcast %38 : vector<1x160xf32> to vector<16x160xf32>
    %41 = arith.mulf %39, %40 : vector<16x160xf32>
    %42 = arith.addf %36, %41 : vector<16x160xf32>
    %43 = arith.mulf %21, %25 : vector<16x1xf32>
    %c3 = arith.constant 3 : index
    %c0_10 = arith.constant 0 : index
    %44 = vector.load %arg5[%c3, %c0_10] : memref<4x160xf32, #tpu.memory_space<vmem>>, vector<1x160xf32>
    %45 = vector.broadcast %43 : vector<16x1xf32> to vector<16x160xf32>
    %46 = vector.broadcast %44 : vector<1x160xf32> to vector<16x160xf32>
    %47 = arith.mulf %45, %46 : vector<16x160xf32>
    %48 = arith.addf %42, %47 : vector<16x160xf32>
    %49 = arith.mulf %4, %48 : vector<16x160xf32>
    %50 = arith.addf %49, %4 : vector<16x160xf32>
    %51 = arith.mulf %50, %50 : vector<16x160xf32>
    %cst_11 = arith.constant dense<0.000000e+00> : vector<16xf32>
    %52 = vector.multi_reduction <add>, %51, %cst_11 [1] : vector<16x160xf32> to vector<16xf32>
    %53 = vector.shape_cast %52 : vector<16xf32> to vector<16x1xf32>
    %cst_12 = arith.constant 1.000000e-24 : f32
    %54 = vector.broadcast %cst_12 : f32 to vector<16x1xf32>
    %55 = arith.maximumf %53, %54 : vector<16x1xf32>
    %56 = math.rsqrt %55 : vector<16x1xf32>
    %57 = vector.broadcast %56 : vector<16x1xf32> to vector<16x160xf32>
    %58 = arith.mulf %50, %57 : vector<16x160xf32>
    %c0_13 = arith.constant 0 : index
    %c0_14 = arith.constant 0 : index
    %59 = vector.load %arg7[%c0_13, %c0_14] : memref<16x160xf32, #tpu.memory_space<vmem>>, vector<16x160xf32>
    tpu.vector_store %arg7[%c0_13, %c0_14], %58 {strides = array<i32>} : memref<16x160xf32, #tpu.memory_space<vmem>>, vector<16x160xf32>,
    %c0_15 = arith.constant 0 : index
    %c0_16 = arith.constant 0 : index
    %60 = vector.load %arg6[%c0_15, %c0_16] : memref<16x160xf32, #tpu.memory_space<vmem>>, vector<16x160xf32>
    %61 = arith.addf %60, %58 : vector<16x160xf32>
    %c0_17 = arith.constant 0 : index
    %c0_18 = arith.constant 0 : index
    %62 = vector.load %arg6[%c0_17, %c0_18] : memref<16x160xf32, #tpu.memory_space<vmem>>, vector<16x160xf32>
    tpu.vector_store %arg6[%c0_17, %c0_18], %61 {strides = array<i32>} : memref<16x160xf32, #tpu.memory_space<vmem>>, vector<16x160xf32>,
    return
  }
  func.func @transform_0(%arg0: i32, %arg1: i32) -> (i32, i32) {
    %c0_i32 = arith.constant 0 : i32
    %c0_i32_0 = arith.constant 0 : i32
    return %arg0, %c0_i32 : i32, i32
  }
  func.func @transform_1(%arg0: i32, %arg1: i32) -> (i32, i32) {
    %c0_i32 = arith.constant 0 : i32
    %c0_i32_0 = arith.constant 0 : i32
    return %arg0, %c0_i32 : i32, i32
  }
  func.func @transform_2(%arg0: i32, %arg1: i32) -> (i32, i32) {
    %c0_i32 = arith.constant 0 : i32
    %c0_i32_0 = arith.constant 0 : i32
    %c0_i32_1 = arith.constant 0 : i32
    return %c0_i32, %c0_i32_0 : i32, i32
  }
  func.func @transform_3(%arg0: i32, %arg1: i32) -> (i32, i32) {
    %c0_i32 = arith.constant 0 : i32
    %c0_i32_0 = arith.constant 0 : i32
    %c0_i32_1 = arith.constant 0 : i32
    return %c0_i32, %c0_i32_0 : i32, i32
  }
  func.func @transform_4(%arg0: i32, %arg1: i32) -> (i32, i32) {
    %c0_i32 = arith.constant 0 : i32
    %c0_i32_0 = arith.constant 0 : i32
    return %arg0, %c0_i32 : i32, i32
  }
}

module attributes {stable_mosaic.version = 11 : i64} {
  func.func @_bpr_kernel(%arg0: memref<4x160xf32, #tpu.memory_space<vmem>>, %arg1: memref<4x160xf32, #tpu.memory_space<vmem>>, %arg2: memref<4x160xf32, #tpu.memory_space<vmem>>, %arg3: memref<4xf32, #tpu.memory_space<smem>>) attributes {dimension_semantics = [], scalar_prefetch = 0 : i64, scratch_operands = 0 : i64, tpu.core_type = #tpu.core_type<tc>} {
    %c0 = arith.constant 0 : index
    %c0_0 = arith.constant 0 : index
    %0 = vector.load %arg0[%c0, %c0_0] : memref<4x160xf32, #tpu.memory_space<vmem>>, vector<4x160xf32>
    %c0_1 = arith.constant 0 : index
    %c0_2 = arith.constant 0 : index
    %1 = vector.load %arg1[%c0_1, %c0_2] : memref<4x160xf32, #tpu.memory_space<vmem>>, vector<4x160xf32>
    %c0_3 = arith.constant 0 : index
    %c0_4 = arith.constant 0 : index
    %2 = vector.load %arg2[%c0_3, %c0_4] : memref<4x160xf32, #tpu.memory_space<vmem>>, vector<4x160xf32>
    %3 = arith.mulf %0, %1 : vector<4x160xf32>
    %cst = arith.constant dense<0.000000e+00> : vector<4xf32>
    %4 = vector.multi_reduction <add>, %3, %cst [1] : vector<4x160xf32> to vector<4xf32>
    %5 = vector.shape_cast %4 : vector<4xf32> to vector<4x1xf32>
    %6 = arith.mulf %0, %2 : vector<4x160xf32>
    %cst_5 = arith.constant dense<0.000000e+00> : vector<4xf32>
    %7 = vector.multi_reduction <add>, %6, %cst_5 [1] : vector<4x160xf32> to vector<4xf32>
    %8 = vector.shape_cast %7 : vector<4xf32> to vector<4x1xf32>
    %9 = arith.subf %5, %8 : vector<4x1xf32>
    %cst_6 = arith.constant 0.000000e+00 : f32
    %10 = vector.broadcast %cst_6 : f32 to vector<4x1xf32>
    %11 = arith.minimumf %9, %10 : vector<4x1xf32>
    %12 = math.absf %9 : vector<4x1xf32>
    %cst_7 = arith.constant 0.000000e+00 : f32
    %13 = vector.broadcast %cst_7 : f32 to vector<4x1xf32>
    %14 = arith.subf %13, %12 : vector<4x1xf32>
    %15 = math.exp %14 : vector<4x1xf32>
    %16 = math.log1p %15 : vector<4x1xf32>
    %17 = arith.subf %11, %16 : vector<4x1xf32>
    %18 = vector.shape_cast %17 : vector<4x1xf32> to vector<1x4x1xf32>
    %cst_8 = arith.constant dense<0.000000e+00> : vector<1xf32>
    %19 = vector.multi_reduction <add>, %18, %cst_8 [1, 2] : vector<1x4x1xf32> to vector<1xf32>
    %20 = vector.shape_cast %19 : vector<1xf32> to vector<1x1x1xf32>
    %21 = vector.extract %20[0, 0, 0] : f32 from vector<1x1x1xf32>
    %c0_9 = arith.constant 0 : index
    %22 = memref.load %arg3[%c0_9] : memref<4xf32, #tpu.memory_space<smem>>
    memref.store %21, %arg3[%c0_9] : memref<4xf32, #tpu.memory_space<smem>>
    %23 = arith.mulf %0, %0 : vector<4x160xf32>
    %24 = vector.shape_cast %23 : vector<4x160xf32> to vector<1x4x160xf32>
    %cst_10 = arith.constant dense<0.000000e+00> : vector<1xf32>
    %25 = vector.multi_reduction <add>, %24, %cst_10 [1, 2] : vector<1x4x160xf32> to vector<1xf32>
    %26 = vector.shape_cast %25 : vector<1xf32> to vector<1x1x1xf32>
    %27 = vector.extract %26[0, 0, 0] : f32 from vector<1x1x1xf32>
    %c1 = arith.constant 1 : index
    %28 = memref.load %arg3[%c1] : memref<4xf32, #tpu.memory_space<smem>>
    memref.store %27, %arg3[%c1] : memref<4xf32, #tpu.memory_space<smem>>
    %29 = arith.mulf %1, %1 : vector<4x160xf32>
    %30 = vector.shape_cast %29 : vector<4x160xf32> to vector<1x4x160xf32>
    %cst_11 = arith.constant dense<0.000000e+00> : vector<1xf32>
    %31 = vector.multi_reduction <add>, %30, %cst_11 [1, 2] : vector<1x4x160xf32> to vector<1xf32>
    %32 = vector.shape_cast %31 : vector<1xf32> to vector<1x1x1xf32>
    %33 = vector.extract %32[0, 0, 0] : f32 from vector<1x1x1xf32>
    %c2 = arith.constant 2 : index
    %34 = memref.load %arg3[%c2] : memref<4xf32, #tpu.memory_space<smem>>
    memref.store %33, %arg3[%c2] : memref<4xf32, #tpu.memory_space<smem>>
    %35 = arith.mulf %2, %2 : vector<4x160xf32>
    %36 = vector.shape_cast %35 : vector<4x160xf32> to vector<1x4x160xf32>
    %cst_12 = arith.constant dense<0.000000e+00> : vector<1xf32>
    %37 = vector.multi_reduction <add>, %36, %cst_12 [1, 2] : vector<1x4x160xf32> to vector<1xf32>
    %38 = vector.shape_cast %37 : vector<1xf32> to vector<1x1x1xf32>
    %39 = vector.extract %38[0, 0, 0] : f32 from vector<1x1x1xf32>
    %c3 = arith.constant 3 : index
    %40 = memref.load %arg3[%c3] : memref<4xf32, #tpu.memory_space<smem>>
    memref.store %39, %arg3[%c3] : memref<4xf32, #tpu.memory_space<smem>>
    return
  }
}

</mosaic_0001>

<bundles_post_ra>
// kernel: recommender_forward.9
= control target key start
LH: loop header
LB: loop body
LE: loop exit
PB: predicated region body
PF: predicated region fallthrough
CT: control target
= control target key end

     0   :  { %vm16_vm0 = vcmask 261120   ;;  %v255_v49 = vmov 0.0   ;;  %s394_s1 = inlined_call_operand.vmem [shape: bf16[128,160], index: 1, kind: input, shape index: {}]   ;;  %s395_s0 = inlined_call_operand.vmem [shape: bf16[16,128], index: 0, kind: input, shape index: {}]   ;;  %s396_s2 = inlined_call_operand.vmem [shape: f32[16,160], index: 2, kind: output, shape index: {}]  }
   0x1   :  { %v231_v0 = vld [vmem:[%s394_s1 + $0x70] sm:$0xf]  ;;  %v253_v1 = vld [vmem:[%s394_s1 + $0x74] sm:$0xf0]  ;;  %v252_v2 = vld [vmem:[%s394_s1 + $0x74] sm:$0xf] }
   0x2   :  { %v232_v3 = vor.u32 %v253_v1, %v231_v0  ;;  %v233_v4 = vld [vmem:[%s394_s1 + $0x78] sm:$0xf0]  ;;  %v223_v5 = vld [vmem:[%s394_s1 + $0x60] sm:$0xf]  ;;  %v251_v6 = vld [vmem:[%s394_s1 + $0x64] sm:$0xf0] }
   0x3   :  { %v236_v7 = vor.u32 %v252_v2, %v233_v4  ;;  %v250_v8 = vld [vmem:[%s394_s1 + $0x64] sm:$0xf]  ;;  %v225_v9 = vld [vmem:[%s394_s1 + $0x68] sm:$0xf0]  ;;  %v224_v10 = vor.u32 %v251_v6, %v223_v5  ;;  %v215_v12 = vld [vmem:[%s394_s1 + $0x50] sm:$0xf] }
   0x4   :  { %128 = vmatpush.bf16.msra.mxu0 %v232_v3  ;;  %v228_v11 = vor.u32 %v250_v8, %v225_v9  ;;  %v249_v13 = vld [vmem:[%s394_s1 + $0x54] sm:$0xf0]  ;;  %v248_v14 = vld [vmem:[%s394_s1 + $0x54] sm:$0xf]  ;;  %v217_v15 = vld [vmem:[%s394_s1 + $0x58] sm:$0xf0] }
   0x5   :  { %142 = vmatpush.bf16.msra.mxu1 %v236_v7  ;;  %v216_v16 = vor.u32 %v249_v13, %v215_v12  ;;  %v220_v17 = vor.u32 %v248_v14, %v217_v15  ;;  %v207_v18 = vld [vmem:[%s394_s1 + $0x40] sm:$0xf]  ;;  %v247_v19 = vld [vmem:[%s394_s1 + $0x44] sm:$0xf0]  ;;  %v246_v20 = vld [vmem:[%s394_s1 + $0x44] sm:$0xf] }
   0x6   :  { %v209_v21 = vld [vmem:[%s394_s1 + $0x48] sm:$0xf0]  ;;  %v208_v22 = vor.u32 %v247_v19, %v207_v18  ;;  %v199_v24 = vld [vmem:[%s394_s1 + $0x30] sm:$0xf]  ;;  %v245_v25 = vld [vmem:[%s394_s1 + $0x34] sm:$0xf0] }
   0x7   :  { %v212_v23 = vor.u32 %v246_v20, %v209_v21  ;;  %v244_v26 = vld [vmem:[%s394_s1 + $0x34] sm:$0xf]  ;;  %v201_v27 = vld [vmem:[%s394_s1 + $0x38] sm:$0xf0]  ;;  %v200_v28 = vor.u32 %v245_v25, %v199_v24  ;;  %v191_v30 = vld [vmem:[%s394_s1 + $0x20] sm:$0xf] }
   0x8   :  { %129 = vmatpush.bf16.msra.mxu0 %v224_v10  ;;  %v204_v29 = vor.u32 %v244_v26, %v201_v27  ;;  %v243_v31 = vld [vmem:[%s394_s1 + $0x24] sm:$0xf0]  ;;  %v242_v32 = vld [vmem:[%s394_s1 + $0x24] sm:$0xf]  ;;  %v193_v33 = vld [vmem:[%s394_s1 + $0x28] sm:$0xf0] }
   0x9   :  { %143 = vmatpush.bf16.msra.mxu1 %v228_v11  ;;  %v192_v34 = vor.u32 %v243_v31, %v191_v30  ;;  %v196_v35 = vor.u32 %v242_v32, %v193_v33  ;;  %v183_v36 = vld [vmem:[%s394_s1 + $0x10] sm:$0xf]  ;;  %v241_v37 = vld [vmem:[%s394_s1 + $0x14] sm:$0xf0]  ;;  %v240_v38 = vld [vmem:[%s394_s1 + $0x14] sm:$0xf] }
   0xa   :  { %v185_v39 = vld [vmem:[%s394_s1 + $0x18] sm:$0xf0]  ;;  %v184_v40 = vor.u32 %v241_v37, %v183_v36  ;;  %v175_v42 = vld [vmem:[%s394_s1] sm:$0xf]  ;;  %v239_v43 = vld [vmem:[%s394_s1 + $0x4] sm:$0xf0] }
   0xb   :  { %v188_v41 = vor.u32 %v240_v38, %v185_v39  ;;  %v238_v44 = vld [vmem:[%s394_s1 + $0x4] sm:$0xf]  ;;  %v177_v45 = vld [vmem:[%s394_s1 + $0x8] sm:$0xf0]  ;;  %v176_v46 = vor.u32 %v239_v43, %v175_v42  ;;  %17 = vst.msk [vmem:[%s396_s2 + $0x8] sm:$0xff] %vm16_vm0, %v255_v49 }
   0xc   :  { %130 = vmatpush.bf16.msra.mxu0 %v216_v16  ;;  %v180_v47 = vor.u32 %v238_v44, %v177_v45  ;;  %v237_v48 = vld [vmem:[%s395_s0] sm:$0xff]  ;;  %19 = vst.msk [vmem:[%s396_s2 + $0x18] sm:$0xff] %vm16_vm0, %v255_v49 }
   0xd   :  { %144 = vmatpush.bf16.msra.mxu1 %v220_v17 }
  0x10   :  { %131 = vmatpush.bf16.msra.mxu0 %v208_v22 }
  0x11   :  { %145 = vmatpush.bf16.msra.mxu1 %v212_v23 }
  0x12   :  { %v21_v50 = vld [vmem:[%s396_s2 + $0x8] sm:$0xff] }
  0x13   :  { %v23_v54 = vld [vmem:[%s396_s2 + $0x18] sm:$0xff] }
  0x14   :  { %132 = vmatpush.bf16.msra.mxu0 %v200_v28 }
  0x15   :  { %146 = vmatpush.bf16.msra.mxu1 %v204_v29 }
  0x18   :  { %133 = vmatpush.bf16.msra.mxu0 %v192_v34 }
  0x19   :  { %147 = vmatpush.bf16.msra.mxu1 %v196_v35 }
  0x1c   :  { %134 = vmatpush.bf16.msra.mxu0 %v184_v40 }
  0x1d   :  { %148 = vmatpush.bf16.msra.mxu1 %v188_v41 }
  0x20   :  { %135 = vmatpush.bf16.msra.mxu0 %v176_v46 }
  0x21   :  { %149 = vmatpush.bf16.msra.mxu1 %v180_v47 }
  0x23   :  { %136 = vmatmul.bf16.vlgmr.msra.gmra.mxu0 %v237_v48 }
  0x24   :  { %150 = vmatmul.bf16.vlgmr.msra.gmra.mxu1 %v237_v48 }
  0xa0   :  { %v137_v51 = vpop.f32.mrf.mxu0 }
  0xa1   :  { %v151_v52 = vpop.f32.mrf.mxu1  ;;  %160 = vst [vmem:[%s396_s2] sm:$0xff] %v137_v51 }
  0xa2   :  { %v157_v53 = vadd.f32 %v151_v52, %v21_v50 }
  0xa4   :  { %162 = vst.msk [vmem:[%s396_s2 + $0x8] sm:$0xff] %vm16_vm0, %v157_v53 }
  0xa8   :  { %v139_v55 = vpop.f32.mrf.mxu0 }
  0xa9   :  { %v153_v56 = vpop.f32.mrf.mxu1  ;;  %163 = vst [vmem:[%s396_s2 + $0x10] sm:$0xff] %v139_v55 }
  0xaa   :  { %v159_v57 = vadd.f32 %v153_v56, %v23_v54 }
  0xac   :  { %164 = vst.msk [vmem:[%s396_s2 + $0x18] sm:$0xff] %vm16_vm0, %v159_v57 }

// kernel: recommender_forward.6
= control target key start
LH: loop header
LB: loop body
LE: loop exit
PB: predicated region body
PF: predicated region fallthrough
CT: control target
= control target key end

     0   :  { %vm19_vm0 = vcmask 261120   ;;  %s2222_s2 = inlined_call_operand.vmem [shape: bf16[4,160], index: 2, kind: input, shape index: {}]   ;;  %s2223_s1 = inlined_call_operand.vmem [shape: bf16[128,160], index: 1, kind: input, shape index: {}]   ;;  %s2224_s0 = inlined_call_operand.vmem [shape: bf16[4,128,128], index: 0, kind: input, shape index: {}]   ;;  %s2225_s3 = inlined_call_operand.vmem [shape: f32[128,160], index: 3, kind: output, shape index: {}]  }
   0x1   :  { %v83_v0 = vld [vmem:[%s2222_s2] sm:$0x5]  ;;  %v65_v1 = vld [vmem:[%s2223_s1 + $0x70] sm:$0xff]  ;;  %v66_v2 = vld [vmem:[%s2223_s1 + $0x78] sm:$0xff] }
   0x2   :  { %85 = vst [vmem:[#allocation1] ss:$4 sm:$0xff] %v83_v0  ;;  %v193_v3 = vld [vmem:[%s2222_s2] sm:$0x5]  ;;  %v64_v5 = vld [vmem:[%s2223_s1 + $0x68] sm:$0xff]  ;;  %v1411_v9 = vunpack.c.l.bf16 %v65_v1  ;;  %v1413_v10 = vunpack.c.l.bf16 %v66_v2  ;;  %v61_v12 = vld [vmem:[%s2223_s1 + $0x50] sm:$0xff]  ;;  %v1421_v14 = vunpack.c.h.bf16 %v65_v1  ;;  %v1423_v15 = vunpack.c.h.bf16 %v66_v2 }
   0x3   :  { %v63_v4 = vld [vmem:[%s2223_s1 + $0x60] sm:$0xff]  ;;  %v62_v13 = vld [vmem:[%s2223_s1 + $0x58] sm:$0xff]  ;;  %v1427_v17 = vunpack.c.l.bf16 %v64_v5  ;;  %v60_v19 = vld [vmem:[%s2223_s1 + $0x48] sm:$0xff]  ;;  %v1437_v23 = vunpack.c.h.bf16 %v64_v5  ;;  %v1445_v26 = vunpack.c.l.bf16 %v61_v12  ;;  %v1449_v28 = vunpack.c.h.bf16 %v61_v12 }
   0x4   :  { %v1425_v16 = vunpack.c.l.bf16 %v63_v4  ;;  %v59_v18 = vld [vmem:[%s2223_s1 + $0x40] sm:$0xff]  ;;  %v1435_v22 = vunpack.c.h.bf16 %v63_v4  ;;  %v57_v24 = vld [vmem:[%s2223_s1 + $0x30] sm:$0xff]  ;;  %v58_v25 = vld [vmem:[%s2223_s1 + $0x38] sm:$0xff]  ;;  %v1447_v27 = vunpack.c.l.bf16 %v62_v13  ;;  %v1451_v29 = vunpack.c.h.bf16 %v62_v13 }
   0x5   :  { %v1457_v32 = vunpack.c.l.bf16 %v59_v18  ;;  %v1459_v33 = vunpack.c.l.bf16 %v60_v19  ;;  %v565_v34 = vld [vmem:[%s2222_s2] sm:$0xa]  ;;  %v1464_v35 = vunpack.c.h.bf16 %v59_v18  ;;  %v1466_v36 = vunpack.c.h.bf16 %v60_v19  ;;  %v56_v54 = vld [vmem:[%s2223_s1 + $0x28] sm:$0xff] }
   0x6   :  { %v1468_v37 = vunpack.c.l.bf16 %v57_v24  ;;  %v1470_v38 = vunpack.c.l.bf16 %v58_v25  ;;  %v1488_v51 = vunpack.c.h.bf16 %v57_v24  ;;  %v1490_v52 = vunpack.c.h.bf16 %v58_v25  ;;  %v55_v53 = vld [vmem:[%s2223_s1 + $0x20] sm:$0xff] }
   0x7   :  { %2236 = vst [vmem:[#allocation2_spill] sm:$0xff] %v1466_v36  ;;  %v1510_v1 = vunpack.c.l.bf16 %v55_v53  ;;  %v1512_v2 = vunpack.c.l.bf16 %v56_v54  ;;  %v1535_v18 = vunpack.c.h.bf16 %v55_v53  ;;  %v1537_v19 = vunpack.c.h.bf16 %v56_v54 }
   0x8   :  { %2237 = vst [vmem:[#allocation3_spill] sm:$0xff] %v1468_v37 }
   0x9   :  { %v86_v6 = vld.sshfl [vmem:[#allocation1] sm:$0xff pattern:$0x73625140]  ;;  %v87_v7 = vld.sshfl [vmem:[#allocation1 + $0x8] sm:$0xff pattern:$0x73625140] }
   0xa   :  { %v88_v8 = vpack.i.b16 %v86_v6, %v86_v6  ;;  %v91_v11 = vpack.i.b16 %v87_v7, %v87_v7  ;;  %195 = vst [vmem:[#allocation1] ss:$4 sm:$0xff] %v193_v3  ;;  %v53_v7 = vld [vmem:[%s2223_s1 + $0x10] sm:$0xff] }
   0xb   :  { %2238 = vst [vmem:[#allocation4_spill] sm:$0xff] %v1470_v38 }
   0xc   :  { %v90_v20 = vperm.slane %v88_v8, 0  ;;  %v93_v21 = vperm.slane %v91_v11, 0  ;;  %2239 = vst [vmem:[#allocation5_spill] sm:$0xff] %v1488_v51  ;;  %v54_v8 = vld [vmem:[%s2223_s1 + $0x18] sm:$0xff]  ;;  %v821_v11 = vld [vmem:[%s2222_s2] sm:$0xa] }
   0xd   :  { %2240 = vst [vmem:[#allocation6_spill] sm:$0xff] %v1490_v52 }
   0xe   :  { %v1453_v30 = vunpack.c.l.bf16 %v90_v20  ;;  %v1455_v31 = vunpack.c.l.bf16 %v93_v21 }
  0x10   :  { %v156_v39 = vmul.f32 %v1453_v30, %v1411_v9  ;;  %v158_v40 = vmul.f32 %v1453_v30, %v1413_v10  ;;  %v157_v41 = vmul.f32 %v1455_v31, %v1421_v14  ;;  %v159_v42 = vmul.f32 %v1455_v31, %v1423_v15 }
  0x11   :  { %v152_v43 = vmul.f32 %v1453_v30, %v1425_v16  ;;  %v154_v44 = vmul.f32 %v1453_v30, %v1427_v17  ;;  %v153_v45 = vmul.f32 %v1455_v31, %v1435_v22  ;;  %v155_v46 = vmul.f32 %v1455_v31, %v1437_v23  ;;  %v196_v47 = vld.sshfl [vmem:[#allocation1] sm:$0xff pattern:$0x73625140]  ;;  %v197_v48 = vld.sshfl [vmem:[#allocation1 + $0x8] sm:$0xff pattern:$0x73625140] }
  0x12   :  { %v174_v49 = vpack.c.bf16 %v158_v40, %v156_v39  ;;  %v175_v50 = vpack.c.bf16 %v159_v42, %v157_v41  ;;  %567 = vst [vmem:[#allocation1] ss:$4 sm:$0xff] %v565_v34  ;;  %v148_v57 = vmul.f32 %v1453_v30, %v1445_v26  ;;  %v150_v58 = vmul.f32 %v1453_v30, %v1447_v27 }
  0x13   :  { %v172_v55 = vpack.c.bf16 %v154_v44, %v152_v43  ;;  %v173_v56 = vpack.c.bf16 %v155_v46, %v153_v45  ;;  %v149_v59 = vmul.f32 %v1455_v31, %v1449_v28  ;;  %v151_v60 = vmul.f32 %v1455_v31, %v1451_v29 }
  0x14   :  { %450 = vmatpush.bf16.msra.mxu2 %v174_v49  ;;  %499 = vmatpush.bf16.msra.mxu3 %v175_v50  ;;  %v198_v61 = vshrl.u32 %v196_v47, 16  ;;  %v202_v62 = vshrl.u32 %v197_v48, 16  ;;  %v144_v63 = vmul.f32 %v1453_v30, %v1457_v32  ;;  %v146_v0 = vmul.f32 %v1453_v30, %v1459_v33 }
  0x15   :  { %v145_v5 = vmul.f32 %v1455_v31, %v1464_v35  ;;  %v147_v6 = vmul.f32 %v1455_v31, %v1466_v36  ;;  %v1529_v12 = vmul.f32 %v1453_v30, %v1468_v37  ;;  %v1533_v13 = vmul.f32 %v1453_v30, %v1470_v38 }
  0x16   :  { %v199_v3 = vpack.i.b16 %v198_v61, %v198_v61  ;;  %v203_v4 = vpack.i.b16 %v202_v62, %v202_v62  ;;  %v170_v20 = vpack.c.bf16 %v150_v58, %v148_v57  ;;  %v171_v21 = vpack.c.bf16 %v151_v60, %v149_v59  ;;  %v51_v62 = vld [vmem:[%s2223_s1] sm:$0xff] }
  0x17   :  { %v168_v40 = vpack.c.bf16 %v146_v0, %v144_v63  ;;  %v1543_v41 = vunpack.c.l.bf16 %v53_v7  ;;  %v1545_v42 = vunpack.c.l.bf16 %v54_v8  ;;  %v1547_v43 = vunpack.c.h.bf16 %v53_v7 }
  0x18   :  { %451 = vmatpush.bf16.msra.mxu2 %v172_v55  ;;  %500 = vmatpush.bf16.msra.mxu3 %v173_v56  ;;  %v201_v24 = vperm.slane %v199_v3, 0  ;;  %v205_v25 = vperm.slane %v203_v4, 0  ;;  %v169_v46 = vpack.c.bf16 %v147_v6, %v145_v5  ;;  %v141_v47 = vmul.f32 %v1455_v31, %v1488_v51  ;;  %v52_v5 = vld [vmem:[%s2223_s1 + $0x8] sm:$0xff] }
  0x19   :  { %v1539_v34 = vld.sshfl [vmem:[#allocation1] sm:$0xff pattern:$0x73625140]  ;;  %v1541_v39 = vld.sshfl [vmem:[#allocation1 + $0x8] sm:$0xff pattern:$0x73625140]  ;;  %v166_v48 = vpack.c.bf16 %v1533_v13, %v1529_v12  ;;  %v143_v49 = vmul.f32 %v1455_v31, %v1490_v52  ;;  %v1561_v50 = vmul.f32 %v1453_v30, %v1510_v1  ;;  %v138_v53 = vmul.f32 %v1453_v30, %v1512_v2 }
  0x1a   :  { %v1549_v44 = vunpack.c.l.bf16 %v201_v24  ;;  %v1551_v45 = vunpack.c.l.bf16 %v205_v25  ;;  %823 = vst [vmem:[#allocation1] ss:$4 sm:$0xff] %v821_v11  ;;  %v1571_v57 = vunpack.c.h.bf16 %v54_v8  ;;  %v137_v3 = vmul.f32 %v1455_v31, %v1535_v18 }
  0x1b   :  { %v139_v4 = vmul.f32 %v1455_v31, %v1537_v19  ;;  %v167_v7 = vpack.c.bf16 %v143_v49, %v141_v47  ;;  %v132_v13 = vmul.f32 %v1453_v30, %v1543_v41  ;;  %v1607_v49 = vunpack.c.l.bf16 %v52_v5 }
  0x1c   :  { %452 = vmatpush.bf16.msra.mxu2 %v170_v20  ;;  %501 = vmatpush.bf16.msra.mxu3 %v171_v21  ;;  %v236_v54 = vmul.f32 %v1549_v44, %v1411_v9  ;;  %v238_v55 = vmul.f32 %v1549_v44, %v1413_v10  ;;  %v237_v56 = vmul.f32 %v1551_v45, %v1421_v14  ;;  %v1601_v21 = vunpack.c.l.bf16 %v51_v62 }
  0x1d   :  { %v239_v58 = vmul.f32 %v1551_v45, %v1423_v15  ;;  %v232_v59 = vmul.f32 %v1549_v44, %v1425_v16  ;;  %v234_v60 = vmul.f32 %v1549_v44, %v1427_v17  ;;  %v233_v61 = vmul.f32 %v1551_v45, %v1435_v22 }
  0x1e   :  { %v254_v63 = vpack.c.bf16 %v238_v55, %v236_v54  ;;  %v235_v0 = vmul.f32 %v1551_v45, %v1437_v23  ;;  %v228_v8 = vmul.f32 %v1549_v44, %v1445_v26  ;;  %v230_v11 = vmul.f32 %v1549_v44, %v1447_v27 }
  0x1f   :  { %v255_v6 = vpack.c.bf16 %v239_v58, %v237_v56  ;;  %v252_v12 = vpack.c.bf16 %v234_v60, %v232_v59  ;;  %v134_v20 = vmul.f32 %v1453_v30, %v1545_v42  ;;  %v229_v25 = vmul.f32 %v1551_v45, %v1449_v28 }
  0x20   :  { %304 = vmatpush.bf16.msra.mxu0 %v254_v63  ;;  %453 = vmatpush.bf16.msra.mxu2 %v168_v40  ;;  %v253_v24 = vpack.c.bf16 %v235_v0, %v233_v61  ;;  %v231_v47 = vmul.f32 %v1551_v45, %v1451_v29  ;;  %v164_v40 = vpack.c.bf16 %v138_v53, %v1561_v50 }
  0x21   :  { %353 = vmatpush.bf16.msra.mxu1 %v255_v6  ;;  %502 = vmatpush.bf16.msra.mxu3 %v169_v46  ;;  %v165_v54 = vpack.c.bf16 %v139_v4, %v137_v3  ;;  %v133_v55 = vmul.f32 %v1455_v31, %v1547_v43  ;;  %v135_v56 = vmul.f32 %v1455_v31, %v1571_v57  ;;  %v824_v61 = vld.sshfl [vmem:[#allocation1] sm:$0xff pattern:$0x73625140]  ;;  %v825_v63 = vld.sshfl [vmem:[#allocation1 + $0x8] sm:$0xff pattern:$0x73625140]  ;;  %v1626_v3 = vunpack.c.h.bf16 %v51_v62 }
  0x22   :  { %v250_v58 = vpack.c.bf16 %v230_v11, %v228_v8  ;;  %v224_v46 = vmul.f32 %v1549_v44, %v1457_v32  ;;  %v226_v59 = vmul.f32 %v1549_v44, %v1459_v33  ;;  %v225_v60 = vmul.f32 %v1551_v45, %v1464_v35 }
  0x23   :  { %v227_v50 = vmul.f32 %v1551_v45, %v1466_v36  ;;  %v220_v53 = vmul.f32 %v1549_v44, %v1468_v37  ;;  %v222_v0 = vmul.f32 %v1549_v44, %v1470_v38  ;;  %v251_v4 = vpack.c.bf16 %v231_v47, %v229_v25 }
  0x24   :  { %305 = vmatpush.bf16.msra.mxu0 %v252_v12  ;;  %454 = vmatpush.bf16.msra.mxu2 %v166_v48  ;;  %v221_v6 = vmul.f32 %v1551_v45, %v1488_v51  ;;  %v223_v48 = vmul.f32 %v1551_v45, %v1490_v52  ;;  %v1632_v8 = vunpack.c.h.bf16 %v52_v5  ;;  %v128_v11 = vmul.f32 %v1453_v30, %v1601_v21 }
  0x25   :  { %354 = vmatpush.bf16.msra.mxu1 %v253_v24  ;;  %503 = vmatpush.bf16.msra.mxu3 %v167_v7  ;;  %v130_v12 = vmul.f32 %v1453_v30, %v1607_v49  ;;  %v826_v38 = vshrl.u32 %v824_v61, 16  ;;  %v830_v62 = vshrl.u32 %v825_v63, 16  ;;  %v162_v37 = vpack.c.bf16 %v134_v20, %v132_v13 }
  0x26   :  { %v163_v24 = vpack.c.bf16 %v135_v56, %v133_v55  ;;  %v248_v7 = vpack.c.bf16 %v226_v59, %v224_v46  ;;  %v249_v25 = vpack.c.bf16 %v227_v50, %v225_v60  ;;  %v246_v47 = vpack.c.bf16 %v222_v0, %v220_v53 }
  0x27   :  { %v247_v52 = vpack.c.bf16 %v223_v48, %v221_v6  ;;  %v129_v5 = vmul.f32 %v1455_v31, %v1626_v3  ;;  %v131_v51 = vmul.f32 %v1455_v31, %v1632_v8  ;;  %v160_v36 = vpack.c.bf16 %v130_v12, %v128_v11 }
  0x28   :  { %306 = vmatpush.bf16.msra.mxu0 %v250_v58  ;;  %455 = vmatpush.bf16.msra.mxu2 %v164_v40  ;;  %v216_v30 = vmul.f32 %v1549_v44, %v1510_v1  ;;  %v827_v13 = vpack.i.b16 %v826_v38, %v826_v38  ;;  %v831_v20 = vpack.i.b16 %v830_v62, %v830_v62 }
  0x29   :  { %355 = vmatpush.bf16.msra.mxu1 %v251_v4  ;;  %504 = vmatpush.bf16.msra.mxu3 %v165_v54  ;;  %v218_v40 = vmul.f32 %v1549_v44, %v1512_v2  ;;  %v217_v55 = vmul.f32 %v1551_v45, %v1535_v18  ;;  %v219_v54 = vmul.f32 %v1551_v45, %v1537_v19 }
  0x2a   :  { %v570_v56 = vpack.i.b16 %v1539_v34, %v1539_v34  ;;  %v212_v31 = vmul.f32 %v1549_v44, %v1543_v41  ;;  %v829_v58 = vperm.slane %v827_v13, 1  ;;  %v833_v38 = vperm.slane %v831_v20, 1 }
  0x2b   :  { %v573_v46 = vpack.i.b16 %v1541_v39, %v1541_v39  ;;  %v161_v59 = vpack.c.bf16 %v131_v51, %v129_v5  ;;  %v214_v60 = vmul.f32 %v1549_v44, %v1545_v42  ;;  %v213_v61 = vmul.f32 %v1551_v45, %v1547_v43  ;;  %v1339_v51 = vld [vmem:[%s2224_s0] sm:$0xff] }
  0x2c   :  { %307 = vmatpush.bf16.msra.mxu0 %v248_v7  ;;  %456 = vmatpush.bf16.msra.mxu2 %v162_v37  ;;  %v572_v34 = vperm.slane %v570_v56, 1  ;;  %v215_v37 = vmul.f32 %v1551_v45, %v1571_v57  ;;  %v1662_v63 = vunpack.c.l.bf16 %v829_v58  ;;  %v1664_v50 = vunpack.c.l.bf16 %v833_v38 }
  0x2d   :  { %356 = vmatpush.bf16.msra.mxu1 %v249_v25  ;;  %505 = vmatpush.bf16.msra.mxu3 %v163_v24  ;;  %v575_v53 = vperm.slane %v573_v46, 1  ;;  %v244_v0 = vpack.c.bf16 %v218_v40, %v216_v30  ;;  %v245_v39 = vpack.c.bf16 %v219_v54, %v217_v55  ;;  %v242_v12 = vpack.c.bf16 %v214_v60, %v212_v31 }
  0x2e   :  { %v864_v4 = vmul.f32 %v1662_v63, %v1411_v9  ;;  %v866_v6 = vmul.f32 %v1662_v63, %v1413_v10  ;;  %v865_v48 = vmul.f32 %v1664_v50, %v1421_v14  ;;  %v1675_v11 = vunpack.c.l.bf16 %v572_v34 }
  0x2f   :  { %v867_v62 = vmul.f32 %v1664_v50, %v1423_v15  ;;  %v1681_v24 = vunpack.c.l.bf16 %v575_v53  ;;  %v243_v7 = vpack.c.bf16 %v215_v37, %v213_v61  ;;  %v860_v5 = vmul.f32 %v1662_v63, %v1425_v16 }
  0x30   :  { %308 = vmatpush.bf16.msra.mxu0 %v246_v47  ;;  %457 = vmatpush.bf16.msra.mxu2 %v160_v36  ;;  %v208_v36 = vmul.f32 %v1549_v44, %v1601_v21  ;;  %v882_v25 = vpack.c.bf16 %v866_v6, %v864_v4  ;;  %v210_v47 = vmul.f32 %v1549_v44, %v1607_v49 }
  0x31   :  { %357 = vmatpush.bf16.msra.mxu1 %v247_v52  ;;  %506 = vmatpush.bf16.msra.mxu3 %v161_v59  ;;  %v883_v52 = vpack.c.bf16 %v867_v62, %v865_v48  ;;  %v209_v30 = vmul.f32 %v1551_v45, %v1626_v3  ;;  %v862_v13 = vmul.f32 %v1662_v63, %v1427_v17 }
  0x32   :  { %v861_v20 = vmul.f32 %v1664_v50, %v1435_v22  ;;  %v211_v40 = vmul.f32 %v1551_v45, %v1632_v8  ;;  %v606_v44 = vmul.f32 %v1675_v11, %v1411_v9  ;;  %v863_v55 = vmul.f32 %v1664_v50, %v1437_v23 }
  0x33   :  { %458 = vmatmul.bf16.vlgmr.msra.gmra.mxu2 %v1339_v51  ;;  %v608_v54 = vmul.f32 %v1675_v11, %v1413_v10  ;;  %v607_v56 = vmul.f32 %v1681_v24, %v1421_v14  ;;  %v880_v31 = vpack.c.bf16 %v862_v13, %v860_v5  ;;  %v609_v58 = vmul.f32 %v1681_v24, %v1423_v15  ;;  %v1341_v5 = vld [vmem:[%s2224_s0 + $0x10] sm:$0xff] }
  0x34   :  { %309 = vmatpush.bf16.msra.mxu0 %v244_v0  ;;  %507 = vmatmul.bf16.vlgmr.msra.gmra.mxu3 %v1339_v51  ;;  %v881_v45 = vpack.c.bf16 %v863_v55, %v861_v20  ;;  %v856_v9 = vmul.f32 %v1662_v63, %v1445_v26  ;;  %v858_v38 = vmul.f32 %v1662_v63, %v1447_v27  ;;  %v2242_v55 = vld [vmem:[#allocation3_spill] sm:$0xff] }
  0x35   :  { %358 = vmatpush.bf16.msra.mxu1 %v245_v39  ;;  %932 = vmatpush.bf16.msrb.mxu2 %v882_v25  ;;  %v857_v46 = vmul.f32 %v1664_v50, %v1449_v28  ;;  %v859_v10 = vmul.f32 %v1664_v50, %v1451_v29  ;;  %v240_v14 = vpack.c.bf16 %v210_v47, %v208_v36  ;;  %v1347_v39 = vld [vmem:[%s2224_s0 + $0x40] sm:$0xff]  ;;  %v1348_v47 = vld [vmem:[%s2224_s0 + $0x48] sm:$0xff] }
  0x36   :  { %981 = vmatpush.bf16.msrb.mxu3 %v883_v52  ;;  %v241_v59 = vpack.c.bf16 %v211_v40, %v209_v30  ;;  %v624_v60 = vpack.c.bf16 %v608_v54, %v606_v44  ;;  %v602_v15 = vmul.f32 %v1675_v11, %v1425_v16  ;;  %v604_v61 = vmul.f32 %v1675_v11, %v1427_v17 }
  0x37   :  { %v625_v34 = vpack.c.bf16 %v609_v58, %v607_v56  ;;  %v603_v37 = vmul.f32 %v1681_v24, %v1435_v22  ;;  %v605_v53 = vmul.f32 %v1681_v24, %v1437_v23  ;;  %v878_v0 = vpack.c.bf16 %v858_v38, %v856_v9  ;;  %v1340_v22 = vld [vmem:[%s2224_s0 + $0x8] sm:$0xff]  ;;  %v2243_v56 = vld [vmem:[#allocation4_spill] sm:$0xff]  ;;  %v1349_v38 = vld [vmem:[%s2224_s0 + $0x50] sm:$0xff] }
  0x38   :  { %310 = vmatpush.bf16.msra.mxu0 %v242_v12  ;;  %v879_v51 = vpack.c.bf16 %v859_v10, %v857_v46  ;;  %v622_v16 = vpack.c.bf16 %v604_v61, %v602_v15  ;;  %v598_v23 = vmul.f32 %v1675_v11, %v1445_v26  ;;  %v600_v4 = vmul.f32 %v1675_v11, %v1447_v27  ;;  %v2245_v58 = vld [vmem:[#allocation6_spill] sm:$0xff]  ;;  %v1342_v46 = vld [vmem:[%s2224_s0 + $0x18] sm:$0xff] }
  0x39   :  { %359 = vmatpush.bf16.msra.mxu1 %v243_v7  ;;  %933 = vmatpush.bf16.msrb.mxu2 %v880_v31  ;;  %v623_v17 = vpack.c.bf16 %v605_v53, %v603_v37  ;;  %v599_v6 = vmul.f32 %v1681_v24, %v1449_v28  ;;  %v601_v48 = vmul.f32 %v1681_v24, %v1451_v29  ;;  %v2241_v7 = vld [vmem:[#allocation2_spill] sm:$0xff]  ;;  %v2244_v31 = vld [vmem:[#allocation5_spill] sm:$0xff] }
  0x3a   :  { %982 = vmatpush.bf16.msrb.mxu3 %v881_v45  ;;  %v620_v12 = vpack.c.bf16 %v600_v4, %v598_v23  ;;  %v852_v36 = vmul.f32 %v1662_v63, %v1457_v32  ;;  %v854_v26 = vmul.f32 %v1662_v63, %v1459_v33  ;;  %v853_v27 = vmul.f32 %v1664_v50, %v1464_v35 }
  0x3b   :  { %v621_v62 = vpack.c.bf16 %v601_v48, %v599_v6  ;;  %v855_v28 = vmul.f32 %v1664_v50, %v2241_v7  ;;  %v594_v52 = vmul.f32 %v1675_v11, %v1457_v32  ;;  %v596_v30 = vmul.f32 %v1675_v11, %v1459_v33 }
  0x3c   :  { %311 = vmatpush.bf16.msra.mxu0 %v240_v14  ;;  %v876_v29 = vpack.c.bf16 %v854_v26, %v852_v36  ;;  %v595_v13 = vmul.f32 %v1681_v24, %v1464_v35  ;;  %v597_v20 = vmul.f32 %v1681_v24, %v2241_v7  ;;  %v848_v54 = vmul.f32 %v1662_v63, %v2242_v55  ;;  %v1351_v26 = vld [vmem:[%s2224_s0 + $0x60] sm:$0xff] }
  0x3d   :  { %360 = vmatpush.bf16.msra.mxu1 %v241_v59  ;;  %934 = vmatpush.bf16.msrb.mxu2 %v878_v0  ;;  %v877_v25 = vpack.c.bf16 %v855_v28, %v853_v27  ;;  %v618_v40 = vpack.c.bf16 %v596_v30, %v594_v52  ;;  %v850_v32 = vmul.f32 %v1662_v63, %v2243_v56  ;;  %v1344_v27 = vld [vmem:[%s2224_s0 + $0x28] sm:$0xff] }
  0x3e   :  { %983 = vmatpush.bf16.msrb.mxu3 %v879_v51  ;;  %v619_v44 = vpack.c.bf16 %v597_v20, %v595_v13  ;;  %v849_v33 = vmul.f32 %v1664_v50, %v2244_v31  ;;  %v851_v35 = vmul.f32 %v1664_v50, %v2245_v58  ;;  %v590_v10 = vmul.f32 %v1675_v11, %v2242_v55  ;;  %v1352_v13 = vld [vmem:[%s2224_s0 + $0x68] sm:$0xff] }
  0x3f   :  { %312 = vmatmul.bf16.vlgmr.msra.gmra.mxu0 %v1347_v39  ;;  %v874_v45 = vpack.c.bf16 %v850_v32, %v848_v54  ;;  %v592_v14 = vmul.f32 %v1675_v11, %v2243_v56  ;;  %v591_v59 = vmul.f32 %v1681_v24, %v2244_v31  ;;  %v846_v37 = vmul.f32 %v1662_v63, %v1512_v2  ;;  %v1353_v56 = vld [vmem:[%s2224_s0 + $0x70] sm:$0xff] }
  0x40   :  { %674 = vmatpush.bf16.msrb.mxu0 %v624_v60  ;;  %361 = vmatmul.bf16.vlgmr.msra.gmra.mxu1 %v1347_v39  ;;  %v875_v9 = vpack.c.bf16 %v851_v35, %v849_v33  ;;  %v593_v60 = vmul.f32 %v1681_v24, %v2245_v58  ;;  %v845_v53 = vmul.f32 %v1664_v50, %v1535_v18 }
  0x41   :  { %723 = vmatpush.bf16.msrb.mxu1 %v625_v34  ;;  %935 = vmatpush.bf16.msrb.mxu2 %v876_v29  ;;  %v616_v15 = vpack.c.bf16 %v592_v14, %v590_v10  ;;  %v844_v34 = vmul.f32 %v1662_v63, %v1510_v1  ;;  %v847_v0 = vmul.f32 %v1664_v50, %v1537_v19 }
  0x42   :  { %984 = vmatpush.bf16.msrb.mxu3 %v877_v25  ;;  %v617_v61 = vpack.c.bf16 %v593_v60, %v591_v59  ;;  %v588_v23 = vmul.f32 %v1675_v11, %v1512_v2  ;;  %v587_v4 = vmul.f32 %v1681_v24, %v1535_v18  ;;  %v589_v6 = vmul.f32 %v1681_v24, %v1537_v19 }
  0x43   :  { %463 = vmatmul.bf16.gmra.mxu2 %v1340_v22  ;;  %v872_v39 = vpack.c.bf16 %v846_v37, %v844_v34  ;;  %v873_v51 = vpack.c.bf16 %v847_v0, %v845_v53  ;;  %v841_v2 = vmul.f32 %v1664_v50, %v1547_v43  ;;  %v843_v18 = vmul.f32 %v1664_v50, %v1571_v57 }
  0x44   :  { %675 = vmatpush.bf16.msrb.mxu0 %v622_v16  ;;  %512 = vmatmul.bf16.gmra.mxu3 %v1340_v22  ;;  %v1350_v16 = vld [vmem:[%s2224_s0 + $0x58] sm:$0xff]  ;;  %v586_v22 = vmul.f32 %v1675_v11, %v1510_v1  ;;  %v842_v1 = vmul.f32 %v1662_v63, %v1545_v42  ;;  %v582_v7 = vmul.f32 %v1675_v11, %v1543_v41 }
  0x45   :  { %724 = vmatpush.bf16.msrb.mxu1 %v623_v17  ;;  %936 = vmatpush.bf16.msrb.mxu2 %v874_v45  ;;  %v1343_v17 = vld [vmem:[%s2224_s0 + $0x20] sm:$0xff]  ;;  %v871_v19 = vpack.c.bf16 %v843_v18, %v841_v2  ;;  %v584_v28 = vmul.f32 %v1675_v11, %v1545_v42  ;;  %v583_v29 = vmul.f32 %v1681_v24, %v1547_v43 }
  0x46   :  { %985 = vmatpush.bf16.msrb.mxu3 %v875_v9  ;;  %v614_v48 = vpack.c.bf16 %v588_v23, %v586_v22  ;;  %v585_v25 = vmul.f32 %v1681_v24, %v1571_v57  ;;  %v836_v52 = vmul.f32 %v1662_v63, %v1601_v21  ;;  %v837_v42 = vmul.f32 %v1664_v50, %v1626_v3  ;;  %v1364_v9 = vld [vmem:[%s2224_s0 + $0xc8] sm:$0xff] }
  0x47   :  { %v839_v43 = vmul.f32 %v1664_v50, %v1632_v8  ;;  %v578_v20 = vmul.f32 %v1675_v11, %v1601_v21  ;;  %v580_v50 = vmul.f32 %v1675_v11, %v1607_v49  ;;  %v1346_v21 = vld [vmem:[%s2224_s0 + $0x38] sm:$0xff] }
  0x48   :  { %676 = vmatpush.bf16.msrb.mxu0 %v620_v12  ;;  %v615_v12 = vpack.c.bf16 %v589_v6, %v587_v4 }
  0x49   :  { %725 = vmatpush.bf16.msrb.mxu1 %v621_v62  ;;  %937 = vmatpush.bf16.msrb.mxu2 %v872_v39  ;;  %v840_v62 = vmul.f32 %v1662_v63, %v1543_v41  ;;  %v838_v41 = vmul.f32 %v1662_v63, %v1607_v49  ;;  %v869_v57 = vpack.c.bf16 %v839_v43, %v837_v42  ;;  %v1345_v63 = vld [vmem:[%s2224_s0 + $0x30] sm:$0xff]  ;;  %v1354_v49 = vld [vmem:[%s2224_s0 + $0x78] sm:$0xff] }
  0x4a   :  { %986 = vmatpush.bf16.msrb.mxu3 %v873_v51  ;;  %v610_v55 = vpack.c.bf16 %v580_v50, %v578_v20  ;;  %v1365_v51 = vld [vmem:[%s2224_s0 + $0xd0] sm:$0xff] }
  0x4b   :  { %v870_v36 = vpack.c.bf16 %v842_v1, %v840_v62  ;;  %v868_v30 = vpack.c.bf16 %v838_v41, %v836_v52 }
  0x4c   :  { %677 = vmatpush.bf16.msrb.mxu0 %v618_v40  ;;  %v579_v40 = vmul.f32 %v1681_v24, %v1626_v3  ;;  %v1363_v3 = vld [vmem:[%s2224_s0 + $0xc0] sm:$0xff] }
  0x4d   :  { %726 = vmatpush.bf16.msrb.mxu1 %v619_v44  ;;  %938 = vmatpush.bf16.msrb.mxu2 %v870_v36  ;;  %v581_v44 = vmul.f32 %v1681_v24, %v1632_v8  ;;  %v1355_v24 = vld [vmem:[%s2224_s0 + $0x80] sm:$0xff] }
  0x4e   :  { %987 = vmatpush.bf16.msrb.mxu3 %v871_v19  ;;  %v1366_v19 = vld [vmem:[%s2224_s0 + $0xd8] sm:$0xff] }
  0x4f   :  { %317 = vmatmul.bf16.gmra.mxu0 %v1348_v47  ;;  %v611_v54 = vpack.c.bf16 %v581_v44, %v579_v40 }
  0x50   :  { %366 = vmatmul.bf16.gmra.mxu1 %v1348_v47  ;;  %678 = vmatpush.bf16.msrb.mxu0 %v616_v15  ;;  %v612_v47 = vpack.c.bf16 %v584_v28, %v582_v7  ;;  %v1356_v15 = vld [vmem:[%s2224_s0 + $0x88] sm:$0xff] }
  0x51   :  { %727 = vmatpush.bf16.msrb.mxu1 %v617_v61  ;;  %939 = vmatpush.bf16.msrb.mxu2 %v868_v30 }
  0x52   :  { %988 = vmatpush.bf16.msrb.mxu3 %v869_v57  ;;  %v1367_v57 = vld [vmem:[%s2224_s0 + $0xe0] sm:$0xff] }
  0x53   :  { %468 = vmatmul.bf16.gmra.mxu2 %v1341_v5 }
  0x54   :  { %517 = vmatmul.bf16.gmra.mxu3 %v1341_v5  ;;  %679 = vmatpush.bf16.msrb.mxu0 %v614_v48  ;;  %v613_v5 = vpack.c.bf16 %v585_v25, %v583_v29  ;;  %v1357_v48 = vld [vmem:[%s2224_s0 + $0x90] sm:$0xff] }
  0x55   :  { %728 = vmatpush.bf16.msrb.mxu1 %v615_v12 }
  0x58   :  { %680 = vmatpush.bf16.msrb.mxu0 %v612_v47  ;;  %v1358_v47 = vld [vmem:[%s2224_s0 + $0x98] sm:$0xff] }
  0x59   :  { %729 = vmatpush.bf16.msrb.mxu1 %v613_v5 }
  0x5c   :  { %681 = vmatpush.bf16.msrb.mxu0 %v610_v55  ;;  %v1359_v55 = vld [vmem:[%s2224_s0 + $0xa0] sm:$0xff] }
  0x5d   :  { %730 = vmatpush.bf16.msrb.mxu1 %v611_v54 }
  0x5f   :  { %322 = vmatmul.bf16.gmra.mxu0 %v1349_v38 }
  0x60   :  { %371 = vmatmul.bf16.gmra.mxu1 %v1349_v38 }
  0x63   :  { %473 = vmatmul.bf16.gmra.mxu2 %v1342_v46 }
  0x64   :  { %522 = vmatmul.bf16.gmra.mxu3 %v1342_v46 }
  0x6f   :  { %327 = vmatmul.bf16.gmra.mxu0 %v1350_v16 }
  0x70   :  { %376 = vmatmul.bf16.gmra.mxu1 %v1350_v16 }
  0x73   :  { %478 = vmatmul.bf16.gmra.mxu2 %v1343_v17 }
  0x74   :  { %527 = vmatmul.bf16.gmra.mxu3 %v1343_v17 }
  0x7f   :  { %332 = vmatmul.bf16.gmra.mxu0 %v1351_v26 }
  0x80   :  { %381 = vmatmul.bf16.gmra.mxu1 %v1351_v26 }
  0x83   :  { %483 = vmatmul.bf16.gmra.mxu2 %v1344_v27 }
  0x84   :  { %532 = vmatmul.bf16.gmra.mxu3 %v1344_v27 }
  0x8f   :  { %337 = vmatmul.bf16.gmra.mxu0 %v1352_v13 }
  0x90   :  { %386 = vmatmul.bf16.gmra.mxu1 %v1352_v13 }
  0x93   :  { %488 = vmatmul.bf16.gmra.mxu2 %v1345_v63 }
  0x94   :  { %537 = vmatmul.bf16.gmra.mxu3 %v1345_v63 }
  0x9f   :  { %342 = vmatmul.bf16.gmra.mxu0 %v1353_v56 }
  0xa0   :  { %391 = vmatmul.bf16.gmra.mxu1 %v1353_v56 }
  0xa3   :  { %493 = vmatmul.bf16.gmra.mxu2 %v1346_v21 }
  0xa4   :  { %542 = vmatmul.bf16.gmra.mxu3 %v1346_v21 }
  0xaf   :  { %347 = vmatmul.bf16.gmra.mxu0 %v1354_v49 }
  0xb0   :  { %396 = vmatmul.bf16.gmra.mxu1 %v1354_v49 }
  0xb3   :  { %940 = vmatmul.bf16.vlgmr.msrb.gmra.mxu2 %v1363_v3 }
  0xb4   :  { %989 = vmatmul.bf16.vlgmr.msrb.gmra.mxu3 %v1363_v3 }
  0xb6   :  { %v459_v8 = vpop.f32.mrf.mxu2 }
  0xb7   :  { %v508_v11 = vpop.f32.mrf.mxu3 }
  0xbc   :  { %v313_v32 = vpop.f32.mrf.mxu0 }
  0xbd   :  { %v1860_v31 = vadd.f32 %v459_v8, %v313_v32  ;;  %v362_v33 = vpop.f32.mrf.mxu1 }
  0xbe   :  { %v1862_v58 = vadd.f32 %v508_v11, %v362_v33  ;;  %v461_v35 = vpop.f32.mrf.mxu2  ;;  %v1368_v11 = vld [vmem:[%s2224_s0 + $0xe8] sm:$0xff] }
  0xbf   :  { %682 = vmatmul.bf16.vlgmr.msrb.gmra.mxu0 %v1355_v24  ;;  %v510_v45 = vpop.f32.mrf.mxu3 }
  0xc0   :  { %731 = vmatmul.bf16.vlgmr.msrb.gmra.mxu1 %v1355_v24 }
  0xc3   :  { %945 = vmatmul.bf16.gmra.mxu2 %v1364_v9 }
  0xc4   :  { %v315_v38 = vpop.f32.mrf.mxu0  ;;  %994 = vmatmul.bf16.gmra.mxu3 %v1364_v9 }
  0xc5   :  { %v1867_v46 = vadd.f32 %v461_v35, %v315_v38  ;;  %v364_v10 = vpop.f32.mrf.mxu1  ;;  %v1360_v38 = vld [vmem:[%s2224_s0 + $0xa8] sm:$0xff] }
  0xc6   :  { %v1869_v14 = vadd.f32 %v510_v45, %v364_v10  ;;  %v464_v59 = vpop.f32.mrf.mxu2 }
  0xc7   :  { %v513_v60 = vpop.f32.mrf.mxu3 }
  0xcc   :  { %v318_v61 = vpop.f32.mrf.mxu0 }
  0xcd   :  { %v1874_v34 = vadd.f32 %v464_v59, %v318_v61  ;;  %v367_v37 = vpop.f32.mrf.mxu1 }
  0xce   :  { %v1876_v53 = vadd.f32 %v513_v60, %v367_v37  ;;  %v466_v0 = vpop.f32.mrf.mxu2 }
  0xcf   :  { %687 = vmatmul.bf16.gmra.mxu0 %v1356_v15  ;;  %v515_v39 = vpop.f32.mrf.mxu3 }
  0xd0   :  { %736 = vmatmul.bf16.gmra.mxu1 %v1356_v15 }
  0xd3   :  { %950 = vmatmul.bf16.gmra.mxu2 %v1365_v51 }
  0xd4   :  { %v320_v16 = vpop.f32.mrf.mxu0  ;;  %999 = vmatmul.bf16.gmra.mxu3 %v1365_v51 }
  0xd5   :  { %v1881_v17 = vadd.f32 %v466_v0, %v320_v16  ;;  %v369_v22 = vpop.f32.mrf.mxu1  ;;  %v1369_v0 = vld [vmem:[%s2224_s0 + $0xf0] sm:$0xff] }
  0xd6   :  { %v1883_v23 = vadd.f32 %v515_v39, %v369_v22  ;;  %v469_v4 = vpop.f32.mrf.mxu2 }
  0xd7   :  { %v518_v6 = vpop.f32.mrf.mxu3 }
  0xdc   :  { %v323_v12 = vpop.f32.mrf.mxu0 }
  0xdd   :  { %v1888_v62 = vadd.f32 %v469_v4, %v323_v12  ;;  %v372_v1 = vpop.f32.mrf.mxu1  ;;  %v1361_v12 = vld [vmem:[%s2224_s0 + $0xb0] sm:$0xff] }
  0xde   :  { %v1890_v2 = vadd.f32 %v518_v6, %v372_v1  ;;  %v471_v18 = vpop.f32.mrf.mxu2 }
  0xdf   :  { %692 = vmatmul.bf16.gmra.mxu0 %v1357_v48  ;;  %v520_v36 = vpop.f32.mrf.mxu3 }
  0xe0   :  { %741 = vmatmul.bf16.gmra.mxu1 %v1357_v48  ;;  %v1372_v48 = vmov 0.0  }
  0xe1   :  { %20 = vst.msk [vmem:[%s2225_s3 + $0x8] sm:$0xff] %vm19_vm0, %v1372_v48 }
  0xe2   :  { %22 = vst.msk [vmem:[%s2225_s3 + $0x18] sm:$0xff] %vm19_vm0, %v1372_v48 }
  0xe3   :  { %955 = vmatmul.bf16.gmra.mxu2 %v1366_v19  ;;  %24 = vst.msk [vmem:[%s2225_s3 + $0x28] sm:$0xff] %vm19_vm0, %v1372_v48 }
  0xe4   :  { %v325_v26 = vpop.f32.mrf.mxu0  ;;  %1004 = vmatmul.bf16.gmra.mxu3 %v1366_v19  ;;  %26 = vst.msk [vmem:[%s2225_s3 + $0x38] sm:$0xff] %vm19_vm0, %v1372_v48 }
  0xe5   :  { %v1895_v27 = vadd.f32 %v471_v18, %v325_v26  ;;  %v374_v7 = vpop.f32.mrf.mxu1  ;;  %28 = vst.msk [vmem:[%s2225_s3 + $0x48] sm:$0xff] %vm19_vm0, %v1372_v48 }
  0xe6   :  { %v1897_v28 = vadd.f32 %v520_v36, %v374_v7  ;;  %v474_v29 = vpop.f32.mrf.mxu2  ;;  %30 = vst.msk [vmem:[%s2225_s3 + $0x58] sm:$0xff] %vm19_vm0, %v1372_v48 }
  0xe7   :  { %v523_v25 = vpop.f32.mrf.mxu3  ;;  %32 = vst.msk [vmem:[%s2225_s3 + $0x68] sm:$0xff] %vm19_vm0, %v1372_v48 }
  0xe8   :  { %34 = vst.msk [vmem:[%s2225_s3 + $0x78] sm:$0xff] %vm19_vm0, %v1372_v48 }
  0xe9   :  { %36 = vst.msk [vmem:[%s2225_s3 + $0x88] sm:$0xff] %vm19_vm0, %v1372_v48 }
  0xea   :  { %38 = vst.msk [vmem:[%s2225_s3 + $0x98] sm:$0xff] %vm19_vm0, %v1372_v48 }
  0xeb   :  { %40 = vst.msk [vmem:[%s2225_s3 + $0xa8] sm:$0xff] %vm19_vm0, %v1372_v48 }
  0xec   :  { %v328_v5 = vpop.f32.mrf.mxu0  ;;  %42 = vst.msk [vmem:[%s2225_s3 + $0xb8] sm:$0xff] %vm19_vm0, %v1372_v48 }
  0xed   :  { %v1902_v52 = vadd.f32 %v474_v29, %v328_v5  ;;  %v377_v41 = vpop.f32.mrf.mxu1  ;;  %v1370_v29 = vld [vmem:[%s2224_s0 + $0xf8] sm:$0xff]  ;;  %44 = vst.msk [vmem:[%s2225_s3 + $0xc8] sm:$0xff] %vm19_vm0, %v1372_v48 }
  0xee   :  { %v1904_v42 = vadd.f32 %v523_v25, %v377_v41  ;;  %v476_v43 = vpop.f32.mrf.mxu2  ;;  %46 = vst.msk [vmem:[%s2225_s3 + $0xd8] sm:$0xff] %vm19_vm0, %v1372_v48 }
  0xef   :  { %697 = vmatmul.bf16.gmra.mxu0 %v1358_v47  ;;  %v525_v30 = vpop.f32.mrf.mxu3  ;;  %48 = vst.msk [vmem:[%s2225_s3 + $0xe8] sm:$0xff] %vm19_vm0, %v1372_v48 }
  0xf0   :  { %746 = vmatmul.bf16.gmra.mxu1 %v1358_v47  ;;  %50 = vst.msk [vmem:[%s2225_s3 + $0xf8] sm:$0xff] %vm19_vm0, %v1372_v48 }
  0xf3   :  { %960 = vmatmul.bf16.gmra.mxu2 %v1367_v57 }
  0xf4   :  { %v330_v13 = vpop.f32.mrf.mxu0  ;;  %1009 = vmatmul.bf16.gmra.mxu3 %v1367_v57  ;;  %v1362_v57 = vld [vmem:[%s2224_s0 + $0xb8] sm:$0xff] }
  0xf5   :  { %v1909_v63 = vadd.f32 %v476_v43, %v330_v13  ;;  %v379_v20 = vpop.f32.mrf.mxu1 }
  0xf6   :  { %v1911_v50 = vadd.f32 %v525_v30, %v379_v20  ;;  %v479_v40 = vpop.f32.mrf.mxu2 }
  0xf7   :  { %v528_v44 = vpop.f32.mrf.mxu3 }
  0xfc   :  { %v333_v54 = vpop.f32.mrf.mxu0 }
  0xfd   :  { %v1916_v56 = vadd.f32 %v479_v40, %v333_v54  ;;  %v382_v21 = vpop.f32.mrf.mxu1 }
  0xfe   :  { %v1918_v49 = vadd.f32 %v528_v44, %v382_v21  ;;  %v481_v3 = vpop.f32.mrf.mxu2 }
  0xff   :  { %702 = vmatmul.bf16.gmra.mxu0 %v1359_v55  ;;  %v530_v8 = vpop.f32.mrf.mxu3 }
 0x100   :  { %751 = vmatmul.bf16.gmra.mxu1 %v1359_v55 }
 0x103   :  { %965 = vmatmul.bf16.gmra.mxu2 %v1368_v11 }
 0x104   :  { %v335_v24 = vpop.f32.mrf.mxu0  ;;  %1014 = vmatmul.bf16.gmra.mxu3 %v1368_v11 }
 0x105   :  { %v1923_v32 = vadd.f32 %v481_v3, %v335_v24  ;;  %v384_v33 = vpop.f32.mrf.mxu1 }
 0x106   :  { %v1925_v35 = vadd.f32 %v530_v8, %v384_v33  ;;  %v484_v45 = vpop.f32.mrf.mxu2 }
 0x107   :  { %v533_v9 = vpop.f32.mrf.mxu3 }
 0x10c   :  { %v338_v10 = vpop.f32.mrf.mxu0 }
 0x10d   :  { %v1930_v59 = vadd.f32 %v484_v45, %v338_v10  ;;  %v387_v60 = vpop.f32.mrf.mxu1 }
 0x10e   :  { %v1932_v15 = vadd.f32 %v533_v9, %v387_v60  ;;  %v486_v61 = vpop.f32.mrf.mxu2 }
 0x10f   :  { %707 = vmatmul.bf16.gmra.mxu0 %v1360_v38  ;;  %v535_v37 = vpop.f32.mrf.mxu3 }
 0x110   :  { %756 = vmatmul.bf16.gmra.mxu1 %v1360_v38 }
 0x113   :  { %970 = vmatmul.bf16.gmra.mxu2 %v1369_v0 }
 0x114   :  { %v340_v39 = vpop.f32.mrf.mxu0  ;;  %1019 = vmatmul.bf16.gmra.mxu3 %v1369_v0 }
 0x115   :  { %v1937_v51 = vadd.f32 %v486_v61, %v340_v39  ;;  %v389_v16 = vpop.f32.mrf.mxu1 }
 0x116   :  { %v1939_v22 = vadd.f32 %v535_v37, %v389_v16  ;;  %v489_v4 = vpop.f32.mrf.mxu2  ;;  %v1063_v37 = vld [vmem:[%s2225_s3 + $0x8] sm:$0xff] }
 0x117   :  { %v538_v6 = vpop.f32.mrf.mxu3 }
 0x11c   :  { %v343_v1 = vpop.f32.mrf.mxu0 }
 0x11d   :  { %v1956_v18 = vadd.f32 %v489_v4, %v343_v1  ;;  %v392_v36 = vpop.f32.mrf.mxu1  ;;  %v1065_v1 = vld [vmem:[%s2225_s3 + $0x18] sm:$0xff] }
 0x11e   :  { %v1962_v19 = vadd.f32 %v538_v6, %v392_v36  ;;  %v491_v26 = vpop.f32.mrf.mxu2 }
 0x11f   :  { %712 = vmatmul.bf16.gmra.mxu0 %v1361_v12  ;;  %v540_v7 = vpop.f32.mrf.mxu3 }
 0x120   :  { %761 = vmatmul.bf16.gmra.mxu1 %v1361_v12 }
 0x123   :  { %975 = vmatmul.bf16.gmra.mxu2 %v1370_v29 }
 0x124   :  { %v345_v25 = vpop.f32.mrf.mxu0  ;;  %1024 = vmatmul.bf16.gmra.mxu3 %v1370_v29 }
 0x125   :  { %v1995_v47 = vadd.f32 %v491_v26, %v345_v25  ;;  %v394_v5 = vpop.f32.mrf.mxu1 }
 0x126   :  { %v2001_v41 = vadd.f32 %v540_v7, %v394_v5  ;;  %v494_v43 = vpop.f32.mrf.mxu2 }
 0x127   :  { %v543_v30 = vpop.f32.mrf.mxu3 }
 0x12c   :  { %v348_v13 = vpop.f32.mrf.mxu0 }
 0x12d   :  { %v2022_v20 = vadd.f32 %v494_v43, %v348_v13  ;;  %v397_v40 = vpop.f32.mrf.mxu1 }
 0x12e   :  { %v2024_v44 = vadd.f32 %v543_v30, %v397_v40  ;;  %v496_v55 = vpop.f32.mrf.mxu2  ;;  %v1067_v30 = vld [vmem:[%s2225_s3 + $0x28] sm:$0xff] }
 0x12f   :  { %717 = vmatmul.bf16.gmra.mxu0 %v1362_v57  ;;  %v545_v54 = vpop.f32.mrf.mxu3 }
 0x130   :  { %766 = vmatmul.bf16.gmra.mxu1 %v1362_v57 }
 0x134   :  { %v350_v21 = vpop.f32.mrf.mxu0 }
 0x135   :  { %v2026_v3 = vadd.f32 %v496_v55, %v350_v21  ;;  %v399_v8 = vpop.f32.mrf.mxu1 }
 0x136   :  { %v2028_v11 = vadd.f32 %v545_v54, %v399_v8  ;;  %v941_v24 = vpop.f32.mrf.mxu2 }
 0x137   :  { %v990_v33 = vpop.f32.mrf.mxu3 }
 0x13c   :  { %v683_v45 = vpop.f32.mrf.mxu0 }
 0x13d   :  { %v772_v9 = vadd.f32 %v683_v45, %v1860_v31  ;;  %v732_v38 = vpop.f32.mrf.mxu1 }
 0x13e   :  { %v773_v10 = vadd.f32 %v732_v38, %v1862_v58  ;;  %v943_v60 = vpop.f32.mrf.mxu2 }
 0x13f   :  { %v1030_v61 = vadd.f32 %v941_v24, %v772_v9  ;;  %v992_v0 = vpop.f32.mrf.mxu3  ;;  %v1069_v24 = vld [vmem:[%s2225_s3 + $0x38] sm:$0xff] }
 0x140   :  { %v1031_v39 = vadd.f32 %v990_v33, %v773_v10 }
 0x141   :  { %1126 = vst [vmem:[%s2225_s3] sm:$0xff] %v1030_v61 }
 0x142   :  { %v1095_v16 = vadd.f32 %v1063_v37, %v1031_v39  ;;  %v1071_v37 = vld [vmem:[%s2225_s3 + $0x48] sm:$0xff] }
 0x144   :  { %1128 = vst.msk [vmem:[%s2225_s3 + $0x8] sm:$0xff] %vm19_vm0, %v1095_v16  ;;  %v685_v31 = vpop.f32.mrf.mxu0 }
 0x145   :  { %v774_v58 = vadd.f32 %v685_v31, %v1867_v46  ;;  %v734_v4 = vpop.f32.mrf.mxu1 }
 0x146   :  { %v775_v6 = vadd.f32 %v734_v4, %v1869_v14  ;;  %v946_v48 = vpop.f32.mrf.mxu2 }
 0x147   :  { %v1032_v12 = vadd.f32 %v943_v60, %v774_v58  ;;  %v995_v36 = vpop.f32.mrf.mxu3 }
 0x148   :  { %v1033_v26 = vadd.f32 %v992_v0, %v775_v6 }
 0x149   :  { %1129 = vst [vmem:[%s2225_s3 + $0x10] sm:$0xff] %v1032_v12 }
 0x14a   :  { %v1097_v7 = vadd.f32 %v1065_v1, %v1033_v26 }
 0x14c   :  { %1130 = vst.msk [vmem:[%s2225_s3 + $0x18] sm:$0xff] %vm19_vm0, %v1097_v7  ;;  %v688_v46 = vpop.f32.mrf.mxu0 }
 0x14d   :  { %v776_v14 = vadd.f32 %v688_v46, %v1874_v34  ;;  %v737_v29 = vpop.f32.mrf.mxu1 }
 0x14e   :  { %v777_v25 = vadd.f32 %v737_v29, %v1876_v53  ;;  %v948_v5 = vpop.f32.mrf.mxu2  ;;  %v1075_v29 = vld [vmem:[%s2225_s3 + $0x68] sm:$0xff] }
 0x14f   :  { %v1034_v43 = vadd.f32 %v946_v48, %v776_v14  ;;  %v997_v57 = vpop.f32.mrf.mxu3  ;;  %v1073_v48 = vld [vmem:[%s2225_s3 + $0x58] sm:$0xff] }
 0x150   :  { %v1035_v13 = vadd.f32 %v995_v36, %v777_v25 }
 0x151   :  { %1131 = vst [vmem:[%s2225_s3 + $0x20] sm:$0xff] %v1034_v43 }
 0x152   :  { %v1099_v40 = vadd.f32 %v1067_v30, %v1035_v13 }
 0x154   :  { %1132 = vst.msk [vmem:[%s2225_s3 + $0x28] sm:$0xff] %vm19_vm0, %v1099_v40  ;;  %v690_v34 = vpop.f32.mrf.mxu0 }
 0x155   :  { %v778_v53 = vadd.f32 %v690_v34, %v1881_v17  ;;  %v739_v55 = vpop.f32.mrf.mxu1  ;;  %v1077_v34 = vld [vmem:[%s2225_s3 + $0x78] sm:$0xff] }
 0x156   :  { %v779_v54 = vadd.f32 %v739_v55, %v1883_v23  ;;  %v951_v21 = vpop.f32.mrf.mxu2 }
 0x157   :  { %v1036_v8 = vadd.f32 %v948_v5, %v778_v53  ;;  %v1000_v33 = vpop.f32.mrf.mxu3 }
 0x158   :  { %v1037_v45 = vadd.f32 %v997_v57, %v779_v54 }
 0x159   :  { %1133 = vst [vmem:[%s2225_s3 + $0x30] sm:$0xff] %v1036_v8 }
 0x15a   :  { %v1101_v9 = vadd.f32 %v1069_v24, %v1037_v45  ;;  %v1079_v45 = vld [vmem:[%s2225_s3 + $0x88] sm:$0xff] }
 0x15c   :  { %1134 = vst.msk [vmem:[%s2225_s3 + $0x38] sm:$0xff] %vm19_vm0, %v1101_v9  ;;  %v693_v17 = vpop.f32.mrf.mxu0 }
 0x15d   :  { %v780_v23 = vadd.f32 %v693_v17, %v1888_v62  ;;  %v742_v38 = vpop.f32.mrf.mxu1 }
 0x15e   :  { %v781_v10 = vadd.f32 %v742_v38, %v1890_v2  ;;  %v953_v60 = vpop.f32.mrf.mxu2 }
 0x15f   :  { %v1038_v61 = vadd.f32 %v951_v21, %v780_v23  ;;  %v1002_v0 = vpop.f32.mrf.mxu3 }
 0x160   :  { %v1039_v39 = vadd.f32 %v1000_v33, %v781_v10 }
 0x161   :  { %1135 = vst [vmem:[%s2225_s3 + $0x40] sm:$0xff] %v1038_v61 }
 0x162   :  { %v1103_v16 = vadd.f32 %v1071_v37, %v1039_v39  ;;  %v1081_v37 = vld [vmem:[%s2225_s3 + $0x98] sm:$0xff] }
 0x164   :  { %1136 = vst.msk [vmem:[%s2225_s3 + $0x48] sm:$0xff] %vm19_vm0, %v1103_v16  ;;  %v695_v62 = vpop.f32.mrf.mxu0 }
 0x165   :  { %v782_v2 = vadd.f32 %v695_v62, %v1895_v27  ;;  %v744_v31 = vpop.f32.mrf.mxu1 }
 0x166   :  { %v783_v58 = vadd.f32 %v744_v31, %v1897_v28  ;;  %v956_v4 = vpop.f32.mrf.mxu2 }
 0x167   :  { %v1040_v6 = vadd.f32 %v953_v60, %v782_v2  ;;  %v1005_v12 = vpop.f32.mrf.mxu3 }
 0x168   :  { %v1041_v1 = vadd.f32 %v1002_v0, %v783_v58 }
 0x169   :  { %1137 = vst [vmem:[%s2225_s3 + $0x50] sm:$0xff] %v1040_v6 }
 0x16a   :  { %v1105_v36 = vadd.f32 %v1073_v48, %v1041_v1 }
 0x16c   :  { %1138 = vst.msk [vmem:[%s2225_s3 + $0x58] sm:$0xff] %vm19_vm0, %v1105_v36  ;;  %v698_v27 = vpop.f32.mrf.mxu0 }
 0x16d   :  { %v784_v28 = vadd.f32 %v698_v27, %v1902_v52  ;;  %v747_v26 = vpop.f32.mrf.mxu1 }
 0x16e   :  { %v785_v7 = vadd.f32 %v747_v26, %v1904_v42  ;;  %v958_v46 = vpop.f32.mrf.mxu2 }
 0x16f   :  { %v1042_v14 = vadd.f32 %v956_v4, %v784_v28  ;;  %v1007_v25 = vpop.f32.mrf.mxu3  ;;  %v1083_v4 = vld [vmem:[%s2225_s3 + $0xa8] sm:$0xff]  ;;  %v1085_v28 = vld [vmem:[%s2225_s3 + $0xb8] sm:$0xff] }
 0x170   :  { %v1043_v5 = vadd.f32 %v1005_v12, %v785_v7 }
 0x171   :  { %1139 = vst [vmem:[%s2225_s3 + $0x60] sm:$0xff] %v1042_v14 }
 0x172   :  { %v1107_v43 = vadd.f32 %v1075_v29, %v1043_v5 }
 0x174   :  { %1140 = vst.msk [vmem:[%s2225_s3 + $0x68] sm:$0xff] %vm19_vm0, %v1107_v43  ;;  %v700_v52 = vpop.f32.mrf.mxu0  ;;  %v1087_v43 = vld [vmem:[%s2225_s3 + $0xc8] sm:$0xff] }
 0x175   :  { %v786_v42 = vadd.f32 %v700_v52, %v1909_v63  ;;  %v749_v30 = vpop.f32.mrf.mxu1 }
 0x176   :  { %v787_v57 = vadd.f32 %v749_v30, %v1911_v50  ;;  %v961_v13 = vpop.f32.mrf.mxu2 }
 0x177   :  { %v1044_v40 = vadd.f32 %v958_v46, %v786_v42  ;;  %v1010_v53 = vpop.f32.mrf.mxu3 }
 0x178   :  { %v1045_v55 = vadd.f32 %v1007_v25, %v787_v57 }
 0x179   :  { %1141 = vst [vmem:[%s2225_s3 + $0x70] sm:$0xff] %v1044_v40 }
 0x17a   :  { %v1109_v54 = vadd.f32 %v1077_v34, %v1045_v55 }
 0x17c   :  { %1142 = vst.msk [vmem:[%s2225_s3 + $0x78] sm:$0xff] %vm19_vm0, %v1109_v54  ;;  %v703_v63 = vpop.f32.mrf.mxu0 }
 0x17d   :  { %v788_v50 = vadd.f32 %v703_v63, %v1916_v56  ;;  %v752_v21 = vpop.f32.mrf.mxu1 }
 0x17e   :  { %v789_v8 = vadd.f32 %v752_v21, %v1918_v49  ;;  %v963_v24 = vpop.f32.mrf.mxu2 }
 0x17f   :  { %v1046_v33 = vadd.f32 %v961_v13, %v788_v50  ;;  %v1012_v9 = vpop.f32.mrf.mxu3 }
 0x180   :  { %v1047_v17 = vadd.f32 %v1010_v53, %v789_v8  ;;  %v1089_v53 = vld [vmem:[%s2225_s3 + $0xd8] sm:$0xff] }
 0x181   :  { %1143 = vst [vmem:[%s2225_s3 + $0x80] sm:$0xff] %v1046_v33  ;;  %v1091_v33 = vld [vmem:[%s2225_s3 + $0xe8] sm:$0xff] }
 0x182   :  { %v1111_v23 = vadd.f32 %v1079_v45, %v1047_v17 }
 0x184   :  { %1144 = vst.msk [vmem:[%s2225_s3 + $0x88] sm:$0xff] %vm19_vm0, %v1111_v23  ;;  %v705_v56 = vpop.f32.mrf.mxu0 }
 0x185   :  { %v790_v49 = vadd.f32 %v705_v56, %v1923_v32  ;;  %v754_v38 = vpop.f32.mrf.mxu1 }
 0x186   :  { %v791_v10 = vadd.f32 %v754_v38, %v1925_v35  ;;  %v966_v60 = vpop.f32.mrf.mxu2 }
 0x187   :  { %v1048_v61 = vadd.f32 %v963_v24, %v790_v49  ;;  %v1015_v0 = vpop.f32.mrf.mxu3 }
 0x188   :  { %v1049_v39 = vadd.f32 %v1012_v9, %v791_v10  ;;  %v1093_v10 = vld [vmem:[%s2225_s3 + $0xf8] sm:$0xff] }
 0x189   :  { %1145 = vst [vmem:[%s2225_s3 + $0x90] sm:$0xff] %v1048_v61 }
 0x18a   :  { %v1113_v16 = vadd.f32 %v1081_v37, %v1049_v39 }
 0x18c   :  { %1146 = vst.msk [vmem:[%s2225_s3 + $0x98] sm:$0xff] %vm19_vm0, %v1113_v16  ;;  %v708_v32 = vpop.f32.mrf.mxu0 }
 0x18d   :  { %v792_v35 = vadd.f32 %v708_v32, %v1930_v59  ;;  %v757_v62 = vpop.f32.mrf.mxu1 }
 0x18e   :  { %v793_v2 = vadd.f32 %v757_v62, %v1932_v15  ;;  %v968_v31 = vpop.f32.mrf.mxu2 }
 0x18f   :  { %v1050_v58 = vadd.f32 %v966_v60, %v792_v35  ;;  %v1017_v6 = vpop.f32.mrf.mxu3 }
 0x190   :  { %v1051_v48 = vadd.f32 %v1015_v0, %v793_v2 }
 0x191   :  { %1147 = vst [vmem:[%s2225_s3 + $0xa0] sm:$0xff] %v1050_v58 }
 0x192   :  { %v1115_v12 = vadd.f32 %v1083_v4, %v1051_v48 }
 0x194   :  { %1148 = vst.msk [vmem:[%s2225_s3 + $0xa8] sm:$0xff] %vm19_vm0, %v1115_v12  ;;  %v710_v59 = vpop.f32.mrf.mxu0 }
 0x195   :  { %v794_v15 = vadd.f32 %v710_v59, %v1937_v51  ;;  %v759_v1 = vpop.f32.mrf.mxu1 }
 0x196   :  { %v795_v36 = vadd.f32 %v759_v1, %v1939_v22  ;;  %v971_v7 = vpop.f32.mrf.mxu2 }
 0x197   :  { %v1052_v27 = vadd.f32 %v968_v31, %v794_v15  ;;  %v1020_v46 = vpop.f32.mrf.mxu3 }
 0x198   :  { %v1053_v26 = vadd.f32 %v1017_v6, %v795_v36 }
 0x199   :  { %1149 = vst [vmem:[%s2225_s3 + $0xb0] sm:$0xff] %v1052_v27 }
 0x19a   :  { %v1117_v14 = vadd.f32 %v1085_v28, %v1053_v26 }
 0x19c   :  { %1150 = vst.msk [vmem:[%s2225_s3 + $0xb8] sm:$0xff] %vm19_vm0, %v1117_v14  ;;  %v713_v51 = vpop.f32.mrf.mxu0 }
 0x19d   :  { %v796_v22 = vadd.f32 %v713_v51, %v1956_v18  ;;  %v762_v29 = vpop.f32.mrf.mxu1 }
 0x19e   :  { %v797_v25 = vadd.f32 %v762_v29, %v1962_v19  ;;  %v973_v30 = vpop.f32.mrf.mxu2 }
 0x19f   :  { %v1054_v5 = vadd.f32 %v971_v7, %v796_v22  ;;  %v1022_v57 = vpop.f32.mrf.mxu3 }
 0x1a0   :  { %v1055_v52 = vadd.f32 %v1020_v46, %v797_v25 }
 0x1a1   :  { %1151 = vst [vmem:[%s2225_s3 + $0xc0] sm:$0xff] %v1054_v5 }
 0x1a2   :  { %v1119_v42 = vadd.f32 %v1087_v43, %v1055_v52 }
 0x1a4   :  { %1152 = vst.msk [vmem:[%s2225_s3 + $0xc8] sm:$0xff] %vm19_vm0, %v1119_v42  ;;  %v715_v18 = vpop.f32.mrf.mxu0 }
 0x1a5   :  { %v798_v19 = vadd.f32 %v715_v18, %v1995_v47  ;;  %v764_v13 = vpop.f32.mrf.mxu1 }
 0x1a6   :  { %v799_v40 = vadd.f32 %v764_v13, %v2001_v41  ;;  %v976_v47 = vpop.f32.mrf.mxu2 }
 0x1a7   :  { %v1056_v34 = vadd.f32 %v973_v30, %v798_v19  ;;  %v1025_v50 = vpop.f32.mrf.mxu3 }
 0x1a8   :  { %v1057_v55 = vadd.f32 %v1022_v57, %v799_v40 }
 0x1a9   :  { %1153 = vst [vmem:[%s2225_s3 + $0xd0] sm:$0xff] %v1056_v34 }
 0x1aa   :  { %v1121_v54 = vadd.f32 %v1089_v53, %v1057_v55 }
 0x1ac   :  { %1154 = vst.msk [vmem:[%s2225_s3 + $0xd8] sm:$0xff] %vm19_vm0, %v1121_v54  ;;  %v718_v63 = vpop.f32.mrf.mxu0 }
 0x1ad   :  { %v800_v41 = vadd.f32 %v718_v63, %v2022_v20  ;;  %v767_v21 = vpop.f32.mrf.mxu1 }
 0x1ae   :  { %v801_v8 = vadd.f32 %v767_v21, %v2024_v44  ;;  %v978_v23 = vpop.f32.mrf.mxu2 }
 0x1af   :  { %v1058_v24 = vadd.f32 %v976_v47, %v800_v41  ;;  %v1027_v49 = vpop.f32.mrf.mxu3 }
 0x1b0   :  { %v1059_v45 = vadd.f32 %v1025_v50, %v801_v8 }
 0x1b1   :  { %1155 = vst [vmem:[%s2225_s3 + $0xe0] sm:$0xff] %v1058_v24 }
 0x1b2   :  { %v1123_v9 = vadd.f32 %v1091_v33, %v1059_v45 }
 0x1b4   :  { %1156 = vst.msk [vmem:[%s2225_s3 + $0xe8] sm:$0xff] %vm19_vm0, %v1123_v9  ;;  %v720_v20 = vpop.f32.mrf.mxu0 }
 0x1b5   :  { %v802_v17 = vadd.f32 %v720_v20, %v2026_v3  ;;  %v769_v44 = vpop.f32.mrf.mxu1 }
 0x1b6   :  { %v803_v56 = vadd.f32 %v769_v44, %v2028_v11 }
 0x1b7   :  { %v1060_v38 = vadd.f32 %v978_v23, %v802_v17 }
 0x1b8   :  { %v1061_v60 = vadd.f32 %v1027_v49, %v803_v56 }
 0x1b9   :  { %1157 = vst [vmem:[%s2225_s3 + $0xf0] sm:$0xff] %v1060_v38 }
 0x1ba   :  { %v1125_v61 = vadd.f32 %v1093_v10, %v1061_v60 }
 0x1bc   :  { %1158 = vst.msk [vmem:[%s2225_s3 + $0xf8] sm:$0xff] %vm19_vm0, %v1125_v61 }

// kernel: recommender_forward.7
= control target key start
LH: loop header
LB: loop body
LE: loop exit
PB: predicated region body
PF: predicated region fallthrough
CT: control target
= control target key end

     0   :  { %vm21_vm0 = vcmask 261120   ;;  %vm1012_vm1 = vcmask 1043456   ;;  %vm1013_vm2 = vcmask 261124   ;;  %s2154_s1 = inlined_call_operand.vmem [shape: bf16[128,160], index: 1, kind: input, shape index: {}]   ;;  %s2155_s0 = inlined_call_operand.vmem [shape: bf16[4,128,128], index: 0, kind: input, shape index: {}]   ;;  %s2156_s2 = inlined_call_operand.vmem [shape: f32[128,160], index: 2, kind: input, shape index: {}]   ;;  %s2157_s4 = inlined_call_operand.vmem [shape: f32[128,160], index: 4, kind: output, shape index: {1}]   ;;  %s2158_s3 = inlined_call_operand.vmem [shape: bf16[128,160], index: 3, kind: output, shape index: {0}]  }
   0x1   :  { %v1273_v0 = vld [vmem:[%s2154_s1 + $0x70] sm:$0xf]  ;;  %v1422_v1 = vld [vmem:[%s2154_s1 + $0x74] sm:$0xf0]  ;;  %v1421_v2 = vld [vmem:[%s2154_s1 + $0x74] sm:$0xf] }
   0x2   :  { %v1491_v3 = vor.u32 %v1422_v1, %v1273_v0  ;;  %v1275_v4 = vld [vmem:[%s2154_s1 + $0x78] sm:$0xf0]  ;;  %v1265_v5 = vld [vmem:[%s2154_s1 + $0x60] sm:$0xf]  ;;  %v1420_v6 = vld [vmem:[%s2154_s1 + $0x64] sm:$0xf0] }
   0x3   :  { %v1502_v7 = vor.u32 %v1421_v2, %v1275_v4  ;;  %v1419_v8 = vld [vmem:[%s2154_s1 + $0x64] sm:$0xf]  ;;  %v1267_v9 = vld [vmem:[%s2154_s1 + $0x68] sm:$0xf0]  ;;  %v1512_v10 = vor.u32 %v1420_v6, %v1265_v5  ;;  %v1257_v12 = vld [vmem:[%s2154_s1 + $0x50] sm:$0xf] }
   0x4   :  { %230 = vmatpush.bf16.msra.mxu0 %v1491_v3  ;;  %376 = vmatpush.bf16.msra.mxu2 %v1491_v3  ;;  %v1516_v11 = vor.u32 %v1419_v8, %v1267_v9  ;;  %v1418_v13 = vld [vmem:[%s2154_s1 + $0x54] sm:$0xf0]  ;;  %v1417_v14 = vld [vmem:[%s2154_s1 + $0x54] sm:$0xf]  ;;  %v1259_v15 = vld [vmem:[%s2154_s1 + $0x58] sm:$0xf0] }
   0x5   :  { %279 = vmatpush.bf16.msra.mxu1 %v1502_v7  ;;  %425 = vmatpush.bf16.msra.mxu3 %v1502_v7  ;;  %v1532_v16 = vor.u32 %v1418_v13, %v1257_v12  ;;  %v1536_v17 = vor.u32 %v1417_v14, %v1259_v15  ;;  %v1249_v18 = vld [vmem:[%s2154_s1 + $0x40] sm:$0xf]  ;;  %v1416_v19 = vld [vmem:[%s2154_s1 + $0x44] sm:$0xf0]  ;;  %v1415_v20 = vld [vmem:[%s2154_s1 + $0x44] sm:$0xf] }
   0x6   :  { %v1251_v21 = vld [vmem:[%s2154_s1 + $0x48] sm:$0xf0]  ;;  %v1552_v22 = vor.u32 %v1416_v19, %v1249_v18  ;;  %v1241_v24 = vld [vmem:[%s2154_s1 + $0x30] sm:$0xf]  ;;  %v1414_v25 = vld [vmem:[%s2154_s1 + $0x34] sm:$0xf0] }
   0x7   :  { %v1556_v23 = vor.u32 %v1415_v20, %v1251_v21  ;;  %v1413_v26 = vld [vmem:[%s2154_s1 + $0x34] sm:$0xf]  ;;  %v1243_v27 = vld [vmem:[%s2154_s1 + $0x38] sm:$0xf0]  ;;  %v1572_v28 = vor.u32 %v1414_v25, %v1241_v24  ;;  %v1233_v30 = vld [vmem:[%s2154_s1 + $0x20] sm:$0xf] }
   0x8   :  { %231 = vmatpush.bf16.msra.mxu0 %v1512_v10  ;;  %377 = vmatpush.bf16.msra.mxu2 %v1512_v10  ;;  %v1576_v29 = vor.u32 %v1413_v26, %v1243_v27  ;;  %v1412_v31 = vld [vmem:[%s2154_s1 + $0x24] sm:$0xf0]  ;;  %v1411_v32 = vld [vmem:[%s2154_s1 + $0x24] sm:$0xf]  ;;  %v1235_v33 = vld [vmem:[%s2154_s1 + $0x28] sm:$0xf0] }
   0x9   :  { %280 = vmatpush.bf16.msra.mxu1 %v1516_v11  ;;  %426 = vmatpush.bf16.msra.mxu3 %v1516_v11  ;;  %v1234_v34 = vor.u32 %v1412_v31, %v1233_v30  ;;  %v1238_v35 = vor.u32 %v1411_v32, %v1235_v33  ;;  %v1225_v36 = vld [vmem:[%s2154_s1 + $0x10] sm:$0xf]  ;;  %v1410_v37 = vld [vmem:[%s2154_s1 + $0x14] sm:$0xf0]  ;;  %v1409_v38 = vld [vmem:[%s2154_s1 + $0x14] sm:$0xf] }
   0xa   :  { %v1227_v39 = vld [vmem:[%s2154_s1 + $0x18] sm:$0xf0]  ;;  %v1226_v40 = vor.u32 %v1410_v37, %v1225_v36  ;;  %v1217_v42 = vld [vmem:[%s2154_s1] sm:$0xf]  ;;  %v1408_v43 = vld [vmem:[%s2154_s1 + $0x4] sm:$0xf0] }
   0xb   :  { %v1230_v41 = vor.u32 %v1409_v38, %v1227_v39  ;;  %v1407_v44 = vld [vmem:[%s2154_s1 + $0x4] sm:$0xf]  ;;  %v1219_v45 = vld [vmem:[%s2154_s1 + $0x8] sm:$0xf0]  ;;  %v1218_v46 = vor.u32 %v1408_v43, %v1217_v42  ;;  %v1433_v52 = vld [vmem:[%s2155_s0 + $0x50] sm:$0xff] }
   0xc   :  { %232 = vmatpush.bf16.msra.mxu0 %v1532_v16  ;;  %378 = vmatpush.bf16.msra.mxu2 %v1532_v16  ;;  %v1222_v47 = vor.u32 %v1407_v44, %v1219_v45  ;;  %v1431_v48 = vld [vmem:[%s2155_s0 + $0x40] sm:$0xff]  ;;  %v1432_v50 = vld [vmem:[%s2155_s0 + $0x48] sm:$0xff]  ;;  %v1425_v53 = vld [vmem:[%s2155_s0 + $0x10] sm:$0xff] }
   0xd   :  { %281 = vmatpush.bf16.msra.mxu1 %v1536_v17  ;;  %427 = vmatpush.bf16.msra.mxu3 %v1536_v17  ;;  %v1423_v49 = vld [vmem:[%s2155_s0] sm:$0xff]  ;;  %v1424_v51 = vld [vmem:[%s2155_s0 + $0x8] sm:$0xff]  ;;  %v1434_v54 = vld [vmem:[%s2155_s0 + $0x58] sm:$0xff] }
   0xe   :  { %v1426_v55 = vld [vmem:[%s2155_s0 + $0x18] sm:$0xff]  ;;  %v1435_v56 = vld [vmem:[%s2155_s0 + $0x60] sm:$0xff]  ;;  %v1436_v58 = vld [vmem:[%s2155_s0 + $0x68] sm:$0xff] }
   0xf   :  { %v1427_v57 = vld [vmem:[%s2155_s0 + $0x20] sm:$0xff]  ;;  %v1428_v59 = vld [vmem:[%s2155_s0 + $0x28] sm:$0xff]  ;;  %v1437_v60 = vld [vmem:[%s2155_s0 + $0x70] sm:$0xff] }
  0x10   :  { %233 = vmatpush.bf16.msra.mxu0 %v1552_v22  ;;  %379 = vmatpush.bf16.msra.mxu2 %v1552_v22  ;;  %v1429_v61 = vld [vmem:[%s2155_s0 + $0x30] sm:$0xff]  ;;  %v1438_v62 = vld [vmem:[%s2155_s0 + $0x78] sm:$0xff]  ;;  %v1439_v0 = vld [vmem:[%s2155_s0 + $0x80] sm:$0xff] }
  0x11   :  { %282 = vmatpush.bf16.msra.mxu1 %v1556_v23  ;;  %428 = vmatpush.bf16.msra.mxu3 %v1556_v23  ;;  %v1430_v63 = vld [vmem:[%s2155_s0 + $0x38] sm:$0xff]  ;;  %v1447_v1 = vld [vmem:[%s2155_s0 + $0xc0] sm:$0xff]  ;;  %v1440_v13 = vld [vmem:[%s2155_s0 + $0x88] sm:$0xff] }
  0x12   :  { %v1448_v14 = vld [vmem:[%s2155_s0 + $0xc8] sm:$0xff]  ;;  %v1441_v27 = vld [vmem:[%s2155_s0 + $0x90] sm:$0xff]  ;;  %v1450_v42 = vld [vmem:[%s2155_s0 + $0xd8] sm:$0xff] }
  0x13   :  { %vm1831_vm3 = vmor %vm1013_vm2, %vm1012_vm1 }
  0x14   :  { %234 = vmatpush.bf16.msra.mxu0 %v1572_v28  ;;  %380 = vmatpush.bf16.msra.mxu2 %v1572_v28 }
  0x15   :  { %283 = vmatpush.bf16.msra.mxu1 %v1576_v29  ;;  %429 = vmatpush.bf16.msra.mxu3 %v1576_v29 }
  0x18   :  { %235 = vmatpush.bf16.msra.mxu0 %v1234_v34  ;;  %381 = vmatpush.bf16.msra.mxu2 %v1234_v34 }
  0x19   :  { %284 = vmatpush.bf16.msra.mxu1 %v1238_v35  ;;  %430 = vmatpush.bf16.msra.mxu3 %v1238_v35 }
  0x1c   :  { %236 = vmatpush.bf16.msra.mxu0 %v1226_v40  ;;  %382 = vmatpush.bf16.msra.mxu2 %v1226_v40 }
  0x1d   :  { %285 = vmatpush.bf16.msra.mxu1 %v1230_v41  ;;  %431 = vmatpush.bf16.msra.mxu3 %v1230_v41 }
  0x20   :  { %237 = vmatpush.bf16.msra.mxu0 %v1218_v46  ;;  %383 = vmatpush.bf16.msra.mxu2 %v1218_v46 }
  0x21   :  { %286 = vmatpush.bf16.msra.mxu1 %v1222_v47  ;;  %432 = vmatpush.bf16.msra.mxu3 %v1222_v47 }
  0x23   :  { %238 = vmatmul.bf16.vlgmr.msra.gmra.mxu0 %v1431_v48  ;;  %384 = vmatmul.bf16.vlgmr.msra.gmra.mxu2 %v1423_v49 }
  0x24   :  { %734 = vmatpush.bf16.msrb.mxu2 %v1491_v3  ;;  %287 = vmatmul.bf16.vlgmr.msra.gmra.mxu1 %v1431_v48 }
  0x25   :  { %783 = vmatpush.bf16.msrb.mxu3 %v1502_v7  ;;  %539 = vmatpush.bf16.msrb.mxu0 %v1491_v3 }
  0x26   :  { %433 = vmatmul.bf16.vlgmr.msra.gmra.mxu3 %v1423_v49  ;;  %588 = vmatpush.bf16.msrb.mxu1 %v1502_v7 }
  0x28   :  { %735 = vmatpush.bf16.msrb.mxu2 %v1512_v10 }
  0x29   :  { %784 = vmatpush.bf16.msrb.mxu3 %v1516_v11  ;;  %540 = vmatpush.bf16.msrb.mxu0 %v1512_v10 }
  0x2a   :  { %589 = vmatpush.bf16.msrb.mxu1 %v1516_v11 }
  0x2c   :  { %736 = vmatpush.bf16.msrb.mxu2 %v1532_v16 }
  0x2d   :  { %785 = vmatpush.bf16.msrb.mxu3 %v1536_v17  ;;  %541 = vmatpush.bf16.msrb.mxu0 %v1532_v16 }
  0x2e   :  { %590 = vmatpush.bf16.msrb.mxu1 %v1536_v17 }
  0x30   :  { %737 = vmatpush.bf16.msrb.mxu2 %v1552_v22 }
  0x31   :  { %786 = vmatpush.bf16.msrb.mxu3 %v1556_v23  ;;  %542 = vmatpush.bf16.msrb.mxu0 %v1552_v22 }
  0x32   :  { %591 = vmatpush.bf16.msrb.mxu1 %v1556_v23 }
  0x33   :  { %243 = vmatmul.bf16.gmra.mxu0 %v1432_v50  ;;  %389 = vmatmul.bf16.gmra.mxu2 %v1424_v51 }
  0x34   :  { %738 = vmatpush.bf16.msrb.mxu2 %v1572_v28  ;;  %292 = vmatmul.bf16.gmra.mxu1 %v1432_v50 }
  0x35   :  { %787 = vmatpush.bf16.msrb.mxu3 %v1576_v29  ;;  %543 = vmatpush.bf16.msrb.mxu0 %v1572_v28  ;;  %v1449_v28 = vld [vmem:[%s2155_s0 + $0xd0] sm:$0xff] }
  0x36   :  { %438 = vmatmul.bf16.gmra.mxu3 %v1424_v51  ;;  %592 = vmatpush.bf16.msrb.mxu1 %v1576_v29 }
  0x38   :  { %739 = vmatpush.bf16.msrb.mxu2 %v1234_v34 }
  0x39   :  { %788 = vmatpush.bf16.msrb.mxu3 %v1238_v35  ;;  %544 = vmatpush.bf16.msrb.mxu0 %v1234_v34 }
  0x3a   :  { %593 = vmatpush.bf16.msrb.mxu1 %v1238_v35 }
  0x3c   :  { %740 = vmatpush.bf16.msrb.mxu2 %v1226_v40 }
  0x3d   :  { %789 = vmatpush.bf16.msrb.mxu3 %v1230_v41  ;;  %545 = vmatpush.bf16.msrb.mxu0 %v1226_v40 }
  0x3e   :  { %594 = vmatpush.bf16.msrb.mxu1 %v1230_v41  ;;  %v1442_v41 = vld [vmem:[%s2155_s0 + $0x98] sm:$0xff] }
  0x40   :  { %741 = vmatpush.bf16.msrb.mxu2 %v1218_v46 }
  0x41   :  { %790 = vmatpush.bf16.msrb.mxu3 %v1222_v47  ;;  %546 = vmatpush.bf16.msrb.mxu0 %v1218_v46 }
  0x42   :  { %595 = vmatpush.bf16.msrb.mxu1 %v1222_v47 }
  0x43   :  { %248 = vmatmul.bf16.gmra.mxu0 %v1433_v52  ;;  %394 = vmatmul.bf16.gmra.mxu2 %v1425_v53 }
  0x44   :  { %297 = vmatmul.bf16.gmra.mxu1 %v1433_v52 }
  0x46   :  { %443 = vmatmul.bf16.gmra.mxu3 %v1425_v53 }
  0x53   :  { %253 = vmatmul.bf16.gmra.mxu0 %v1434_v54  ;;  %399 = vmatmul.bf16.gmra.mxu2 %v1426_v55 }
  0x54   :  { %302 = vmatmul.bf16.gmra.mxu1 %v1434_v54 }
  0x56   :  { %448 = vmatmul.bf16.gmra.mxu3 %v1426_v55  ;;  %v1443_v55 = vld [vmem:[%s2155_s0 + $0xa0] sm:$0xff] }
  0x63   :  { %258 = vmatmul.bf16.gmra.mxu0 %v1435_v56  ;;  %404 = vmatmul.bf16.gmra.mxu2 %v1427_v57 }
  0x64   :  { %307 = vmatmul.bf16.gmra.mxu1 %v1435_v56  ;;  %v1451_v56 = vld [vmem:[%s2155_s0 + $0xe0] sm:$0xff] }
  0x66   :  { %453 = vmatmul.bf16.gmra.mxu3 %v1427_v57 }
  0x73   :  { %263 = vmatmul.bf16.gmra.mxu0 %v1436_v58  ;;  %409 = vmatmul.bf16.gmra.mxu2 %v1428_v59 }
  0x74   :  { %312 = vmatmul.bf16.gmra.mxu1 %v1436_v58 }
  0x76   :  { %458 = vmatmul.bf16.gmra.mxu3 %v1428_v59 }
  0x83   :  { %268 = vmatmul.bf16.gmra.mxu0 %v1437_v60  ;;  %414 = vmatmul.bf16.gmra.mxu2 %v1429_v61 }
  0x84   :  { %317 = vmatmul.bf16.gmra.mxu1 %v1437_v60 }
  0x86   :  { %463 = vmatmul.bf16.gmra.mxu3 %v1429_v61 }
  0x93   :  { %273 = vmatmul.bf16.gmra.mxu0 %v1438_v62  ;;  %419 = vmatmul.bf16.gmra.mxu2 %v1430_v63 }
  0x94   :  { %322 = vmatmul.bf16.gmra.mxu1 %v1438_v62 }
  0x96   :  { %468 = vmatmul.bf16.gmra.mxu3 %v1430_v63 }
  0xa0   :  { %v239_v2 = vpop.f32.mrf.mxu0 }
  0xa1   :  { %v288_v3 = vpop.f32.mrf.mxu1 }
  0xa3   :  { %547 = vmatmul.bf16.vlgmr.msrb.gmra.mxu0 %v1439_v0  ;;  %742 = vmatmul.bf16.vlgmr.msrb.gmra.mxu2 %v1447_v1 }
  0xa4   :  { %596 = vmatmul.bf16.vlgmr.msrb.gmra.mxu1 %v1439_v0 }
  0xa6   :  { %791 = vmatmul.bf16.vlgmr.msrb.gmra.mxu3 %v1447_v1  ;;  %v385_v4 = vpop.f32.mrf.mxu2 }
  0xa7   :  { %v1692_v5 = vadd.f32 %v385_v4, %v239_v2 }
  0xa8   :  { %v241_v8 = vpop.f32.mrf.mxu0 }
  0xa9   :  { %v434_v6 = vpop.f32.mrf.mxu3  ;;  %v290_v9 = vpop.f32.mrf.mxu1 }
  0xaa   :  { %v1694_v7 = vadd.f32 %v434_v6, %v288_v3  ;;  %v1444_v6 = vld [vmem:[%s2155_s0 + $0xa8] sm:$0xff] }
  0xae   :  { %v387_v10 = vpop.f32.mrf.mxu2 }
  0xaf   :  { %v1696_v11 = vadd.f32 %v387_v10, %v241_v8  ;;  %v1452_v8 = vld [vmem:[%s2155_s0 + $0xe8] sm:$0xff] }
  0xb0   :  { %v244_v16 = vpop.f32.mrf.mxu0 }
  0xb1   :  { %v436_v12 = vpop.f32.mrf.mxu3  ;;  %v293_v17 = vpop.f32.mrf.mxu1 }
  0xb2   :  { %v1704_v15 = vadd.f32 %v436_v12, %v290_v9 }
  0xb3   :  { %552 = vmatmul.bf16.gmra.mxu0 %v1440_v13  ;;  %747 = vmatmul.bf16.gmra.mxu2 %v1448_v14 }
  0xb4   :  { %601 = vmatmul.bf16.gmra.mxu1 %v1440_v13 }
  0xb6   :  { %796 = vmatmul.bf16.gmra.mxu3 %v1448_v14  ;;  %v390_v18 = vpop.f32.mrf.mxu2 }
  0xb7   :  { %v1706_v19 = vadd.f32 %v390_v18, %v244_v16 }
  0xb8   :  { %v246_v22 = vpop.f32.mrf.mxu0 }
  0xb9   :  { %v439_v20 = vpop.f32.mrf.mxu3  ;;  %v295_v23 = vpop.f32.mrf.mxu1 }
  0xba   :  { %v1708_v21 = vadd.f32 %v439_v20, %v293_v17 }
  0xbe   :  { %v392_v24 = vpop.f32.mrf.mxu2 }
  0xbf   :  { %v1710_v25 = vadd.f32 %v392_v24, %v246_v22 }
  0xc0   :  { %v249_v30 = vpop.f32.mrf.mxu0 }
  0xc1   :  { %v441_v26 = vpop.f32.mrf.mxu3  ;;  %v298_v31 = vpop.f32.mrf.mxu1 }
  0xc2   :  { %v1718_v29 = vadd.f32 %v441_v26, %v295_v23  ;;  %v1445_v26 = vld [vmem:[%s2155_s0 + $0xb0] sm:$0xff] }
  0xc3   :  { %557 = vmatmul.bf16.gmra.mxu0 %v1441_v27  ;;  %752 = vmatmul.bf16.gmra.mxu2 %v1449_v28 }
  0xc4   :  { %606 = vmatmul.bf16.gmra.mxu1 %v1441_v27  ;;  %v1453_v27 = vld [vmem:[%s2155_s0 + $0xf0] sm:$0xff] }
  0xc6   :  { %801 = vmatmul.bf16.gmra.mxu3 %v1449_v28  ;;  %v395_v32 = vpop.f32.mrf.mxu2 }
  0xc7   :  { %v1720_v33 = vadd.f32 %v395_v32, %v249_v30  ;;  %v1456_v32 = vmov 0.0  }
  0xc8   :  { %v251_v36 = vpop.f32.mrf.mxu0  ;;  %22 = vst.msk [vmem:[#allocation2 + $0x8] sm:$0xff] %vm21_vm0, %v1456_v32 }
  0xc9   :  { %v444_v34 = vpop.f32.mrf.mxu3  ;;  %v300_v37 = vpop.f32.mrf.mxu1  ;;  %24 = vst.msk [vmem:[#allocation2 + $0x18] sm:$0xff] %vm21_vm0, %v1456_v32 }
  0xca   :  { %v1722_v35 = vadd.f32 %v444_v34, %v298_v31  ;;  %26 = vst.msk [vmem:[#allocation2 + $0x28] sm:$0xff] %vm21_vm0, %v1456_v32 }
  0xcb   :  { %28 = vst.msk [vmem:[#allocation2 + $0x38] sm:$0xff] %vm21_vm0, %v1456_v32 }
  0xcc   :  { %30 = vst.msk [vmem:[#allocation2 + $0x48] sm:$0xff] %vm21_vm0, %v1456_v32 }
  0xcd   :  { %32 = vst.msk [vmem:[#allocation2 + $0x58] sm:$0xff] %vm21_vm0, %v1456_v32 }
  0xce   :  { %v397_v38 = vpop.f32.mrf.mxu2  ;;  %34 = vst.msk [vmem:[#allocation2 + $0x68] sm:$0xff] %vm21_vm0, %v1456_v32 }
  0xcf   :  { %v1724_v39 = vadd.f32 %v397_v38, %v251_v36  ;;  %36 = vst.msk [vmem:[#allocation2 + $0x78] sm:$0xff] %vm21_vm0, %v1456_v32 }
  0xd0   :  { %v254_v44 = vpop.f32.mrf.mxu0  ;;  %38 = vst.msk [vmem:[#allocation2 + $0x88] sm:$0xff] %vm21_vm0, %v1456_v32 }
  0xd1   :  { %v446_v40 = vpop.f32.mrf.mxu3  ;;  %v303_v45 = vpop.f32.mrf.mxu1  ;;  %40 = vst.msk [vmem:[#allocation2 + $0x98] sm:$0xff] %vm21_vm0, %v1456_v32 }
  0xd2   :  { %v1732_v43 = vadd.f32 %v446_v40, %v300_v37  ;;  %42 = vst.msk [vmem:[#allocation2 + $0xa8] sm:$0xff] %vm21_vm0, %v1456_v32 }
  0xd3   :  { %562 = vmatmul.bf16.gmra.mxu0 %v1442_v41  ;;  %757 = vmatmul.bf16.gmra.mxu2 %v1450_v42  ;;  %44 = vst.msk [vmem:[#allocation2 + $0xb8] sm:$0xff] %vm21_vm0, %v1456_v32 }
  0xd4   :  { %611 = vmatmul.bf16.gmra.mxu1 %v1442_v41  ;;  %46 = vst.msk [vmem:[#allocation2 + $0xc8] sm:$0xff] %vm21_vm0, %v1456_v32 }
  0xd5   :  { %48 = vst.msk [vmem:[#allocation2 + $0xd8] sm:$0xff] %vm21_vm0, %v1456_v32 }
  0xd6   :  { %806 = vmatmul.bf16.gmra.mxu3 %v1450_v42  ;;  %v400_v46 = vpop.f32.mrf.mxu2  ;;  %50 = vst.msk [vmem:[#allocation2 + $0xe8] sm:$0xff] %vm21_vm0, %v1456_v32 }
  0xd7   :  { %v1734_v47 = vadd.f32 %v400_v46, %v254_v44  ;;  %v1446_v46 = vld [vmem:[%s2155_s0 + $0xb8] sm:$0xff]  ;;  %52 = vst.msk [vmem:[#allocation2 + $0xf8] sm:$0xff] %vm21_vm0, %v1456_v32 }
  0xd8   :  { %v256_v50 = vpop.f32.mrf.mxu0 }
  0xd9   :  { %v449_v48 = vpop.f32.mrf.mxu3  ;;  %v305_v51 = vpop.f32.mrf.mxu1 }
  0xda   :  { %v1736_v49 = vadd.f32 %v449_v48, %v303_v45  ;;  %v1454_v48 = vld [vmem:[%s2155_s0 + $0xf8] sm:$0xff] }
  0xde   :  { %v402_v52 = vpop.f32.mrf.mxu2 }
  0xdf   :  { %v1738_v53 = vadd.f32 %v402_v52, %v256_v50 }
  0xe0   :  { %v259_v58 = vpop.f32.mrf.mxu0 }
  0xe1   :  { %v451_v54 = vpop.f32.mrf.mxu3  ;;  %v308_v59 = vpop.f32.mrf.mxu1 }
  0xe2   :  { %v1746_v57 = vadd.f32 %v451_v54, %v305_v51 }
  0xe3   :  { %567 = vmatmul.bf16.gmra.mxu0 %v1443_v55  ;;  %762 = vmatmul.bf16.gmra.mxu2 %v1451_v56 }
  0xe4   :  { %616 = vmatmul.bf16.gmra.mxu1 %v1443_v55 }
  0xe6   :  { %811 = vmatmul.bf16.gmra.mxu3 %v1451_v56  ;;  %v405_v60 = vpop.f32.mrf.mxu2 }
  0xe7   :  { %v1748_v61 = vadd.f32 %v405_v60, %v259_v58 }
  0xe8   :  { %v261_v0 = vpop.f32.mrf.mxu0 }
  0xe9   :  { %v454_v62 = vpop.f32.mrf.mxu3  ;;  %v310_v1 = vpop.f32.mrf.mxu1 }
  0xea   :  { %v1750_v63 = vadd.f32 %v454_v62, %v308_v59 }
  0xee   :  { %v407_v2 = vpop.f32.mrf.mxu2 }
  0xef   :  { %v1752_v3 = vadd.f32 %v407_v2, %v261_v0 }
  0xf0   :  { %v264_v10 = vpop.f32.mrf.mxu0 }
  0xf1   :  { %v456_v4 = vpop.f32.mrf.mxu3  ;;  %v313_v12 = vpop.f32.mrf.mxu1 }
  0xf2   :  { %v1760_v9 = vadd.f32 %v456_v4, %v310_v1 }
  0xf3   :  { %572 = vmatmul.bf16.gmra.mxu0 %v1444_v6  ;;  %767 = vmatmul.bf16.gmra.mxu2 %v1452_v8 }
  0xf4   :  { %621 = vmatmul.bf16.gmra.mxu1 %v1444_v6 }
  0xf6   :  { %816 = vmatmul.bf16.gmra.mxu3 %v1452_v8  ;;  %v410_v13 = vpop.f32.mrf.mxu2 }
  0xf7   :  { %v1762_v14 = vadd.f32 %v410_v13, %v264_v10 }
  0xf8   :  { %v266_v18 = vpop.f32.mrf.mxu0 }
  0xf9   :  { %v459_v16 = vpop.f32.mrf.mxu3  ;;  %v315_v20 = vpop.f32.mrf.mxu1 }
  0xfa   :  { %v1764_v17 = vadd.f32 %v459_v16, %v313_v12 }
  0xfe   :  { %v412_v22 = vpop.f32.mrf.mxu2 }
  0xff   :  { %v1766_v23 = vadd.f32 %v412_v22, %v266_v18  ;;  %v865_v18 = vld [vmem:[#allocation2 + $0x8] sm:$0xff] }
 0x100   :  { %v269_v30 = vpop.f32.mrf.mxu0 }
 0x101   :  { %v461_v24 = vpop.f32.mrf.mxu3  ;;  %v318_v31 = vpop.f32.mrf.mxu1 }
 0x102   :  { %v1774_v28 = vadd.f32 %v461_v24, %v315_v20  ;;  %v1031_v20 = vld [vmem:[%s2156_s2] sm:$0xff] }
 0x103   :  { %577 = vmatmul.bf16.gmra.mxu0 %v1445_v26  ;;  %772 = vmatmul.bf16.gmra.mxu2 %v1453_v27 }
 0x104   :  { %626 = vmatmul.bf16.gmra.mxu1 %v1445_v26 }
 0x106   :  { %821 = vmatmul.bf16.gmra.mxu3 %v1453_v27  ;;  %v415_v34 = vpop.f32.mrf.mxu2 }
 0x107   :  { %v1781_v36 = vadd.f32 %v415_v34, %v269_v30 }
 0x108   :  { %v271_v40 = vpop.f32.mrf.mxu0 }
 0x109   :  { %v464_v37 = vpop.f32.mrf.mxu3  ;;  %v320_v41 = vpop.f32.mrf.mxu1 }
 0x10a   :  { %v1784_v38 = vadd.f32 %v464_v37, %v318_v31  ;;  %v867_v37 = vld [vmem:[#allocation2 + $0x18] sm:$0xff] }
 0x10e   :  { %v417_v42 = vpop.f32.mrf.mxu2 }
 0x10f   :  { %v1793_v44 = vadd.f32 %v417_v42, %v271_v40  ;;  %v1033_v40 = vld [vmem:[%s2156_s2 + $0x10] sm:$0xff] }
 0x110   :  { %v274_v51 = vpop.f32.mrf.mxu0 }
 0x111   :  { %v466_v45 = vpop.f32.mrf.mxu3  ;;  %v323_v52 = vpop.f32.mrf.mxu1 }
 0x112   :  { %v1802_v50 = vadd.f32 %v466_v45, %v320_v41  ;;  %v1032_v45 = vld [vmem:[%s2156_s2 + $0x8] sm:$0xff] }
 0x113   :  { %582 = vmatmul.bf16.gmra.mxu0 %v1446_v46  ;;  %777 = vmatmul.bf16.gmra.mxu2 %v1454_v48 }
 0x114   :  { %631 = vmatmul.bf16.gmra.mxu1 %v1446_v46 }
 0x116   :  { %826 = vmatmul.bf16.gmra.mxu3 %v1454_v48  ;;  %v420_v54 = vpop.f32.mrf.mxu2 }
 0x117   :  { %v1806_v55 = vadd.f32 %v420_v54, %v274_v51 }
 0x118   :  { %v276_v59 = vpop.f32.mrf.mxu0 }
 0x119   :  { %v469_v56 = vpop.f32.mrf.mxu3  ;;  %v325_v60 = vpop.f32.mrf.mxu1 }
 0x11a   :  { %v1808_v58 = vadd.f32 %v469_v56, %v323_v52 }
 0x11e   :  { %v422_v62 = vpop.f32.mrf.mxu2 }
 0x11f   :  { %v1810_v0 = vadd.f32 %v422_v62, %v276_v59 }
 0x120   :  { %v548_v4 = vpop.f32.mrf.mxu0 }
 0x121   :  { %v471_v1 = vpop.f32.mrf.mxu3  ;;  %v597_v6 = vpop.f32.mrf.mxu1  ;;  %v637_v8 = vadd.f32 %v548_v4, %v1692_v5  ;;  %v869_v4 = vld [vmem:[#allocation2 + $0x28] sm:$0xff] }
 0x122   :  { %v1812_v2 = vadd.f32 %v471_v1, %v325_v60  ;;  %v638_v10 = vadd.f32 %v597_v6, %v1694_v7 }
 0x126   :  { %v743_v12 = vpop.f32.mrf.mxu2 }
 0x127   :  { %v832_v13 = vadd.f32 %v743_v12, %v637_v8 }
 0x128   :  { %v550_v24 = vpop.f32.mrf.mxu0 }
 0x129   :  { %v792_v16 = vpop.f32.mrf.mxu3  ;;  %v599_v26 = vpop.f32.mrf.mxu1  ;;  %v1095_v30 = vadd.f32 %v1031_v20, %v832_v13  ;;  %v639_v5 = vadd.f32 %v550_v24, %v1696_v11 }
 0x12a   :  { %v833_v22 = vadd.f32 %v792_v16, %v638_v10  ;;  %v640_v7 = vadd.f32 %v599_v26, %v1704_v15  ;;  %v1034_v10 = vld [vmem:[%s2156_s2 + $0x18] sm:$0xff] }
 0x12b   :  { %1127 = vst [vmem:[%s2157_s4] sm:$0xff] %v1095_v30 }
 0x12c   :  { %v897_v27 = vadd.f32 %v865_v18, %v833_v22 }
 0x12e   :  { %930 = vst.msk [vmem:[#allocation2 + $0x8] sm:$0xff] %vm21_vm0, %v897_v27  ;;  %v745_v31 = vpop.f32.mrf.mxu2 }
 0x12f   :  { %v834_v32 = vadd.f32 %v745_v31, %v639_v5  ;;  %v871_v5 = vld [vmem:[#allocation2 + $0x38] sm:$0xff] }
 0x130   :  { %v553_v42 = vpop.f32.mrf.mxu0 }
 0x131   :  { %v794_v34 = vpop.f32.mrf.mxu3  ;;  %v602_v46 = vpop.f32.mrf.mxu1  ;;  %v1097_v51 = vadd.f32 %v1033_v40, %v834_v32  ;;  %v641_v56 = vadd.f32 %v553_v42, %v1706_v19  ;;  %v1035_v19 = vld [vmem:[%s2156_s2 + $0x20] sm:$0xff] }
 0x132   :  { %v835_v41 = vadd.f32 %v794_v34, %v640_v7  ;;  %v642_v59 = vadd.f32 %v602_v46, %v1708_v21 }
 0x133   :  { %1129 = vst [vmem:[%s2157_s4 + $0x10] sm:$0xff] %v1097_v51 }
 0x134   :  { %v899_v11 = vadd.f32 %v867_v37, %v835_v41 }
 0x135   :  { %v965_v48 = vld [vmem:[#allocation2 + $0x8] sm:$0xff] }
 0x136   :  { %v996_v52 = vpack.c.bf16 %v965_v48, %v832_v13  ;;  %v1096_v54 = vadd.f32 %v1032_v45, %v965_v48  ;;  %932 = vst.msk [vmem:[#allocation2 + $0x18] sm:$0xff] %vm21_vm0, %v899_v11  ;;  %v748_v60 = vpop.f32.mrf.mxu2 }
 0x137   :  { %v836_v62 = vadd.f32 %v748_v60, %v641_v56 }
 0x138   :  { %1015 = vst.msk [vmem:[%s2158_s3] sm:$0xff] %vm1831_vm3, %v996_v52  ;;  %v555_v8 = vpop.f32.mrf.mxu0  ;;  %v873_v52 = vld [vmem:[#allocation2 + $0x48] sm:$0xff] }
 0x139   :  { %1128 = vst.msk [vmem:[%s2157_s4 + $0x8] sm:$0xff] %vm21_vm0, %v1096_v54  ;;  %v797_v1 = vpop.f32.mrf.mxu3  ;;  %v604_v21 = vpop.f32.mrf.mxu1  ;;  %v1099_v16 = vadd.f32 %v1035_v19, %v836_v62  ;;  %v643_v22 = vadd.f32 %v555_v8, %v1710_v25  ;;  %v1037_v25 = vld [vmem:[%s2156_s2 + $0x30] sm:$0xff] }
 0x13a   :  { %v837_v6 = vadd.f32 %v797_v1, %v642_v59  ;;  %v644_v24 = vadd.f32 %v604_v21, %v1718_v29  ;;  %v1038_v59 = vld [vmem:[%s2156_s2 + $0x38] sm:$0xff] }
 0x13b   :  { %1131 = vst [vmem:[%s2157_s4 + $0x20] sm:$0xff] %v1099_v16 }
 0x13c   :  { %v901_v12 = vadd.f32 %v869_v4, %v837_v6 }
 0x13d   :  { %v967_v13 = vld [vmem:[#allocation2 + $0x18] sm:$0xff] }
 0x13e   :  { %v997_v18 = vpack.c.bf16 %v967_v13, %v834_v32  ;;  %v1098_v20 = vadd.f32 %v1034_v10, %v967_v13  ;;  %934 = vst.msk [vmem:[#allocation2 + $0x28] sm:$0xff] %vm21_vm0, %v901_v12  ;;  %v750_v26 = vpop.f32.mrf.mxu2  ;;  %v1036_v32 = vld [vmem:[%s2156_s2 + $0x28] sm:$0xff]  ;;  %v875_v13 = vld [vmem:[#allocation2 + $0x58] sm:$0xff] }
 0x13f   :  { %v838_v27 = vadd.f32 %v750_v26, %v643_v22 }
 0x140   :  { %1016 = vst.msk [vmem:[%s2158_s3 + $0x8] sm:$0xff] %vm1831_vm3, %v997_v18  ;;  %v558_v31 = vpop.f32.mrf.mxu0 }
 0x141   :  { %1130 = vst.msk [vmem:[%s2157_s4 + $0x18] sm:$0xff] %vm21_vm0, %v1098_v20  ;;  %v799_v30 = vpop.f32.mrf.mxu3  ;;  %v607_v29 = vpop.f32.mrf.mxu1  ;;  %v1101_v40 = vadd.f32 %v1037_v25, %v838_v27  ;;  %v645_v45 = vadd.f32 %v558_v31, %v1720_v33  ;;  %v1039_v33 = vld [vmem:[%s2156_s2 + $0x40] sm:$0xff]  ;;  %v1040_v20 = vld [vmem:[%s2156_s2 + $0x48] sm:$0xff] }
 0x142   :  { %v839_v7 = vadd.f32 %v799_v30, %v644_v24  ;;  %v646_v46 = vadd.f32 %v607_v29, %v1722_v35  ;;  %v877_v29 = vld [vmem:[#allocation2 + $0x68] sm:$0xff] }
 0x143   :  { %1133 = vst [vmem:[%s2157_s4 + $0x30] sm:$0xff] %v1101_v40  ;;  %v1042_v40 = vld [vmem:[%s2156_s2 + $0x58] sm:$0xff] }
 0x144   :  { %v903_v34 = vadd.f32 %v871_v5, %v839_v7 }
 0x145   :  { %v969_v37 = vld [vmem:[#allocation2 + $0x28] sm:$0xff] }
 0x146   :  { %v998_v41 = vpack.c.bf16 %v969_v37, %v836_v62  ;;  %v1100_v42 = vadd.f32 %v1036_v32, %v969_v37  ;;  %936 = vst.msk [vmem:[#allocation2 + $0x38] sm:$0xff] %vm21_vm0, %v903_v34  ;;  %v753_v11 = vpop.f32.mrf.mxu2 }
 0x147   :  { %v840_v48 = vadd.f32 %v753_v11, %v645_v45 }
 0x148   :  { %1017 = vst.msk [vmem:[%s2158_s3 + $0x10] sm:$0xff] %vm1831_vm3, %v998_v41  ;;  %v560_v56 = vpop.f32.mrf.mxu0 }
 0x149   :  { %1132 = vst.msk [vmem:[%s2157_s4 + $0x28] sm:$0xff] %vm21_vm0, %v1100_v42  ;;  %v802_v51 = vpop.f32.mrf.mxu3  ;;  %v609_v35 = vpop.f32.mrf.mxu1  ;;  %v1103_v1 = vadd.f32 %v1039_v33, %v840_v48  ;;  %v647_v6 = vadd.f32 %v560_v56, %v1724_v39  ;;  %v1041_v39 = vld [vmem:[%s2156_s2 + $0x50] sm:$0xff]  ;;  %v879_v56 = vld [vmem:[#allocation2 + $0x78] sm:$0xff] }
 0x14a   :  { %v841_v54 = vadd.f32 %v802_v51, %v646_v46  ;;  %v648_v8 = vadd.f32 %v609_v35, %v1732_v43 }
 0x14b   :  { %1135 = vst [vmem:[%s2157_s4 + $0x40] sm:$0xff] %v1103_v1 }
 0x14c   :  { %v905_v60 = vadd.f32 %v873_v52, %v841_v54 }
 0x14d   :  { %v971_v62 = vld [vmem:[#allocation2 + $0x38] sm:$0xff] }
 0x14e   :  { %v999_v4 = vpack.c.bf16 %v971_v62, %v838_v27  ;;  %v1102_v19 = vadd.f32 %v1038_v59, %v971_v62  ;;  %938 = vst.msk [vmem:[#allocation2 + $0x48] sm:$0xff] %vm21_vm0, %v905_v60  ;;  %v755_v10 = vpop.f32.mrf.mxu2  ;;  %v1044_v60 = vld [vmem:[%s2156_s2 + $0x68] sm:$0xff] }
 0x14f   :  { %v842_v21 = vadd.f32 %v755_v10, %v647_v6 }
 0x150   :  { %1018 = vst.msk [vmem:[%s2158_s3 + $0x18] sm:$0xff] %vm1831_vm3, %v999_v4  ;;  %v563_v18 = vpop.f32.mrf.mxu0 }
 0x151   :  { %1134 = vst.msk [vmem:[%s2157_s4 + $0x38] sm:$0xff] %vm21_vm0, %v1102_v19  ;;  %v804_v12 = vpop.f32.mrf.mxu3  ;;  %v612_v43 = vpop.f32.mrf.mxu1  ;;  %v1105_v26 = vadd.f32 %v1041_v39, %v842_v21  ;;  %v649_v5 = vadd.f32 %v563_v18, %v1734_v47  ;;  %v1043_v47 = vld [vmem:[%s2156_s2 + $0x60] sm:$0xff]  ;;  %v881_v39 = vld [vmem:[#allocation2 + $0x88] sm:$0xff] }
 0x152   :  { %v843_v16 = vadd.f32 %v804_v12, %v648_v8  ;;  %v650_v25 = vadd.f32 %v612_v43, %v1736_v49 }
 0x153   :  { %1137 = vst [vmem:[%s2157_s4 + $0x50] sm:$0xff] %v1105_v26 }
 0x154   :  { %v907_v22 = vadd.f32 %v875_v13, %v843_v16 }
 0x155   :  { %v973_v24 = vld [vmem:[#allocation2 + $0x48] sm:$0xff] }
 0x156   :  { %v1000_v27 = vpack.c.bf16 %v973_v24, %v840_v48  ;;  %v1104_v30 = vadd.f32 %v1040_v20, %v973_v24  ;;  %940 = vst.msk [vmem:[#allocation2 + $0x58] sm:$0xff] %vm21_vm0, %v907_v22  ;;  %v758_v7 = vpop.f32.mrf.mxu2  ;;  %v1046_v20 = vld [vmem:[%s2156_s2 + $0x78] sm:$0xff] }
 0x157   :  { %v844_v31 = vadd.f32 %v758_v7, %v649_v5 }
 0x158   :  { %1019 = vst.msk [vmem:[%s2158_s3 + $0x20] sm:$0xff] %vm1831_vm3, %v1000_v27  ;;  %v565_v37 = vpop.f32.mrf.mxu0 }
 0x159   :  { %1136 = vst.msk [vmem:[%s2157_s4 + $0x48] sm:$0xff] %vm21_vm0, %v1104_v30  ;;  %v807_v32 = vpop.f32.mrf.mxu3  ;;  %v614_v49 = vpop.f32.mrf.mxu1  ;;  %v1107_v45 = vadd.f32 %v1043_v47, %v844_v31  ;;  %v651_v48 = vadd.f32 %v565_v37, %v1738_v53  ;;  %v1045_v53 = vld [vmem:[%s2156_s2 + $0x70] sm:$0xff] }
 0x15a   :  { %v845_v34 = vadd.f32 %v807_v32, %v650_v25  ;;  %v652_v51 = vadd.f32 %v614_v49, %v1746_v57  ;;  %v883_v32 = vld [vmem:[#allocation2 + $0x98] sm:$0xff] }
 0x15b   :  { %1139 = vst [vmem:[%s2157_s4 + $0x60] sm:$0xff] %v1107_v45 }
 0x15c   :  { %v909_v41 = vadd.f32 %v877_v29, %v845_v34  ;;  %v1048_v34 = vld [vmem:[%s2156_s2 + $0x88] sm:$0xff] }
 0x15d   :  { %v975_v42 = vld [vmem:[#allocation2 + $0x58] sm:$0xff] }
 0x15e   :  { %v1001_v46 = vpack.c.bf16 %v975_v42, %v842_v21  ;;  %v1106_v11 = vadd.f32 %v1042_v40, %v975_v42  ;;  %942 = vst.msk [vmem:[#allocation2 + $0x68] sm:$0xff] %vm21_vm0, %v909_v41  ;;  %v760_v52 = vpop.f32.mrf.mxu2 }
 0x15f   :  { %v846_v33 = vadd.f32 %v760_v52, %v651_v48  ;;  %v885_v52 = vld [vmem:[#allocation2 + $0xa8] sm:$0xff] }
 0x160   :  { %1020 = vst.msk [vmem:[%s2158_s3 + $0x28] sm:$0xff] %vm1831_vm3, %v1001_v46  ;;  %v568_v35 = vpop.f32.mrf.mxu0 }
 0x161   :  { %1138 = vst.msk [vmem:[%s2157_s4 + $0x58] sm:$0xff] %vm21_vm0, %v1106_v11  ;;  %v809_v54 = vpop.f32.mrf.mxu3  ;;  %v617_v57 = vpop.f32.mrf.mxu1  ;;  %v1109_v4 = vadd.f32 %v1045_v53, %v846_v33  ;;  %v653_v8 = vadd.f32 %v568_v35, %v1748_v61  ;;  %v1047_v61 = vld [vmem:[%s2156_s2 + $0x80] sm:$0xff] }
 0x162   :  { %v847_v59 = vadd.f32 %v809_v54, %v652_v51  ;;  %v654_v10 = vadd.f32 %v617_v57, %v1750_v63 }
 0x163   :  { %1141 = vst [vmem:[%s2157_s4 + $0x70] sm:$0xff] %v1109_v4 }
 0x164   :  { %v911_v62 = vadd.f32 %v879_v56, %v847_v59  ;;  %v1050_v56 = vld [vmem:[%s2156_s2 + $0x98] sm:$0xff] }
 0x165   :  { %v977_v1 = vld [vmem:[#allocation2 + $0x68] sm:$0xff] }
 0x166   :  { %v1002_v19 = vpack.c.bf16 %v977_v1, %v844_v31  ;;  %v1108_v6 = vadd.f32 %v1044_v60, %v977_v1  ;;  %944 = vst.msk [vmem:[#allocation2 + $0x78] sm:$0xff] %vm21_vm0, %v911_v62  ;;  %v763_v21 = vpop.f32.mrf.mxu2 }
 0x167   :  { %v848_v12 = vadd.f32 %v763_v21, %v653_v8  ;;  %v887_v8 = vld [vmem:[#allocation2 + $0xb8] sm:$0xff] }
 0x168   :  { %1021 = vst.msk [vmem:[%s2158_s3 + $0x30] sm:$0xff] %vm1831_vm3, %v1002_v19  ;;  %v570_v18 = vpop.f32.mrf.mxu0 }
 0x169   :  { %1140 = vst.msk [vmem:[%s2157_s4 + $0x68] sm:$0xff] %vm21_vm0, %v1108_v6  ;;  %v812_v13 = vpop.f32.mrf.mxu3  ;;  %v619_v63 = vpop.f32.mrf.mxu1  ;;  %v1111_v24 = vadd.f32 %v1047_v61, %v848_v12  ;;  %v655_v30 = vadd.f32 %v570_v18, %v1752_v3  ;;  %v1049_v3 = vld [vmem:[%s2156_s2 + $0x90] sm:$0xff] }
 0x16a   :  { %v849_v16 = vadd.f32 %v812_v13, %v654_v10  ;;  %v656_v5 = vadd.f32 %v619_v63, %v1760_v9 }
 0x16b   :  { %1143 = vst [vmem:[%s2157_s4 + $0x80] sm:$0xff] %v1111_v24 }
 0x16c   :  { %v913_v43 = vadd.f32 %v881_v39, %v849_v16 }
 0x16d   :  { %v979_v22 = vld [vmem:[#allocation2 + $0x78] sm:$0xff] }
 0x16e   :  { %v1003_v26 = vpack.c.bf16 %v979_v22, %v846_v33  ;;  %v1110_v27 = vadd.f32 %v1046_v20, %v979_v22  ;;  %946 = vst.msk [vmem:[#allocation2 + $0x88] sm:$0xff] %vm21_vm0, %v913_v43  ;;  %v765_v25 = vpop.f32.mrf.mxu2 }
 0x16f   :  { %v850_v7 = vadd.f32 %v765_v25, %v655_v30 }
 0x170   :  { %1022 = vst.msk [vmem:[%s2158_s3 + $0x38] sm:$0xff] %vm1831_vm3, %v1003_v26  ;;  %v573_v47 = vpop.f32.mrf.mxu0  ;;  %v889_v26 = vld [vmem:[#allocation2 + $0xc8] sm:$0xff] }
 0x171   :  { %1142 = vst.msk [vmem:[%s2157_s4 + $0x78] sm:$0xff] %vm21_vm0, %v1110_v27  ;;  %v814_v31 = vpop.f32.mrf.mxu3  ;;  %v622_v9 = vpop.f32.mrf.mxu1  ;;  %v1113_v49 = vadd.f32 %v1049_v3, %v850_v7  ;;  %v657_v45 = vadd.f32 %v573_v47, %v1762_v14  ;;  %v1051_v14 = vld [vmem:[%s2156_s2 + $0xa0] sm:$0xff] }
 0x172   :  { %v851_v29 = vadd.f32 %v814_v31, %v656_v5  ;;  %v658_v46 = vadd.f32 %v622_v9, %v1764_v17  ;;  %v1054_v5 = vld [vmem:[%s2156_s2 + $0xb8] sm:$0xff] }
 0x173   :  { %1145 = vst [vmem:[%s2157_s4 + $0x90] sm:$0xff] %v1113_v49 }
 0x174   :  { %v915_v37 = vadd.f32 %v883_v32, %v851_v29 }
 0x175   :  { %v981_v40 = vld [vmem:[#allocation2 + $0x88] sm:$0xff] }
 0x176   :  { %v1004_v41 = vpack.c.bf16 %v981_v40, %v848_v12  ;;  %v1112_v42 = vadd.f32 %v1048_v34, %v981_v40  ;;  %948 = vst.msk [vmem:[#allocation2 + $0x98] sm:$0xff] %vm21_vm0, %v915_v37  ;;  %v768_v11 = vpop.f32.mrf.mxu2  ;;  %v1052_v12 = vld [vmem:[%s2156_s2 + $0xa8] sm:$0xff]  ;;  %v891_v40 = vld [vmem:[#allocation2 + $0xd8] sm:$0xff] }
 0x177   :  { %v852_v48 = vadd.f32 %v768_v11, %v657_v45 }
 0x178   :  { %1023 = vst.msk [vmem:[%s2158_s3 + $0x40] sm:$0xff] %vm1831_vm3, %v1004_v41  ;;  %v575_v54 = vpop.f32.mrf.mxu0 }
 0x179   :  { %1144 = vst.msk [vmem:[%s2157_s4 + $0x88] sm:$0xff] %vm21_vm0, %v1112_v42  ;;  %v817_v51 = vpop.f32.mrf.mxu3  ;;  %v624_v17 = vpop.f32.mrf.mxu1  ;;  %v1115_v35 = vadd.f32 %v1051_v14, %v852_v48  ;;  %v659_v62 = vadd.f32 %v575_v54, %v1766_v23  ;;  %v1053_v23 = vld [vmem:[%s2156_s2 + $0xb0] sm:$0xff]  ;;  %v1056_v42 = vld [vmem:[%s2156_s2 + $0xc8] sm:$0xff] }
 0x17a   :  { %v853_v33 = vadd.f32 %v817_v51, %v658_v46  ;;  %v660_v1 = vadd.f32 %v624_v17, %v1774_v28  ;;  %v893_v17 = vld [vmem:[#allocation2 + $0xe8] sm:$0xff] }
 0x17b   :  { %1147 = vst [vmem:[%s2157_s4 + $0xa0] sm:$0xff] %v1115_v35 }
 0x17c   :  { %v917_v53 = vadd.f32 %v885_v52, %v853_v33 }
 0x17d   :  { %v983_v59 = vld [vmem:[#allocation2 + $0x98] sm:$0xff] }
 0x17e   :  { %v1005_v60 = vpack.c.bf16 %v983_v59, %v850_v7  ;;  %v1114_v57 = vadd.f32 %v1050_v56, %v983_v59  ;;  %950 = vst.msk [vmem:[#allocation2 + $0xa8] sm:$0xff] %vm21_vm0, %v917_v53  ;;  %v770_v4 = vpop.f32.mrf.mxu2  ;;  %v1058_v59 = vld [vmem:[%s2156_s2 + $0xd8] sm:$0xff] }
 0x17f   :  { %v854_v19 = vadd.f32 %v770_v4, %v659_v62 }
 0x180   :  { %1024 = vst.msk [vmem:[%s2158_s3 + $0x48] sm:$0xff] %vm1831_vm3, %v1005_v60  ;;  %v578_v21 = vpop.f32.mrf.mxu0 }
 0x181   :  { %1146 = vst.msk [vmem:[%s2157_s4 + $0x98] sm:$0xff] %vm21_vm0, %v1114_v57  ;;  %v819_v6 = vpop.f32.mrf.mxu3  ;;  %v627_v28 = vpop.f32.mrf.mxu1  ;;  %v1117_v61 = vadd.f32 %v1053_v23, %v854_v19  ;;  %v661_v20 = vadd.f32 %v578_v21, %v1781_v36  ;;  %v1055_v36 = vld [vmem:[%s2156_s2 + $0xc0] sm:$0xff]  ;;  %v895_v21 = vld [vmem:[#allocation2 + $0xf8] sm:$0xff] }
 0x182   :  { %v855_v10 = vadd.f32 %v819_v6, %v660_v1  ;;  %v662_v63 = vadd.f32 %v627_v28, %v1784_v38  ;;  %v1060_v28 = vld [vmem:[%s2156_s2 + $0xe8] sm:$0xff] }
 0x183   :  { %1149 = vst [vmem:[%s2157_s4 + $0xb0] sm:$0xff] %v1117_v61 }
 0x184   :  { %v919_v13 = vadd.f32 %v887_v8, %v855_v10 }
 0x185   :  { %v985_v39 = vld [vmem:[#allocation2 + $0xa8] sm:$0xff] }
 0x186   :  { %v1006_v16 = vpack.c.bf16 %v985_v39, %v852_v48  ;;  %v1116_v18 = vadd.f32 %v1052_v12, %v985_v39  ;;  %952 = vst.msk [vmem:[#allocation2 + $0xb8] sm:$0xff] %vm21_vm0, %v919_v13  ;;  %v773_v43 = vpop.f32.mrf.mxu2 }
 0x187   :  { %v856_v22 = vadd.f32 %v773_v43, %v661_v20 }
 0x188   :  { %1025 = vst.msk [vmem:[%s2158_s3 + $0x50] sm:$0xff] %vm1831_vm3, %v1006_v16  ;;  %v580_v30 = vpop.f32.mrf.mxu0 }
 0x189   :  { %1148 = vst.msk [vmem:[%s2157_s4 + $0xa8] sm:$0xff] %vm21_vm0, %v1116_v18  ;;  %v822_v24 = vpop.f32.mrf.mxu3  ;;  %v629_v38 = vpop.f32.mrf.mxu1  ;;  %v1119_v31 = vadd.f32 %v1055_v36, %v856_v22  ;;  %v663_v29 = vadd.f32 %v580_v30, %v1793_v44  ;;  %v1057_v44 = vld [vmem:[%s2156_s2 + $0xd0] sm:$0xff]  ;;  %v1062_v18 = vld [vmem:[%s2156_s2 + $0xf8] sm:$0xff] }
 0x18a   :  { %v857_v27 = vadd.f32 %v822_v24, %v662_v63  ;;  %v664_v47 = vadd.f32 %v629_v38, %v1802_v50 }
 0x18b   :  { %1151 = vst [vmem:[%s2157_s4 + $0xc0] sm:$0xff] %v1119_v31 }
 0x18c   :  { %v921_v25 = vadd.f32 %v889_v26, %v857_v27 }
 0x18d   :  { %v987_v7 = vld [vmem:[#allocation2 + $0xb8] sm:$0xff] }
 0x18e   :  { %v1007_v32 = vpack.c.bf16 %v987_v7, %v854_v19  ;;  %v1118_v3 = vadd.f32 %v1054_v5, %v987_v7  ;;  %954 = vst.msk [vmem:[#allocation2 + $0xc8] sm:$0xff] %vm21_vm0, %v921_v25  ;;  %v775_v34 = vpop.f32.mrf.mxu2 }
 0x18f   :  { %v858_v9 = vadd.f32 %v775_v34, %v663_v29 }
 0x190   :  { %1026 = vst.msk [vmem:[%s2158_s3 + $0x58] sm:$0xff] %vm1831_vm3, %v1007_v32  ;;  %v583_v41 = vpop.f32.mrf.mxu0 }
 0x191   :  { %1150 = vst.msk [vmem:[%s2157_s4 + $0xb8] sm:$0xff] %vm21_vm0, %v1118_v3  ;;  %v824_v37 = vpop.f32.mrf.mxu3  ;;  %v632_v50 = vpop.f32.mrf.mxu1  ;;  %v1121_v11 = vadd.f32 %v1057_v44, %v858_v9  ;;  %v665_v52 = vadd.f32 %v583_v41, %v1806_v55  ;;  %v1059_v55 = vld [vmem:[%s2156_s2 + $0xe0] sm:$0xff] }
 0x192   :  { %v859_v49 = vadd.f32 %v824_v37, %v664_v47  ;;  %v666_v14 = vadd.f32 %v632_v50, %v1808_v58 }
 0x193   :  { %1153 = vst [vmem:[%s2157_s4 + $0xd0] sm:$0xff] %v1121_v11 }
 0x194   :  { %v923_v45 = vadd.f32 %v891_v40, %v859_v49 }
 0x195   :  { %v989_v46 = vld [vmem:[#allocation2 + $0xc8] sm:$0xff] }
 0x196   :  { %v1008_v48 = vpack.c.bf16 %v989_v46, %v856_v22  ;;  %v1120_v51 = vadd.f32 %v1056_v42, %v989_v46  ;;  %956 = vst.msk [vmem:[#allocation2 + $0xd8] sm:$0xff] %vm21_vm0, %v923_v45  ;;  %v778_v33 = vpop.f32.mrf.mxu2 }
 0x197   :  { %v860_v54 = vadd.f32 %v778_v33, %v665_v52 }
 0x198   :  { %1027 = vst.msk [vmem:[%s2158_s3 + $0x60] sm:$0xff] %vm1831_vm3, %v1008_v48  ;;  %v585_v58 = vpop.f32.mrf.mxu0 }
 0x199   :  { %1152 = vst.msk [vmem:[%s2157_s4 + $0xc8] sm:$0xff] %vm21_vm0, %v1120_v51  ;;  %v827_v56 = vpop.f32.mrf.mxu3  ;;  %v1123_v57 = vadd.f32 %v1059_v55, %v860_v54  ;;  %v634_v62 = vpop.f32.mrf.mxu1  ;;  %v667_v19 = vadd.f32 %v585_v58, %v1810_v0  ;;  %v1061_v0 = vld [vmem:[%s2156_s2 + $0xf0] sm:$0xff] }
 0x19a   :  { %v861_v53 = vadd.f32 %v827_v56, %v666_v14  ;;  %v668_v6 = vadd.f32 %v634_v62, %v1812_v2 }
 0x19b   :  { %1155 = vst [vmem:[%s2157_s4 + $0xe0] sm:$0xff] %v1123_v57 }
 0x19c   :  { %v925_v35 = vadd.f32 %v893_v17, %v861_v53 }
 0x19d   :  { %v991_v60 = vld [vmem:[#allocation2 + $0xd8] sm:$0xff] }
 0x19e   :  { %v1009_v1 = vpack.c.bf16 %v991_v60, %v858_v9  ;;  %v1122_v4 = vadd.f32 %v1058_v59, %v991_v60  ;;  %958 = vst.msk [vmem:[#allocation2 + $0xe8] sm:$0xff] %vm21_vm0, %v925_v35  ;;  %v780_v8 = vpop.f32.mrf.mxu2 }
 0x19f   :  { %v862_v23 = vadd.f32 %v780_v8, %v667_v19 }
 0x1a0   :  { %1028 = vst.msk [vmem:[%s2158_s3 + $0x68] sm:$0xff] %vm1831_vm3, %v1009_v1 }
 0x1a1   :  { %1154 = vst.msk [vmem:[%s2157_s4 + $0xd8] sm:$0xff] %vm21_vm0, %v1122_v4  ;;  %v829_v10 = vpop.f32.mrf.mxu3  ;;  %v1125_v39 = vadd.f32 %v1061_v0, %v862_v23 }
 0x1a2   :  { %v863_v12 = vadd.f32 %v829_v10, %v668_v6 }
 0x1a3   :  { %1157 = vst [vmem:[%s2157_s4 + $0xf0] sm:$0xff] %v1125_v39 }
 0x1a4   :  { %v927_v13 = vadd.f32 %v895_v21, %v863_v12 }
 0x1a5   :  { %v993_v2 = vld [vmem:[#allocation2 + $0xe8] sm:$0xff] }
 0x1a6   :  { %v1010_v61 = vpack.c.bf16 %v993_v2, %v860_v54  ;;  %v1124_v16 = vadd.f32 %v1060_v28, %v993_v2  ;;  %960 = vst.msk [vmem:[#allocation2 + $0xf8] sm:$0xff] %vm21_vm0, %v927_v13 }
 0x1a8   :  { %1029 = vst.msk [vmem:[%s2158_s3 + $0x70] sm:$0xff] %vm1831_vm3, %v1010_v61 }
 0x1a9   :  { %1156 = vst.msk [vmem:[%s2157_s4 + $0xe8] sm:$0xff] %vm21_vm0, %v1124_v16 }
 0x1ad   :  { %v995_v20 = vld [vmem:[#allocation2 + $0xf8] sm:$0xff] }
 0x1ae   :  { %v1011_v63 = vpack.c.bf16 %v995_v20, %v862_v23  ;;  %v1126_v43 = vadd.f32 %v1062_v18, %v995_v20 }
 0x1b0   :  { %1030 = vst.msk [vmem:[%s2158_s3 + $0x78] sm:$0xff] %vm1831_vm3, %v1011_v63 }
 0x1b1   :  { %1158 = vst.msk [vmem:[%s2157_s4 + $0xf8] sm:$0xff] %vm21_vm0, %v1126_v43 }

// kernel: recommender_forward.8
= control target key start
LH: loop header
LB: loop body
LE: loop exit
PB: predicated region body
PF: predicated region fallthrough
CT: control target
= control target key end

     0   :  { %s2156_s0 = inlined_call_operand.vmem [shape: bf16[4,128,128], index: 0, kind: input, shape index: {}]   ;;  %s2157_s1 = inlined_call_operand.vmem [shape: bf16[128,160], index: 1, kind: input, shape index: {}]   ;;  %s2158_s2 = inlined_call_operand.vmem [shape: f32[128,160], index: 2, kind: input, shape index: {}]   ;;  %s2159_s3 = inlined_call_operand.hbm [shape: bf16[128,160], index: 3, kind: output, shape index: {0}]   ;;  %s2160_s4 = inlined_call_operand.vmem [shape: f32[128,160], index: 4, kind: output, shape index: {1}]  }
   0x1   :  { %v1288_v0 = vld [vmem:[%s2157_s1 + $0x70] sm:$0xf]  ;;  %v1437_v1 = vld [vmem:[%s2157_s1 + $0x74] sm:$0xf0]  ;;  %v1436_v2 = vld [vmem:[%s2157_s1 + $0x74] sm:$0xf] }
   0x2   :  { %v1538_v3 = vor.u32 %v1437_v1, %v1288_v0  ;;  %v1290_v4 = vld [vmem:[%s2157_s1 + $0x78] sm:$0xf0]  ;;  %v1280_v5 = vld [vmem:[%s2157_s1 + $0x60] sm:$0xf]  ;;  %v1435_v6 = vld [vmem:[%s2157_s1 + $0x64] sm:$0xf0] }
   0x3   :  { %v1549_v7 = vor.u32 %v1436_v2, %v1290_v4  ;;  %v1434_v8 = vld [vmem:[%s2157_s1 + $0x64] sm:$0xf]  ;;  %v1282_v9 = vld [vmem:[%s2157_s1 + $0x68] sm:$0xf0]  ;;  %v1559_v10 = vor.u32 %v1435_v6, %v1280_v5  ;;  %v1272_v12 = vld [vmem:[%s2157_s1 + $0x50] sm:$0xf] }
   0x4   :  { %231 = vmatpush.bf16.msra.mxu0 %v1538_v3  ;;  %377 = vmatpush.bf16.msra.mxu2 %v1538_v3  ;;  %v1563_v11 = vor.u32 %v1434_v8, %v1282_v9  ;;  %v1433_v13 = vld [vmem:[%s2157_s1 + $0x54] sm:$0xf0]  ;;  %v1432_v14 = vld [vmem:[%s2157_s1 + $0x54] sm:$0xf]  ;;  %v1274_v15 = vld [vmem:[%s2157_s1 + $0x58] sm:$0xf0] }
   0x5   :  { %280 = vmatpush.bf16.msra.mxu1 %v1549_v7  ;;  %426 = vmatpush.bf16.msra.mxu3 %v1549_v7  ;;  %v1579_v16 = vor.u32 %v1433_v13, %v1272_v12  ;;  %v1583_v17 = vor.u32 %v1432_v14, %v1274_v15  ;;  %v1264_v18 = vld [vmem:[%s2157_s1 + $0x40] sm:$0xf]  ;;  %v1431_v19 = vld [vmem:[%s2157_s1 + $0x44] sm:$0xf0]  ;;  %v1430_v20 = vld [vmem:[%s2157_s1 + $0x44] sm:$0xf] }
   0x6   :  { %v1266_v21 = vld [vmem:[%s2157_s1 + $0x48] sm:$0xf0]  ;;  %v1599_v22 = vor.u32 %v1431_v19, %v1264_v18 }
   0x8   :  { %232 = vmatpush.bf16.msra.mxu0 %v1559_v10  ;;  %378 = vmatpush.bf16.msra.mxu2 %v1559_v10 }
   0x9   :  { %281 = vmatpush.bf16.msra.mxu1 %v1563_v11  ;;  %427 = vmatpush.bf16.msra.mxu3 %v1563_v11 }
   0xc   :  { %233 = vmatpush.bf16.msra.mxu0 %v1579_v16  ;;  %379 = vmatpush.bf16.msra.mxu2 %v1579_v16 }
   0xd   :  { %10 = vsyncpa [#allocation4], 0  ;;  %282 = vmatpush.bf16.msra.mxu1 %v1583_v17  ;;  %428 = vmatpush.bf16.msra.mxu3 %v1583_v17  ;;  %v1603_v23 = vor.u32 %v1430_v20, %v1266_v21  ;;  %v1256_v24 = vld [vmem:[%s2157_s1 + $0x30] sm:$0xf]  ;;  %v1429_v25 = vld [vmem:[%s2157_s1 + $0x34] sm:$0xf0] }
   0xe   :  { %v1428_v26 = vld [vmem:[%s2157_s1 + $0x34] sm:$0xf]  ;;  %v1258_v27 = vld [vmem:[%s2157_s1 + $0x38] sm:$0xf0]  ;;  %v1619_v28 = vor.u32 %v1429_v25, %v1256_v24  ;;  %v1248_v30 = vld [vmem:[%s2157_s1 + $0x20] sm:$0xf] }
   0xf   :  { %v1623_v29 = vor.u32 %v1428_v26, %v1258_v27  ;;  %v1427_v31 = vld [vmem:[%s2157_s1 + $0x24] sm:$0xf0]  ;;  %v1426_v32 = vld [vmem:[%s2157_s1 + $0x24] sm:$0xf]  ;;  %v1250_v33 = vld [vmem:[%s2157_s1 + $0x28] sm:$0xf0] }
  0x10   :  { %234 = vmatpush.bf16.msra.mxu0 %v1599_v22  ;;  %380 = vmatpush.bf16.msra.mxu2 %v1599_v22  ;;  %v1249_v34 = vor.u32 %v1427_v31, %v1248_v30  ;;  %v1253_v35 = vor.u32 %v1426_v32, %v1250_v33  ;;  %v1240_v36 = vld [vmem:[%s2157_s1 + $0x10] sm:$0xf]  ;;  %v1425_v37 = vld [vmem:[%s2157_s1 + $0x14] sm:$0xf0]  ;;  %v1424_v38 = vld [vmem:[%s2157_s1 + $0x14] sm:$0xf] }
  0x11   :  { %283 = vmatpush.bf16.msra.mxu1 %v1603_v23  ;;  %429 = vmatpush.bf16.msra.mxu3 %v1603_v23  ;;  %v1242_v39 = vld [vmem:[%s2157_s1 + $0x18] sm:$0xf0]  ;;  %v1241_v40 = vor.u32 %v1425_v37, %v1240_v36  ;;  %v1232_v42 = vld [vmem:[%s2157_s1] sm:$0xf]  ;;  %v1423_v43 = vld [vmem:[%s2157_s1 + $0x4] sm:$0xf0] }
  0x12   :  { %v1245_v41 = vor.u32 %v1424_v38, %v1242_v39  ;;  %v1422_v44 = vld [vmem:[%s2157_s1 + $0x4] sm:$0xf]  ;;  %v1234_v45 = vld [vmem:[%s2157_s1 + $0x8] sm:$0xf0]  ;;  %v1233_v46 = vor.u32 %v1423_v43, %v1232_v42  ;;  %v1448_v52 = vld [vmem:[%s2156_s0 + $0x50] sm:$0xff]  ;;  %vm22_vm0 = vcmask 261120  }
  0x13   :  { %v1237_v47 = vor.u32 %v1422_v44, %v1234_v45  ;;  %v1446_v48 = vld [vmem:[%s2156_s0 + $0x40] sm:$0xff]  ;;  %v1447_v50 = vld [vmem:[%s2156_s0 + $0x48] sm:$0xff]  ;;  %v1440_v53 = vld [vmem:[%s2156_s0 + $0x10] sm:$0xff]  ;;  %vm1013_vm1 = vcmask 1043456   ;;  %vm1014_vm2 = vcmask 261124   ;;  %s1501_s23 = smov [#allocation3]  }
  0x14   :  { %235 = vmatpush.bf16.msra.mxu0 %v1619_v28  ;;  %381 = vmatpush.bf16.msra.mxu2 %v1619_v28  ;;  %v1438_v49 = vld [vmem:[%s2156_s0] sm:$0xff]  ;;  %v1439_v51 = vld [vmem:[%s2156_s0 + $0x8] sm:$0xff]  ;;  %v1449_v54 = vld [vmem:[%s2156_s0 + $0x58] sm:$0xff]  ;;  %s1164_s24 = sshll.u32 %s1501_s23, 4  ;;  %s1166_s27 = sshll.u32 %s2159_s3, 4  ;;  %s1165_s24 = int_to_ptr.vmem [resolvable:$true] %s1164_s24  ;;  %s1167_s27 = int_to_ptr.hbm [resolvable:$true] %s1166_s27 }
  0x15   :  { %284 = vmatpush.bf16.msra.mxu1 %v1623_v29  ;;  %430 = vmatpush.bf16.msra.mxu3 %v1623_v29  ;;  %v1441_v55 = vld [vmem:[%s2156_s0 + $0x18] sm:$0xff]  ;;  %v1450_v56 = vld [vmem:[%s2156_s0 + $0x60] sm:$0xff]  ;;  %v1451_v58 = vld [vmem:[%s2156_s0 + $0x68] sm:$0xff]  ;;  %s1503_s30 = smov 8  }
  0x16   :  { %v1442_v57 = vld [vmem:[%s2156_s0 + $0x20] sm:$0xff]  ;;  %v1443_v59 = vld [vmem:[%s2156_s0 + $0x28] sm:$0xff]  ;;  %v1452_v60 = vld [vmem:[%s2156_s0 + $0x70] sm:$0xff] }
  0x17   :  { %v1444_v61 = vld [vmem:[%s2156_s0 + $0x30] sm:$0xff]  ;;  %v1453_v62 = vld [vmem:[%s2156_s0 + $0x78] sm:$0xff]  ;;  %v1454_v0 = vld [vmem:[%s2156_s0 + $0x80] sm:$0xff] }
  0x18   :  { %236 = vmatpush.bf16.msra.mxu0 %v1249_v34  ;;  %382 = vmatpush.bf16.msra.mxu2 %v1249_v34  ;;  %v1445_v63 = vld [vmem:[%s2156_s0 + $0x38] sm:$0xff]  ;;  %v1462_v1 = vld [vmem:[%s2156_s0 + $0xc0] sm:$0xff]  ;;  %v1455_v13 = vld [vmem:[%s2156_s0 + $0x88] sm:$0xff] }
  0x19   :  { %285 = vmatpush.bf16.msra.mxu1 %v1253_v35  ;;  %431 = vmatpush.bf16.msra.mxu3 %v1253_v35  ;;  %v1463_v14 = vld [vmem:[%s2156_s0 + $0xc8] sm:$0xff]  ;;  %v1456_v27 = vld [vmem:[%s2156_s0 + $0x90] sm:$0xff]  ;;  %v1465_v42 = vld [vmem:[%s2156_s0 + $0xd8] sm:$0xff] }
  0x1a   :  { %vm1878_vm3 = vmor %vm1014_vm2, %vm1013_vm1 }
  0x1c   :  { %237 = vmatpush.bf16.msra.mxu0 %v1241_v40  ;;  %383 = vmatpush.bf16.msra.mxu2 %v1241_v40 }
  0x1d   :  { %286 = vmatpush.bf16.msra.mxu1 %v1245_v41  ;;  %432 = vmatpush.bf16.msra.mxu3 %v1245_v41 }
  0x20   :  { %238 = vmatpush.bf16.msra.mxu0 %v1233_v46  ;;  %384 = vmatpush.bf16.msra.mxu2 %v1233_v46 }
  0x21   :  { %287 = vmatpush.bf16.msra.mxu1 %v1237_v47  ;;  %433 = vmatpush.bf16.msra.mxu3 %v1237_v47 }
  0x23   :  { %239 = vmatmul.bf16.vlgmr.msra.gmra.mxu0 %v1446_v48  ;;  %385 = vmatmul.bf16.vlgmr.msra.gmra.mxu2 %v1438_v49 }
  0x24   :  { %735 = vmatpush.bf16.msrb.mxu2 %v1538_v3  ;;  %288 = vmatmul.bf16.vlgmr.msra.gmra.mxu1 %v1446_v48 }
  0x25   :  { %784 = vmatpush.bf16.msrb.mxu3 %v1549_v7  ;;  %540 = vmatpush.bf16.msrb.mxu0 %v1538_v3 }
  0x26   :  { %434 = vmatmul.bf16.vlgmr.msra.gmra.mxu3 %v1438_v49  ;;  %589 = vmatpush.bf16.msrb.mxu1 %v1549_v7 }
  0x28   :  { %736 = vmatpush.bf16.msrb.mxu2 %v1559_v10 }
  0x29   :  { %785 = vmatpush.bf16.msrb.mxu3 %v1563_v11  ;;  %541 = vmatpush.bf16.msrb.mxu0 %v1559_v10 }
  0x2a   :  { %590 = vmatpush.bf16.msrb.mxu1 %v1563_v11 }
  0x2c   :  { %737 = vmatpush.bf16.msrb.mxu2 %v1579_v16 }
  0x2d   :  { %786 = vmatpush.bf16.msrb.mxu3 %v1583_v17  ;;  %542 = vmatpush.bf16.msrb.mxu0 %v1579_v16 }
  0x2e   :  { %591 = vmatpush.bf16.msrb.mxu1 %v1583_v17 }
  0x30   :  { %738 = vmatpush.bf16.msrb.mxu2 %v1599_v22 }
  0x31   :  { %787 = vmatpush.bf16.msrb.mxu3 %v1603_v23  ;;  %543 = vmatpush.bf16.msrb.mxu0 %v1599_v22 }
  0x32   :  { %592 = vmatpush.bf16.msrb.mxu1 %v1603_v23 }
  0x33   :  { %244 = vmatmul.bf16.gmra.mxu0 %v1447_v50  ;;  %390 = vmatmul.bf16.gmra.mxu2 %v1439_v51 }
  0x34   :  { %739 = vmatpush.bf16.msrb.mxu2 %v1619_v28  ;;  %293 = vmatmul.bf16.gmra.mxu1 %v1447_v50 }
  0x35   :  { %788 = vmatpush.bf16.msrb.mxu3 %v1623_v29  ;;  %544 = vmatpush.bf16.msrb.mxu0 %v1619_v28  ;;  %v1464_v28 = vld [vmem:[%s2156_s0 + $0xd0] sm:$0xff] }
  0x36   :  { %439 = vmatmul.bf16.gmra.mxu3 %v1439_v51  ;;  %593 = vmatpush.bf16.msrb.mxu1 %v1623_v29 }
  0x38   :  { %740 = vmatpush.bf16.msrb.mxu2 %v1249_v34 }
  0x39   :  { %789 = vmatpush.bf16.msrb.mxu3 %v1253_v35  ;;  %545 = vmatpush.bf16.msrb.mxu0 %v1249_v34 }
  0x3a   :  { %594 = vmatpush.bf16.msrb.mxu1 %v1253_v35 }
  0x3c   :  { %741 = vmatpush.bf16.msrb.mxu2 %v1241_v40 }
  0x3d   :  { %790 = vmatpush.bf16.msrb.mxu3 %v1245_v41  ;;  %546 = vmatpush.bf16.msrb.mxu0 %v1241_v40 }
  0x3e   :  { %595 = vmatpush.bf16.msrb.mxu1 %v1245_v41  ;;  %v1457_v41 = vld [vmem:[%s2156_s0 + $0x98] sm:$0xff] }
  0x40   :  { %742 = vmatpush.bf16.msrb.mxu2 %v1233_v46 }
  0x41   :  { %791 = vmatpush.bf16.msrb.mxu3 %v1237_v47  ;;  %547 = vmatpush.bf16.msrb.mxu0 %v1233_v46 }
  0x42   :  { %596 = vmatpush.bf16.msrb.mxu1 %v1237_v47 }
  0x43   :  { %249 = vmatmul.bf16.gmra.mxu0 %v1448_v52  ;;  %395 = vmatmul.bf16.gmra.mxu2 %v1440_v53 }
  0x44   :  { %298 = vmatmul.bf16.gmra.mxu1 %v1448_v52 }
  0x46   :  { %444 = vmatmul.bf16.gmra.mxu3 %v1440_v53 }
  0x53   :  { %254 = vmatmul.bf16.gmra.mxu0 %v1449_v54  ;;  %400 = vmatmul.bf16.gmra.mxu2 %v1441_v55 }
  0x54   :  { %303 = vmatmul.bf16.gmra.mxu1 %v1449_v54 }
  0x56   :  { %449 = vmatmul.bf16.gmra.mxu3 %v1441_v55  ;;  %v1458_v55 = vld [vmem:[%s2156_s0 + $0xa0] sm:$0xff] }
  0x63   :  { %259 = vmatmul.bf16.gmra.mxu0 %v1450_v56  ;;  %405 = vmatmul.bf16.gmra.mxu2 %v1442_v57 }
  0x64   :  { %308 = vmatmul.bf16.gmra.mxu1 %v1450_v56  ;;  %v1466_v56 = vld [vmem:[%s2156_s0 + $0xe0] sm:$0xff] }
  0x66   :  { %454 = vmatmul.bf16.gmra.mxu3 %v1442_v57 }
  0x73   :  { %264 = vmatmul.bf16.gmra.mxu0 %v1451_v58  ;;  %410 = vmatmul.bf16.gmra.mxu2 %v1443_v59 }
  0x74   :  { %313 = vmatmul.bf16.gmra.mxu1 %v1451_v58 }
  0x76   :  { %459 = vmatmul.bf16.gmra.mxu3 %v1443_v59 }
  0x83   :  { %269 = vmatmul.bf16.gmra.mxu0 %v1452_v60  ;;  %415 = vmatmul.bf16.gmra.mxu2 %v1444_v61 }
  0x84   :  { %318 = vmatmul.bf16.gmra.mxu1 %v1452_v60 }
  0x86   :  { %464 = vmatmul.bf16.gmra.mxu3 %v1444_v61 }
  0x93   :  { %274 = vmatmul.bf16.gmra.mxu0 %v1453_v62  ;;  %420 = vmatmul.bf16.gmra.mxu2 %v1445_v63 }
  0x94   :  { %323 = vmatmul.bf16.gmra.mxu1 %v1453_v62 }
  0x96   :  { %469 = vmatmul.bf16.gmra.mxu3 %v1445_v63 }
  0xa0   :  { %v240_v2 = vpop.f32.mrf.mxu0 }
  0xa1   :  { %v289_v3 = vpop.f32.mrf.mxu1 }
  0xa3   :  { %548 = vmatmul.bf16.vlgmr.msrb.gmra.mxu0 %v1454_v0  ;;  %743 = vmatmul.bf16.vlgmr.msrb.gmra.mxu2 %v1462_v1 }
  0xa4   :  { %597 = vmatmul.bf16.vlgmr.msrb.gmra.mxu1 %v1454_v0 }
  0xa6   :  { %792 = vmatmul.bf16.vlgmr.msrb.gmra.mxu3 %v1462_v1  ;;  %v386_v4 = vpop.f32.mrf.mxu2 }
  0xa7   :  { %v1739_v5 = vadd.f32 %v386_v4, %v240_v2 }
  0xa8   :  { %v242_v8 = vpop.f32.mrf.mxu0 }
  0xa9   :  { %v435_v6 = vpop.f32.mrf.mxu3  ;;  %v291_v9 = vpop.f32.mrf.mxu1 }
  0xaa   :  { %v1741_v7 = vadd.f32 %v435_v6, %v289_v3  ;;  %v1459_v6 = vld [vmem:[%s2156_s0 + $0xa8] sm:$0xff] }
  0xae   :  { %v388_v10 = vpop.f32.mrf.mxu2 }
  0xaf   :  { %v1743_v11 = vadd.f32 %v388_v10, %v242_v8  ;;  %v1467_v8 = vld [vmem:[%s2156_s0 + $0xe8] sm:$0xff] }
  0xb0   :  { %v245_v16 = vpop.f32.mrf.mxu0 }
  0xb1   :  { %v437_v12 = vpop.f32.mrf.mxu3  ;;  %v294_v17 = vpop.f32.mrf.mxu1 }
  0xb2   :  { %v1751_v15 = vadd.f32 %v437_v12, %v291_v9 }
  0xb3   :  { %553 = vmatmul.bf16.gmra.mxu0 %v1455_v13  ;;  %748 = vmatmul.bf16.gmra.mxu2 %v1463_v14 }
  0xb4   :  { %602 = vmatmul.bf16.gmra.mxu1 %v1455_v13 }
  0xb6   :  { %797 = vmatmul.bf16.gmra.mxu3 %v1463_v14  ;;  %v391_v18 = vpop.f32.mrf.mxu2 }
  0xb7   :  { %v1753_v19 = vadd.f32 %v391_v18, %v245_v16 }
  0xb8   :  { %v247_v22 = vpop.f32.mrf.mxu0 }
  0xb9   :  { %v440_v20 = vpop.f32.mrf.mxu3  ;;  %v296_v23 = vpop.f32.mrf.mxu1 }
  0xba   :  { %v1755_v21 = vadd.f32 %v440_v20, %v294_v17 }
  0xbe   :  { %v393_v24 = vpop.f32.mrf.mxu2 }
  0xbf   :  { %v1757_v25 = vadd.f32 %v393_v24, %v247_v22 }
  0xc0   :  { %v250_v30 = vpop.f32.mrf.mxu0 }
  0xc1   :  { %v442_v26 = vpop.f32.mrf.mxu3  ;;  %v299_v31 = vpop.f32.mrf.mxu1 }
  0xc2   :  { %v1765_v29 = vadd.f32 %v442_v26, %v296_v23  ;;  %v1460_v26 = vld [vmem:[%s2156_s0 + $0xb0] sm:$0xff] }
  0xc3   :  { %558 = vmatmul.bf16.gmra.mxu0 %v1456_v27  ;;  %753 = vmatmul.bf16.gmra.mxu2 %v1464_v28 }
  0xc4   :  { %607 = vmatmul.bf16.gmra.mxu1 %v1456_v27  ;;  %v1468_v27 = vld [vmem:[%s2156_s0 + $0xf0] sm:$0xff] }
  0xc6   :  { %802 = vmatmul.bf16.gmra.mxu3 %v1464_v28  ;;  %v396_v32 = vpop.f32.mrf.mxu2 }
  0xc7   :  { %v1767_v33 = vadd.f32 %v396_v32, %v250_v30  ;;  %v1500_v32 = vmov 0.0  }
  0xc8   :  { %v252_v36 = vpop.f32.mrf.mxu0  ;;  %23 = vst.msk [vmem:[#allocation2 + $0x8] sm:$0xff] %vm22_vm0, %v1500_v32 }
  0xc9   :  { %v445_v34 = vpop.f32.mrf.mxu3  ;;  %v301_v37 = vpop.f32.mrf.mxu1  ;;  %25 = vst.msk [vmem:[#allocation2 + $0x18] sm:$0xff] %vm22_vm0, %v1500_v32 }
  0xca   :  { %v1769_v35 = vadd.f32 %v445_v34, %v299_v31  ;;  %27 = vst.msk [vmem:[#allocation2 + $0x28] sm:$0xff] %vm22_vm0, %v1500_v32 }
  0xcb   :  { %29 = vst.msk [vmem:[#allocation2 + $0x38] sm:$0xff] %vm22_vm0, %v1500_v32 }
  0xcc   :  { %31 = vst.msk [vmem:[#allocation2 + $0x48] sm:$0xff] %vm22_vm0, %v1500_v32 }
  0xcd   :  { %33 = vst.msk [vmem:[#allocation2 + $0x58] sm:$0xff] %vm22_vm0, %v1500_v32 }
  0xce   :  { %v398_v38 = vpop.f32.mrf.mxu2  ;;  %35 = vst.msk [vmem:[#allocation2 + $0x68] sm:$0xff] %vm22_vm0, %v1500_v32 }
  0xcf   :  { %v1771_v39 = vadd.f32 %v398_v38, %v252_v36  ;;  %37 = vst.msk [vmem:[#allocation2 + $0x78] sm:$0xff] %vm22_vm0, %v1500_v32 }
  0xd0   :  { %v255_v44 = vpop.f32.mrf.mxu0  ;;  %39 = vst.msk [vmem:[#allocation2 + $0x88] sm:$0xff] %vm22_vm0, %v1500_v32 }
  0xd1   :  { %v447_v40 = vpop.f32.mrf.mxu3  ;;  %v304_v45 = vpop.f32.mrf.mxu1  ;;  %41 = vst.msk [vmem:[#allocation2 + $0x98] sm:$0xff] %vm22_vm0, %v1500_v32 }
  0xd2   :  { %v1779_v43 = vadd.f32 %v447_v40, %v301_v37  ;;  %43 = vst.msk [vmem:[#allocation2 + $0xa8] sm:$0xff] %vm22_vm0, %v1500_v32 }
  0xd3   :  { %563 = vmatmul.bf16.gmra.mxu0 %v1457_v41  ;;  %758 = vmatmul.bf16.gmra.mxu2 %v1465_v42  ;;  %45 = vst.msk [vmem:[#allocation2 + $0xb8] sm:$0xff] %vm22_vm0, %v1500_v32 }
  0xd4   :  { %612 = vmatmul.bf16.gmra.mxu1 %v1457_v41  ;;  %47 = vst.msk [vmem:[#allocation2 + $0xc8] sm:$0xff] %vm22_vm0, %v1500_v32 }
  0xd5   :  { %49 = vst.msk [vmem:[#allocation2 + $0xd8] sm:$0xff] %vm22_vm0, %v1500_v32 }
  0xd6   :  { %807 = vmatmul.bf16.gmra.mxu3 %v1465_v42  ;;  %v401_v46 = vpop.f32.mrf.mxu2  ;;  %51 = vst.msk [vmem:[#allocation2 + $0xe8] sm:$0xff] %vm22_vm0, %v1500_v32 }
  0xd7   :  { %v1781_v47 = vadd.f32 %v401_v46, %v255_v44  ;;  %v1461_v46 = vld [vmem:[%s2156_s0 + $0xb8] sm:$0xff]  ;;  %53 = vst.msk [vmem:[#allocation2 + $0xf8] sm:$0xff] %vm22_vm0, %v1500_v32 }
  0xd8   :  { %v257_v50 = vpop.f32.mrf.mxu0 }
  0xd9   :  { %v450_v48 = vpop.f32.mrf.mxu3  ;;  %v306_v51 = vpop.f32.mrf.mxu1 }
  0xda   :  { %v1783_v49 = vadd.f32 %v450_v48, %v304_v45  ;;  %v1469_v48 = vld [vmem:[%s2156_s0 + $0xf8] sm:$0xff] }
  0xde   :  { %v403_v52 = vpop.f32.mrf.mxu2 }
  0xdf   :  { %v1785_v53 = vadd.f32 %v403_v52, %v257_v50 }
  0xe0   :  { %v260_v58 = vpop.f32.mrf.mxu0 }
  0xe1   :  { %v452_v54 = vpop.f32.mrf.mxu3  ;;  %v309_v59 = vpop.f32.mrf.mxu1 }
  0xe2   :  { %v1793_v57 = vadd.f32 %v452_v54, %v306_v51 }
  0xe3   :  { %568 = vmatmul.bf16.gmra.mxu0 %v1458_v55  ;;  %763 = vmatmul.bf16.gmra.mxu2 %v1466_v56 }
  0xe4   :  { %617 = vmatmul.bf16.gmra.mxu1 %v1458_v55 }
  0xe6   :  { %812 = vmatmul.bf16.gmra.mxu3 %v1466_v56  ;;  %v406_v60 = vpop.f32.mrf.mxu2 }
  0xe7   :  { %v1795_v61 = vadd.f32 %v406_v60, %v260_v58 }
  0xe8   :  { %v262_v0 = vpop.f32.mrf.mxu0 }
  0xe9   :  { %v455_v62 = vpop.f32.mrf.mxu3  ;;  %v311_v1 = vpop.f32.mrf.mxu1 }
  0xea   :  { %v1797_v63 = vadd.f32 %v455_v62, %v309_v59 }
  0xee   :  { %v408_v2 = vpop.f32.mrf.mxu2 }
  0xef   :  { %v1799_v3 = vadd.f32 %v408_v2, %v262_v0 }
  0xf0   :  { %v265_v10 = vpop.f32.mrf.mxu0 }
  0xf1   :  { %v457_v4 = vpop.f32.mrf.mxu3  ;;  %v314_v12 = vpop.f32.mrf.mxu1 }
  0xf2   :  { %v1807_v9 = vadd.f32 %v457_v4, %v311_v1 }
  0xf3   :  { %573 = vmatmul.bf16.gmra.mxu0 %v1459_v6  ;;  %768 = vmatmul.bf16.gmra.mxu2 %v1467_v8 }
  0xf4   :  { %622 = vmatmul.bf16.gmra.mxu1 %v1459_v6 }
  0xf6   :  { %817 = vmatmul.bf16.gmra.mxu3 %v1467_v8  ;;  %v411_v13 = vpop.f32.mrf.mxu2 }
  0xf7   :  { %v1809_v14 = vadd.f32 %v411_v13, %v265_v10 }
  0xf8   :  { %v267_v18 = vpop.f32.mrf.mxu0 }
  0xf9   :  { %v460_v16 = vpop.f32.mrf.mxu3  ;;  %v316_v20 = vpop.f32.mrf.mxu1 }
  0xfa   :  { %v1811_v17 = vadd.f32 %v460_v16, %v314_v12 }
  0xfe   :  { %v413_v22 = vpop.f32.mrf.mxu2 }
  0xff   :  { %v1813_v23 = vadd.f32 %v413_v22, %v267_v18  ;;  %v866_v18 = vld [vmem:[#allocation2 + $0x8] sm:$0xff] }
 0x100   :  { %v270_v30 = vpop.f32.mrf.mxu0 }
 0x101   :  { %v462_v24 = vpop.f32.mrf.mxu3  ;;  %v319_v31 = vpop.f32.mrf.mxu1 }
 0x102   :  { %v1821_v28 = vadd.f32 %v462_v24, %v316_v20  ;;  %v1032_v20 = vld [vmem:[%s2158_s2] sm:$0xff] }
 0x103   :  { %578 = vmatmul.bf16.gmra.mxu0 %v1460_v26  ;;  %773 = vmatmul.bf16.gmra.mxu2 %v1468_v27 }
 0x104   :  { %627 = vmatmul.bf16.gmra.mxu1 %v1460_v26 }
 0x106   :  { %822 = vmatmul.bf16.gmra.mxu3 %v1468_v27  ;;  %v416_v34 = vpop.f32.mrf.mxu2 }
 0x107   :  { %v1828_v36 = vadd.f32 %v416_v34, %v270_v30 }
 0x108   :  { %v272_v40 = vpop.f32.mrf.mxu0 }
 0x109   :  { %v465_v37 = vpop.f32.mrf.mxu3  ;;  %v321_v41 = vpop.f32.mrf.mxu1 }
 0x10a   :  { %v1831_v38 = vadd.f32 %v465_v37, %v319_v31  ;;  %v868_v37 = vld [vmem:[#allocation2 + $0x18] sm:$0xff] }
 0x10e   :  { %v418_v42 = vpop.f32.mrf.mxu2 }
 0x10f   :  { %v1840_v44 = vadd.f32 %v418_v42, %v272_v40  ;;  %v1034_v40 = vld [vmem:[%s2158_s2 + $0x10] sm:$0xff] }
 0x110   :  { %v275_v51 = vpop.f32.mrf.mxu0 }
 0x111   :  { %v467_v45 = vpop.f32.mrf.mxu3  ;;  %v324_v52 = vpop.f32.mrf.mxu1 }
 0x112   :  { %v1849_v50 = vadd.f32 %v467_v45, %v321_v41  ;;  %v1033_v45 = vld [vmem:[%s2158_s2 + $0x8] sm:$0xff] }
 0x113   :  { %583 = vmatmul.bf16.gmra.mxu0 %v1461_v46  ;;  %778 = vmatmul.bf16.gmra.mxu2 %v1469_v48 }
 0x114   :  { %632 = vmatmul.bf16.gmra.mxu1 %v1461_v46 }
 0x116   :  { %827 = vmatmul.bf16.gmra.mxu3 %v1469_v48  ;;  %v421_v54 = vpop.f32.mrf.mxu2 }
 0x117   :  { %v1853_v55 = vadd.f32 %v421_v54, %v275_v51 }
 0x118   :  { %v277_v59 = vpop.f32.mrf.mxu0 }
 0x119   :  { %v470_v56 = vpop.f32.mrf.mxu3  ;;  %v326_v60 = vpop.f32.mrf.mxu1 }
 0x11a   :  { %v1855_v58 = vadd.f32 %v470_v56, %v324_v52 }
 0x11e   :  { %v423_v62 = vpop.f32.mrf.mxu2 }
 0x11f   :  { %v1857_v0 = vadd.f32 %v423_v62, %v277_v59 }
 0x120   :  { %v549_v4 = vpop.f32.mrf.mxu0 }
 0x121   :  { %v472_v1 = vpop.f32.mrf.mxu3  ;;  %v598_v6 = vpop.f32.mrf.mxu1  ;;  %v638_v8 = vadd.f32 %v549_v4, %v1739_v5  ;;  %v870_v4 = vld [vmem:[#allocation2 + $0x28] sm:$0xff] }
 0x122   :  { %v1859_v2 = vadd.f32 %v472_v1, %v326_v60  ;;  %v639_v10 = vadd.f32 %v598_v6, %v1741_v7  ;;  %v1036_v6 = vld [vmem:[%s2158_s2 + $0x20] sm:$0xff] }
 0x126   :  { %v744_v12 = vpop.f32.mrf.mxu2 }
 0x127   :  { %v833_v13 = vadd.f32 %v744_v12, %v638_v8 }
 0x128   :  { %v551_v24 = vpop.f32.mrf.mxu0 }
 0x129   :  { %v793_v16 = vpop.f32.mrf.mxu3  ;;  %v600_v26 = vpop.f32.mrf.mxu1  ;;  %v1096_v30 = vadd.f32 %v1032_v20, %v833_v13  ;;  %v640_v5 = vadd.f32 %v551_v24, %v1743_v11 }
 0x12a   :  { %v834_v22 = vadd.f32 %v793_v16, %v639_v10  ;;  %v641_v7 = vadd.f32 %v600_v26, %v1751_v15  ;;  %v1035_v10 = vld [vmem:[%s2158_s2 + $0x18] sm:$0xff] }
 0x12b   :  { %1128 = vst [vmem:[%s2160_s4] sm:$0xff] %v1096_v30 }
 0x12c   :  { %v898_v27 = vadd.f32 %v866_v18, %v834_v22 }
 0x12e   :  { %931 = vst.msk [vmem:[#allocation2 + $0x8] sm:$0xff] %vm22_vm0, %v898_v27  ;;  %v746_v31 = vpop.f32.mrf.mxu2 }
 0x12f   :  { %v835_v32 = vadd.f32 %v746_v31, %v640_v5  ;;  %v872_v5 = vld [vmem:[#allocation2 + $0x38] sm:$0xff] }
 0x130   :  { %v554_v42 = vpop.f32.mrf.mxu0 }
 0x131   :  { %v795_v34 = vpop.f32.mrf.mxu3  ;;  %v603_v46 = vpop.f32.mrf.mxu1  ;;  %v1098_v51 = vadd.f32 %v1034_v40, %v835_v32  ;;  %v642_v56 = vadd.f32 %v554_v42, %v1753_v19 }
 0x132   :  { %v836_v41 = vadd.f32 %v795_v34, %v641_v7  ;;  %v643_v59 = vadd.f32 %v603_v46, %v1755_v21  ;;  %v1038_v7 = vld [vmem:[%s2158_s2 + $0x30] sm:$0xff] }
 0x133   :  { %1130 = vst [vmem:[%s2160_s4 + $0x10] sm:$0xff] %v1098_v51 }
 0x134   :  { %v900_v11 = vadd.f32 %v868_v37, %v836_v41 }
 0x135   :  { %v966_v48 = vld [vmem:[#allocation2 + $0x8] sm:$0xff] }
 0x136   :  { %v997_v52 = vpack.c.bf16 %v966_v48, %v833_v13  ;;  %v1097_v54 = vadd.f32 %v1033_v45, %v966_v48  ;;  %933 = vst.msk [vmem:[#allocation2 + $0x18] sm:$0xff] %vm22_vm0, %v900_v11  ;;  %v749_v60 = vpop.f32.mrf.mxu2 }
 0x137   :  { %v837_v62 = vadd.f32 %v749_v60, %v642_v56 }
 0x138   :  { %1016 = vst.msk [vmem:[#allocation3] sm:$0xff] %vm1878_vm3, %v997_v52  ;;  %v556_v19 = vpop.f32.mrf.mxu0  ;;  %v874_v52 = vld [vmem:[#allocation2 + $0x48] sm:$0xff] }
 0x139   :  { %1129 = vst.msk [vmem:[%s2160_s4 + $0x8] sm:$0xff] %vm22_vm0, %v1097_v54  ;;  %v798_v1 = vpop.f32.mrf.mxu3  ;;  %v605_v21 = vpop.f32.mrf.mxu1  ;;  %v1100_v16 = vadd.f32 %v1036_v6, %v837_v62  ;;  %v644_v22 = vadd.f32 %v556_v19, %v1757_v25  ;;  %v1040_v54 = vld [vmem:[%s2158_s2 + $0x40] sm:$0xff] }
 0x13a   :  { %v838_v8 = vadd.f32 %v798_v1, %v643_v59  ;;  %v645_v24 = vadd.f32 %v605_v21, %v1765_v29  ;;  %v1039_v59 = vld [vmem:[%s2158_s2 + $0x38] sm:$0xff] }
 0x13b   :  { %1132 = vst [vmem:[%s2160_s4 + $0x20] sm:$0xff] %v1100_v16  ;;  %v1042_v16 = vld [vmem:[%s2158_s2 + $0x50] sm:$0xff] }
 0x13c   :  { %v902_v12 = vadd.f32 %v870_v4, %v838_v8 }
 0x13d   :  { %v968_v13 = vld [vmem:[#allocation2 + $0x18] sm:$0xff] }
 0x13e   :  { %v998_v18 = vpack.c.bf16 %v968_v13, %v835_v32  ;;  %v1099_v20 = vadd.f32 %v1035_v10, %v968_v13  ;;  %935 = vst.msk [vmem:[#allocation2 + $0x28] sm:$0xff] %vm22_vm0, %v902_v12  ;;  %v751_v26 = vpop.f32.mrf.mxu2  ;;  %v1037_v32 = vld [vmem:[%s2158_s2 + $0x28] sm:$0xff]  ;;  %v876_v13 = vld [vmem:[#allocation2 + $0x58] sm:$0xff] }
 0x13f   :  { %v839_v27 = vadd.f32 %v751_v26, %v644_v22 }
 0x140   :  { %1017 = vst.msk [vmem:[#allocation3 + $0x8] sm:$0xff] %vm1878_vm3, %v998_v18  ;;  %v559_v25 = vpop.f32.mrf.mxu0 }
 0x141   :  { %1131 = vst.msk [vmem:[%s2160_s4 + $0x18] sm:$0xff] %vm22_vm0, %v1099_v20  ;;  %v800_v30 = vpop.f32.mrf.mxu3  ;;  %v608_v29 = vpop.f32.mrf.mxu1  ;;  %v1102_v40 = vadd.f32 %v1038_v7, %v839_v27  ;;  %v646_v45 = vadd.f32 %v559_v25, %v1767_v33  ;;  %v1041_v20 = vld [vmem:[%s2158_s2 + $0x48] sm:$0xff] }
 0x142   :  { %v840_v31 = vadd.f32 %v800_v30, %v645_v24  ;;  %v647_v46 = vadd.f32 %v608_v29, %v1769_v35  ;;  %v878_v29 = vld [vmem:[#allocation2 + $0x68] sm:$0xff] }
 0x143   :  { %1134 = vst [vmem:[%s2160_s4 + $0x30] sm:$0xff] %v1102_v40  ;;  %v1043_v40 = vld [vmem:[%s2158_s2 + $0x58] sm:$0xff] }
 0x144   :  { %v904_v34 = vadd.f32 %v872_v5, %v840_v31 }
 0x145   :  { %v970_v37 = vld [vmem:[#allocation2 + $0x28] sm:$0xff] }
 0x146   :  { %v999_v41 = vpack.c.bf16 %v970_v37, %v837_v62  ;;  %v1101_v42 = vadd.f32 %v1037_v32, %v970_v37  ;;  %937 = vst.msk [vmem:[#allocation2 + $0x38] sm:$0xff] %vm22_vm0, %v904_v34  ;;  %v754_v11 = vpop.f32.mrf.mxu2  ;;  %v1044_v34 = vld [vmem:[%s2158_s2 + $0x60] sm:$0xff] }
 0x147   :  { %v841_v48 = vadd.f32 %v754_v11, %v646_v45 }
 0x148   :  { %1018 = vst.msk [vmem:[#allocation3 + $0x10] sm:$0xff] %vm1878_vm3, %v999_v41  ;;  %v561_v33 = vpop.f32.mrf.mxu0 }
 0x149   :  { %1133 = vst.msk [vmem:[%s2160_s4 + $0x28] sm:$0xff] %vm22_vm0, %v1101_v42  ;;  %v803_v51 = vpop.f32.mrf.mxu3  ;;  %v610_v35 = vpop.f32.mrf.mxu1  ;;  %v1104_v1 = vadd.f32 %v1040_v54, %v841_v48  ;;  %v648_v8 = vadd.f32 %v561_v33, %v1771_v39  ;;  %v880_v33 = vld [vmem:[#allocation2 + $0x78] sm:$0xff] }
 0x14a   :  { %v842_v56 = vadd.f32 %v803_v51, %v647_v46  ;;  %v649_v19 = vadd.f32 %v610_v35, %v1779_v43 }
 0x14b   :  { %1136 = vst [vmem:[%s2160_s4 + $0x40] sm:$0xff] %v1104_v1 }
 0x14c   :  { %v906_v60 = vadd.f32 %v874_v52, %v842_v56 }
 0x14d   :  { %v972_v62 = vld [vmem:[#allocation2 + $0x38] sm:$0xff] }
 0x14e   :  { %v1000_v4 = vpack.c.bf16 %v972_v62, %v839_v27  ;;  %v1103_v6 = vadd.f32 %v1039_v59, %v972_v62  ;;  %939 = vst.msk [vmem:[#allocation2 + $0x48] sm:$0xff] %vm22_vm0, %v906_v60  ;;  %v756_v10 = vpop.f32.mrf.mxu2  ;;  %v1046_v59 = vld [vmem:[%s2158_s2 + $0x70] sm:$0xff]  ;;  %v1045_v60 = vld [vmem:[%s2158_s2 + $0x68] sm:$0xff] }
 0x14f   :  { %v843_v21 = vadd.f32 %v756_v10, %v648_v8 }
 0x150   :  { %1019 = vst.msk [vmem:[#allocation3 + $0x18] sm:$0xff] %vm1878_vm3, %v1000_v4  ;;  %v564_v39 = vpop.f32.mrf.mxu0 }
 0x151   :  { %1135 = vst.msk [vmem:[%s2160_s4 + $0x38] sm:$0xff] %vm22_vm0, %v1103_v6  ;;  %v805_v12 = vpop.f32.mrf.mxu3  ;;  %v613_v43 = vpop.f32.mrf.mxu1  ;;  %v1106_v26 = vadd.f32 %v1042_v16, %v843_v21  ;;  %v650_v5 = vadd.f32 %v564_v39, %v1781_v47  ;;  %v882_v16 = vld [vmem:[#allocation2 + $0x88] sm:$0xff] }
 0x152   :  { %v844_v18 = vadd.f32 %v805_v12, %v649_v19  ;;  %v651_v7 = vadd.f32 %v613_v43, %v1783_v49 }
 0x153   :  { %1138 = vst [vmem:[%s2160_s4 + $0x50] sm:$0xff] %v1106_v26 }
 0x154   :  { %v908_v22 = vadd.f32 %v876_v13, %v844_v18  ;;  %v1048_v18 = vld [vmem:[%s2158_s2 + $0x80] sm:$0xff] }
 0x155   :  { %v974_v24 = vld [vmem:[#allocation2 + $0x48] sm:$0xff] }
 0x156   :  { %v1001_v27 = vpack.c.bf16 %v974_v24, %v841_v48  ;;  %v1105_v30 = vadd.f32 %v1041_v20, %v974_v24  ;;  %941 = vst.msk [vmem:[#allocation2 + $0x58] sm:$0xff] %vm22_vm0, %v908_v22  ;;  %v759_v31 = vpop.f32.mrf.mxu2  ;;  %v1047_v20 = vld [vmem:[%s2158_s2 + $0x78] sm:$0xff] }
 0x157   :  { %v845_v25 = vadd.f32 %v759_v31, %v650_v5 }
 0x158   :  { %1020 = vst.msk [vmem:[#allocation3 + $0x20] sm:$0xff] %vm1878_vm3, %v1001_v27  ;;  %v566_v47 = vpop.f32.mrf.mxu0 }
 0x159   :  { %1137 = vst.msk [vmem:[%s2160_s4 + $0x48] sm:$0xff] %vm22_vm0, %v1105_v30  ;;  %v808_v32 = vpop.f32.mrf.mxu3  ;;  %v615_v49 = vpop.f32.mrf.mxu1  ;;  %v1108_v45 = vadd.f32 %v1044_v34, %v845_v25  ;;  %v652_v48 = vadd.f32 %v566_v47, %v1785_v53 }
 0x15a   :  { %v846_v37 = vadd.f32 %v808_v32, %v651_v7  ;;  %v653_v51 = vadd.f32 %v615_v49, %v1793_v57  ;;  %v884_v32 = vld [vmem:[#allocation2 + $0x98] sm:$0xff] }
 0x15b   :  { %1140 = vst [vmem:[%s2160_s4 + $0x60] sm:$0xff] %v1108_v45 }
 0x15c   :  { %v910_v41 = vadd.f32 %v878_v29, %v846_v37  ;;  %v1050_v29 = vld [vmem:[%s2158_s2 + $0x90] sm:$0xff]  ;;  %v1049_v37 = vld [vmem:[%s2158_s2 + $0x88] sm:$0xff] }
 0x15d   :  { %v976_v42 = vld [vmem:[#allocation2 + $0x58] sm:$0xff] }
 0x15e   :  { %v1002_v46 = vpack.c.bf16 %v976_v42, %v843_v21  ;;  %v1107_v11 = vadd.f32 %v1043_v40, %v976_v42  ;;  %943 = vst.msk [vmem:[#allocation2 + $0x68] sm:$0xff] %vm22_vm0, %v910_v41  ;;  %v761_v52 = vpop.f32.mrf.mxu2 }
 0x15f   :  { %v847_v54 = vadd.f32 %v761_v52, %v652_v48  ;;  %v886_v52 = vld [vmem:[#allocation2 + $0xa8] sm:$0xff] }
 0x160   :  { %1021 = vst.msk [vmem:[#allocation3 + $0x28] sm:$0xff] %vm1878_vm3, %v1002_v46  ;;  %v569_v53 = vpop.f32.mrf.mxu0 }
 0x161   :  { %1139 = vst.msk [vmem:[%s2160_s4 + $0x58] sm:$0xff] %vm22_vm0, %v1107_v11  ;;  %v810_v56 = vpop.f32.mrf.mxu3  ;;  %v618_v57 = vpop.f32.mrf.mxu1  ;;  %v1110_v4 = vadd.f32 %v1046_v59, %v847_v54  ;;  %v654_v19 = vadd.f32 %v569_v53, %v1795_v61 }
 0x162   :  { %v848_v35 = vadd.f32 %v810_v56, %v653_v51  ;;  %v655_v10 = vadd.f32 %v618_v57, %v1797_v63 }
 0x163   :  { %1142 = vst [vmem:[%s2160_s4 + $0x70] sm:$0xff] %v1110_v4 }
 0x164   :  { %v912_v62 = vadd.f32 %v880_v33, %v848_v35  ;;  %v1051_v33 = vld [vmem:[%s2158_s2 + $0x98] sm:$0xff] }
 0x165   :  { %v978_v1 = vld [vmem:[#allocation2 + $0x68] sm:$0xff] }
 0x166   :  { %v1003_v6 = vpack.c.bf16 %v978_v1, %v845_v25  ;;  %v1109_v8 = vadd.f32 %v1045_v60, %v978_v1  ;;  %945 = vst.msk [vmem:[#allocation2 + $0x78] sm:$0xff] %vm22_vm0, %v912_v62  ;;  %v764_v21 = vpop.f32.mrf.mxu2 }
 0x167   :  { %v849_v12 = vadd.f32 %v764_v21, %v654_v19  ;;  %v888_v19 = vld [vmem:[#allocation2 + $0xb8] sm:$0xff] }
 0x168   :  { %1022 = vst.msk [vmem:[#allocation3 + $0x30] sm:$0xff] %vm1878_vm3, %v1003_v6  ;;  %v571_v61 = vpop.f32.mrf.mxu0 }
 0x169   :  { %1141 = vst.msk [vmem:[%s2160_s4 + $0x68] sm:$0xff] %vm22_vm0, %v1109_v8  ;;  %v813_v13 = vpop.f32.mrf.mxu3  ;;  %v620_v63 = vpop.f32.mrf.mxu1  ;;  %v1112_v24 = vadd.f32 %v1048_v18, %v849_v12  ;;  %v656_v30 = vadd.f32 %v571_v61, %v1799_v3 }
 0x16a   :  { %v850_v39 = vadd.f32 %v813_v13, %v655_v10  ;;  %v657_v5 = vadd.f32 %v620_v63, %v1807_v9  ;;  %v1054_v10 = vld [vmem:[%s2158_s2 + $0xb0] sm:$0xff] }
 0x16b   :  { %1144 = vst [vmem:[%s2160_s4 + $0x80] sm:$0xff] %v1112_v24 }
 0x16c   :  { %v914_v43 = vadd.f32 %v882_v16, %v850_v39 }
 0x16d   :  { %v980_v22 = vld [vmem:[#allocation2 + $0x78] sm:$0xff] }
 0x16e   :  { %v1004_v26 = vpack.c.bf16 %v980_v22, %v847_v54  ;;  %v1111_v27 = vadd.f32 %v1047_v20, %v980_v22  ;;  %947 = vst.msk [vmem:[#allocation2 + $0x88] sm:$0xff] %vm22_vm0, %v914_v43  ;;  %v766_v7 = vpop.f32.mrf.mxu2  ;;  %v1052_v54 = vld [vmem:[%s2158_s2 + $0xa0] sm:$0xff] }
 0x16f   :  { %v851_v31 = vadd.f32 %v766_v7, %v656_v30 }
 0x170   :  { %1023 = vst.msk [vmem:[#allocation3 + $0x38] sm:$0xff] %vm1878_vm3, %v1004_v26  ;;  %v574_v3 = vpop.f32.mrf.mxu0  ;;  %v890_v26 = vld [vmem:[#allocation2 + $0xc8] sm:$0xff] }
 0x171   :  { %1143 = vst.msk [vmem:[%s2160_s4 + $0x78] sm:$0xff] %vm22_vm0, %v1111_v27  ;;  %v815_v25 = vpop.f32.mrf.mxu3  ;;  %v623_v9 = vpop.f32.mrf.mxu1  ;;  %v1114_v49 = vadd.f32 %v1050_v29, %v851_v31  ;;  %v658_v45 = vadd.f32 %v574_v3, %v1809_v14  ;;  %v1056_v27 = vld [vmem:[%s2158_s2 + $0xc0] sm:$0xff] }
 0x172   :  { %v852_v34 = vadd.f32 %v815_v25, %v657_v5  ;;  %v659_v46 = vadd.f32 %v623_v9, %v1811_v17  ;;  %v1055_v5 = vld [vmem:[%s2158_s2 + $0xb8] sm:$0xff] }
 0x173   :  { %1146 = vst [vmem:[%s2160_s4 + $0x90] sm:$0xff] %v1114_v49  ;;  %v1058_v49 = vld [vmem:[%s2158_s2 + $0xd0] sm:$0xff] }
 0x174   :  { %v916_v47 = vadd.f32 %v884_v32, %v852_v34 }
 0x175   :  { %v982_v40 = vld [vmem:[#allocation2 + $0x88] sm:$0xff] }
 0x176   :  { %v1005_v41 = vpack.c.bf16 %v982_v40, %v849_v12  ;;  %v1113_v42 = vadd.f32 %v1049_v37, %v982_v40  ;;  %949 = vst.msk [vmem:[#allocation2 + $0x98] sm:$0xff] %vm22_vm0, %v916_v47  ;;  %v769_v11 = vpop.f32.mrf.mxu2  ;;  %v1053_v12 = vld [vmem:[%s2158_s2 + $0xa8] sm:$0xff]  ;;  %v892_v40 = vld [vmem:[#allocation2 + $0xd8] sm:$0xff] }
 0x177   :  { %v853_v48 = vadd.f32 %v769_v11, %v658_v45 }
 0x178   :  { %1024 = vst.msk [vmem:[#allocation3 + $0x40] sm:$0xff] %vm1878_vm3, %v1005_v41  ;;  %v576_v14 = vpop.f32.mrf.mxu0 }
 0x179   :  { %1145 = vst.msk [vmem:[%s2160_s4 + $0x88] sm:$0xff] %vm22_vm0, %v1113_v42  ;;  %v818_v51 = vpop.f32.mrf.mxu3  ;;  %v625_v17 = vpop.f32.mrf.mxu1  ;;  %v1116_v53 = vadd.f32 %v1052_v54, %v853_v48  ;;  %v660_v62 = vadd.f32 %v576_v14, %v1813_v23  ;;  %v1057_v42 = vld [vmem:[%s2158_s2 + $0xc8] sm:$0xff] }
 0x17a   :  { %v854_v56 = vadd.f32 %v818_v51, %v659_v46  ;;  %v661_v1 = vadd.f32 %v625_v17, %v1821_v28  ;;  %v894_v17 = vld [vmem:[#allocation2 + $0xe8] sm:$0xff] }
 0x17b   :  { %1148 = vst [vmem:[%s2160_s4 + $0xa0] sm:$0xff] %v1116_v53 }
 0x17c   :  { %v918_v59 = vadd.f32 %v886_v52, %v854_v56 }
 0x17d   :  { %v984_v35 = vld [vmem:[#allocation2 + $0x98] sm:$0xff] }
 0x17e   :  { %v1006_v60 = vpack.c.bf16 %v984_v35, %v851_v31  ;;  %v1115_v57 = vadd.f32 %v1051_v33, %v984_v35  ;;  %951 = vst.msk [vmem:[#allocation2 + $0xa8] sm:$0xff] %vm22_vm0, %v918_v59  ;;  %v771_v4 = vpop.f32.mrf.mxu2  ;;  %v1060_v59 = vld [vmem:[%s2158_s2 + $0xe0] sm:$0xff] }
 0x17f   :  { %v855_v6 = vadd.f32 %v771_v4, %v660_v62 }
 0x180   :  { %1025 = vst.msk [vmem:[#allocation3 + $0x48] sm:$0xff] %vm1878_vm3, %v1006_v60  ;;  %v579_v23 = vpop.f32.mrf.mxu0 }
 0x181   :  { %1147 = vst.msk [vmem:[%s2160_s4 + $0x98] sm:$0xff] %vm22_vm0, %v1115_v57  ;;  %v820_v8 = vpop.f32.mrf.mxu3  ;;  %v628_v28 = vpop.f32.mrf.mxu1  ;;  %v1118_v18 = vadd.f32 %v1054_v10, %v855_v6  ;;  %v662_v20 = vadd.f32 %v579_v23, %v1828_v36  ;;  %v896_v23 = vld [vmem:[#allocation2 + $0xf8] sm:$0xff] }
 0x182   :  { %v856_v21 = vadd.f32 %v820_v8, %v661_v1  ;;  %v663_v63 = vadd.f32 %v628_v28, %v1831_v38 }
 0x183   :  { %1150 = vst [vmem:[%s2160_s4 + $0xb0] sm:$0xff] %v1118_v18 }
 0x184   :  { %v920_v13 = vadd.f32 %v888_v19, %v856_v21 }
 0x185   :  { %v986_v16 = vld [vmem:[#allocation2 + $0xa8] sm:$0xff] }
 0x186   :  { %v1007_v39 = vpack.c.bf16 %v986_v16, %v853_v48  ;;  %v1117_v61 = vadd.f32 %v1053_v12, %v986_v16  ;;  %953 = vst.msk [vmem:[#allocation2 + $0xb8] sm:$0xff] %vm22_vm0, %v920_v13  ;;  %v774_v43 = vpop.f32.mrf.mxu2  ;;  %v1062_v12 = vld [vmem:[%s2158_s2 + $0xf0] sm:$0xff] }
 0x187   :  { %v857_v22 = vadd.f32 %v774_v43, %v662_v20 }
 0x188   :  { %1026 = vst.msk [vmem:[#allocation3 + $0x50] sm:$0xff] %vm1878_vm3, %v1007_v39  ;;  %v581_v36 = vpop.f32.mrf.mxu0 }
 0x189   :  { %1149 = vst.msk [vmem:[%s2160_s4 + $0xa8] sm:$0xff] %vm22_vm0, %v1117_v61  ;;  %v823_v24 = vpop.f32.mrf.mxu3  ;;  %v630_v38 = vpop.f32.mrf.mxu1  ;;  %v1120_v25 = vadd.f32 %v1056_v27, %v857_v22  ;;  %v664_v34 = vadd.f32 %v581_v36, %v1840_v44  ;;  %v1063_v61 = vld [vmem:[%s2158_s2 + $0xf8] sm:$0xff] }
 0x18a   :  { %v858_v30 = vadd.f32 %v823_v24, %v663_v63  ;;  %v665_v3 = vadd.f32 %v630_v38, %v1849_v50 }
 0x18b   :  { %1152 = vst [vmem:[%s2160_s4 + $0xc0] sm:$0xff] %v1120_v25 }
 0x18c   :  { %v922_v7 = vadd.f32 %v890_v26, %v858_v30 }
 0x18d   :  { %v988_v31 = vld [vmem:[#allocation2 + $0xb8] sm:$0xff] }
 0x18e   :  { %v1008_v32 = vpack.c.bf16 %v988_v31, %v855_v6  ;;  %v1119_v29 = vadd.f32 %v1055_v5, %v988_v31  ;;  %955 = vst.msk [vmem:[#allocation2 + $0xc8] sm:$0xff] %vm22_vm0, %v922_v7  ;;  %v776_v37 = vpop.f32.mrf.mxu2 }
 0x18f   :  { %v859_v9 = vadd.f32 %v776_v37, %v664_v34 }
 0x190   :  { %1027 = vst.msk [vmem:[#allocation3 + $0x58] sm:$0xff] %vm1878_vm3, %v1008_v32  ;;  %v584_v44 = vpop.f32.mrf.mxu0 }
 0x191   :  { %1151 = vst.msk [vmem:[%s2160_s4 + $0xb8] sm:$0xff] %vm22_vm0, %v1119_v29  ;;  %v825_v47 = vpop.f32.mrf.mxu3  ;;  %v633_v50 = vpop.f32.mrf.mxu1  ;;  %v1122_v11 = vadd.f32 %v1058_v49, %v859_v9  ;;  %v666_v52 = vadd.f32 %v584_v44, %v1853_v55  ;;  %v1059_v55 = vld [vmem:[%s2158_s2 + $0xd8] sm:$0xff] }
 0x192   :  { %v860_v41 = vadd.f32 %v825_v47, %v665_v3  ;;  %v667_v54 = vadd.f32 %v633_v50, %v1855_v58 }
 0x193   :  { %1154 = vst [vmem:[%s2160_s4 + $0xd0] sm:$0xff] %v1122_v11 }
 0x194   :  { %v924_v45 = vadd.f32 %v892_v40, %v860_v41 }
 0x195   :  { %v990_v46 = vld [vmem:[#allocation2 + $0xc8] sm:$0xff] }
 0x196   :  { %v1009_v48 = vpack.c.bf16 %v990_v46, %v857_v22  ;;  %v1121_v51 = vadd.f32 %v1057_v42, %v990_v46  ;;  %957 = vst.msk [vmem:[#allocation2 + $0xd8] sm:$0xff] %vm22_vm0, %v924_v45  ;;  %v779_v56 = vpop.f32.mrf.mxu2 }
 0x197   :  { %v861_v14 = vadd.f32 %v779_v56, %v666_v52 }
 0x198   :  { %1028 = vst.msk [vmem:[#allocation3 + $0x60] sm:$0xff] %vm1878_vm3, %v1009_v48  ;;  %v586_v58 = vpop.f32.mrf.mxu0 }
 0x199   :  { %1153 = vst.msk [vmem:[%s2160_s4 + $0xc8] sm:$0xff] %vm22_vm0, %v1121_v51  ;;  %v828_v33 = vpop.f32.mrf.mxu3  ;;  %v1124_v57 = vadd.f32 %v1060_v59, %v861_v14  ;;  %v635_v62 = vpop.f32.mrf.mxu1  ;;  %v668_v6 = vadd.f32 %v586_v58, %v1857_v0  ;;  %v1061_v0 = vld [vmem:[%s2158_s2 + $0xe8] sm:$0xff]  ;;  %s1502_s2 = smov 128  }
 0x19a   :  { %v862_v35 = vadd.f32 %v828_v33, %v667_v54  ;;  %v669_v8 = vadd.f32 %v635_v62, %v1859_v2 }
 0x19b   :  { %1156 = vst [vmem:[%s2160_s4 + $0xe0] sm:$0xff] %v1124_v57 }
 0x19c   :  { %v926_v53 = vadd.f32 %v894_v17, %v862_v35 }
 0x19d   :  { %v992_v60 = vld [vmem:[#allocation2 + $0xd8] sm:$0xff] }
 0x19e   :  { %v1010_v1 = vpack.c.bf16 %v992_v60, %v859_v9  ;;  %v1123_v4 = vadd.f32 %v1059_v55, %v992_v60  ;;  %959 = vst.msk [vmem:[#allocation2 + $0xe8] sm:$0xff] %vm22_vm0, %v926_v53  ;;  %v781_v19 = vpop.f32.mrf.mxu2 }
 0x19f   :  { %v863_v10 = vadd.f32 %v781_v19, %v668_v6 }
 0x1a0   :  { %1029 = vst.msk [vmem:[#allocation3 + $0x68] sm:$0xff] %vm1878_vm3, %v1010_v1 }
 0x1a1   :  { %1155 = vst.msk [vmem:[%s2160_s4 + $0xd8] sm:$0xff] %vm22_vm0, %v1123_v4  ;;  %v830_v21 = vpop.f32.mrf.mxu3  ;;  %v1126_v16 = vadd.f32 %v1062_v12, %v863_v10 }
 0x1a2   :  { %v864_v28 = vadd.f32 %v830_v21, %v669_v8 }
 0x1a3   :  { %1158 = vst [vmem:[%s2160_s4 + $0xf0] sm:$0xff] %v1126_v16 }
 0x1a4   :  { %v928_v13 = vadd.f32 %v896_v23, %v864_v28 }
 0x1a5   :  { %v994_v2 = vld [vmem:[#allocation2 + $0xe8] sm:$0xff] }
 0x1a6   :  { %v1011_v18 = vpack.c.bf16 %v994_v2, %v861_v14  ;;  %v1125_v39 = vadd.f32 %v1061_v0, %v994_v2  ;;  %961 = vst.msk [vmem:[#allocation2 + $0xf8] sm:$0xff] %vm22_vm0, %v928_v13 }
 0x1a8   :  { %1030 = vst.msk [vmem:[#allocation3 + $0x70] sm:$0xff] %vm1878_vm3, %v1011_v18 }
 0x1a9   :  { %1157 = vst.msk [vmem:[%s2160_s4 + $0xe8] sm:$0xff] %vm22_vm0, %v1125_v39 }
 0x1ad   :  { %v996_v20 = vld [vmem:[#allocation2 + $0xf8] sm:$0xff] }
 0x1ae   :  { %v1012_v63 = vpack.c.bf16 %v996_v20, %v863_v10  ;;  %v1127_v43 = vadd.f32 %v1063_v61, %v996_v20 }
 0x1b0   :  { %1031 = vst.msk [vmem:[#allocation3 + $0x78] sm:$0xff] %vm1878_vm3, %v1012_v63 }
 0x1b1   :  { %1159 = vst.msk [vmem:[%s2160_s4 + $0xf8] sm:$0xff] %vm22_vm0, %v1127_v43 }
 0x1b2   :  { %1172 = dma.vmem_to_hbm [thread:$0]  %s1165_s24, 2048, %s1167_s27, [#allocation4], %s1502_s2, %s1502_s2, %s1503_s30  }
 0x1b3   :  { %1498 = dma.done.wait [#allocation4], 2048  }
 0x1b4   :  { %1499 = vsyncadd [#allocation4], 4294965248 }
 0x1b5   :  { %1181 = vsyncpa [#allocation4], 1 }

// kernel: recommender_forward.10
= control target key start
LH: loop header
LB: loop body
LE: loop exit
PB: predicated region body
PF: predicated region fallthrough
CT: control target
= control target key end

     0   :  { %s871_s15 = smov 0   ;;  %s873_s16 = smov 0   ;;  %s1094_s0 = inlined_call_operand.vmem [shape: f32[16,160], index: 0, kind: input, shape index: {}]   ;;  %s1095_s1 = inlined_call_operand.vmem [shape: f32[16,160], index: 1, kind: input, shape index: {}]   ;;  %s1096_s2 = inlined_call_operand.vmem [shape: f32[160,4], index: 2, kind: input, shape index: {}]   ;;  %s1097_s3 = inlined_call_operand.vmem [shape: f32[4,160], index: 3, kind: input, shape index: {}]   ;;  %s1098_s4 = inlined_call_operand.vmem [shape: f32[16,160], index: 4, kind: output, shape index: {}]  }
   0x1   :  { %s875_s17 = smov 0  }
   0x2 LB: > { %s23_s18 = sadd.s32 1, %s830_s16  ;;  %p718_p0 = scmp.ge.s32.totalorder %s834_s17, 1  ;;  %s834_s17 = sphi %s875_s17, %s14_s17   ;;  %s830_s16 = sphi %s873_s16, %s1100_s16   ;;  %s826_s15 = sphi %s871_s15, %s1099_s15  }
   0x3   : > { %p24_p1 = scmp.ge.s32.totalorder %s23_s18, 2  ;;  %p188_p2 = scmp.lt.s32.totalorder %s834_s17, 3 }
   0x5   : > { %s1102_s18 = smov (%p24_p1, %s23_s18), 0  ;;  %p189_p3 = pnand %p718_p0, %p188_p2 }
   0x6   : > { %p719_p4 = scmp.ne.s32.totalorder (!%p189_p3), %s826_s15, 0 }
   0x7   : > { %192 = sbr.rel (%p189_p3) target bundleno = 972 (0x3cc), region = 36 }
   0xc   : > { %246 = sbr.rel (%p719_p4) target bundleno = 26 (0x1a), region = 40 }
  0x11   : > { %v247_v0 = vld [vmem:[%s1094_s0] sm:$0xff]  ;;  %v248_v1 = vld [vmem:[%s1094_s0 + $0x8] sm:$0xff]  ;;  %vm252_vm0 = vcmask 261120   ;;  %v249_v2 = vld [vmem:[%s1094_s0 + $0x10] sm:$0xff] }
  0x12   : > { %251 = vst [vmem:[#allocation2] sm:$0xff] %v247_v0  ;;  %v250_v3 = vld [vmem:[%s1094_s0 + $0x18] sm:$0xff] }
  0x13   : > { %253 = vst.msk [vmem:[#allocation2 + $0x8] sm:$0xff] %vm252_vm0, %v248_v1 }
  0x14   : > { %254 = vst [vmem:[#allocation2 + $0x10] sm:$0xff] %v249_v2 }
  0x15   : > { %255 = vst.msk [vmem:[#allocation2 + $0x18] sm:$0xff] %vm252_vm0, %v250_v3 }
  0x16   : > { %260 = vst [vmem:[%s1098_s4] sm:$0xff] %v247_v0 }
  0x17   : > { %261 = vst.msk [vmem:[%s1098_s4 + $0x8] sm:$0xff] %vm252_vm0, %v248_v1 }
  0x18   : > { %262 = vst [vmem:[%s1098_s4 + $0x10] sm:$0xff] %v249_v2 }
  0x19   : > { %263 = vst.msk [vmem:[%s1098_s4 + $0x18] sm:$0xff] %vm252_vm0, %v250_v3 }
  0x1a PF: > { %v287_v4 = vld [vmem:[%s1096_s2 + $0x78] sm:$0xff]  ;;  %v286_v5 = vld [vmem:[%s1096_s2 + $0x70] sm:$0xff]  ;;  %v285_v6 = vld [vmem:[%s1096_s2 + $0x68] sm:$0xff]  ;;  %vm292_vm1 = vcmask 261120   ;;  %s836_s29 = smov 125   ;;  %s837_s30 = smov 126  }
  0x1b   : > { %299 = vmatpush.msra.mxu0 %v287_v4  ;;  %729 = vmatpush.msra.mxu2 %v287_v4  ;;  %v284_v7 = vld [vmem:[%s1096_s2 + $0x60] sm:$0xff]  ;;  %v291_v8 = vld [vmem:[%s1096_s2 + $0x98] sm:$0xff]  ;;  %v290_v9 = vld [vmem:[%s1096_s2 + $0x90] sm:$0xff]  ;;  %s838_s5 = smov 127   ;;  %s839_s6 = smov 2  }
  0x1c   : > { %v283_v10 = vld [vmem:[%s1096_s2 + $0x58] sm:$0xff]  ;;  %334 = vmatpush.msra.mxu1 %v291_v8  ;;  %v289_v11 = vld [vmem:[%s1096_s2 + $0x88] sm:$0xff]  ;;  %v282_v12 = vld [vmem:[%s1096_s2 + $0x50] sm:$0xff]  ;;  %s840_s7 = smov 1   ;;  %s841_s8 = smov 3  }
  0x1d   : > { %300 = vmatpush.msra.mxu0 %v286_v5  ;;  %730 = vmatpush.msra.mxu2 %v286_v5  ;;  %v288_v13 = vld [vmem:[%s1096_s2 + $0x80] sm:$0xff]  ;;  %v281_v14 = vld [vmem:[%s1096_s2 + $0x48] sm:$0xff]  ;;  %v279_v17 = vld [vmem:[%s1096_s2 + $0x38] sm:$0xff] }
  0x1e   : > { %335 = vmatpush.msra.mxu1 %v290_v9  ;;  %v265_v15 = vld [vmem:[#allocation2 + $0x8] sm:$0xff]  ;;  %v280_v16 = vld [vmem:[%s1096_s2 + $0x40] sm:$0xff]  ;;  %v278_v18 = vld [vmem:[%s1096_s2 + $0x30] sm:$0xff] }
  0x1f   : > { %301 = vmatpush.msra.mxu0 %v285_v6  ;;  %731 = vmatpush.msra.mxu2 %v285_v6  ;;  %v277_v19 = vld [vmem:[%s1096_s2 + $0x28] sm:$0xff]  ;;  %v267_v20 = vld [vmem:[#allocation2 + $0x18] sm:$0xff]  ;;  %v276_v21 = vld [vmem:[%s1096_s2 + $0x20] sm:$0xff] }
  0x20   : > { %336 = vmatpush.msra.mxu1 %v289_v11  ;;  %v275_v22 = vld [vmem:[%s1096_s2 + $0x18] sm:$0xff]  ;;  %v274_v23 = vld [vmem:[%s1096_s2 + $0x10] sm:$0xff]  ;;  %v273_v24 = vld [vmem:[%s1096_s2 + $0x8] sm:$0xff] }
  0x21   : > { %302 = vmatpush.msra.mxu0 %v284_v7  ;;  %732 = vmatpush.msra.mxu2 %v284_v7  ;;  %v272_v25 = vld [vmem:[%s1096_s2] sm:$0xff]  ;;  %v266_v27 = vld [vmem:[#allocation2 + $0x10] sm:$0xff] }
  0x22   : > { %337 = vmatpush.msra.mxu1 %v288_v13  ;;  %v264_v26 = vld [vmem:[#allocation2] sm:$0xff] }
  0x23   : > { %303 = vmatpush.msra.mxu0 %v283_v10  ;;  %733 = vmatpush.msra.mxu2 %v283_v10 }
  0x24   : > { %720 = vmatmul.msk.f32.vlgmr.msra.gmra.mxu1 %vm292_vm1, %v265_v15 }
  0x25   : > { %304 = vmatpush.msra.mxu0 %v282_v12  ;;  %734 = vmatpush.msra.mxu2 %v282_v12  ;;  %v842_v12 = vmov 0  }
  0x26   : > { %780 = vset.pattern.permute.xlu1 %v842_v12  ;;  %779 = vset.pattern.permute.xlu0 %v842_v12 }
  0x27   : > { %305 = vmatpush.msra.mxu0 %v281_v14  ;;  %735 = vmatpush.msra.mxu2 %v281_v14 }
  0x29   : > { %306 = vmatpush.msra.mxu0 %v280_v16  ;;  %736 = vmatpush.msra.mxu2 %v280_v16 }
  0x2b   : > { %307 = vmatpush.msra.mxu0 %v279_v17  ;;  %737 = vmatpush.msra.mxu2 %v279_v17 }
  0x2c   : > { %721 = vmatmul.msk.f32.gmra.mxu1 %vm292_vm1, %v267_v20 }
  0x2d   : > { %308 = vmatpush.msra.mxu0 %v278_v18  ;;  %738 = vmatpush.msra.mxu2 %v278_v18 }
  0x2f   : > { %309 = vmatpush.msra.mxu0 %v277_v19  ;;  %739 = vmatpush.msra.mxu2 %v277_v19 }
  0x31   : > { %310 = vmatpush.msra.mxu0 %v276_v21  ;;  %740 = vmatpush.msra.mxu2 %v276_v21 }
  0x33   : > { %311 = vmatpush.msra.mxu0 %v275_v22  ;;  %741 = vmatpush.msra.mxu2 %v275_v22 }
  0x35   : > { %312 = vmatpush.msra.mxu0 %v274_v23  ;;  %742 = vmatpush.msra.mxu2 %v274_v23 }
  0x37   : > { %313 = vmatpush.msra.mxu0 %v273_v24  ;;  %743 = vmatpush.msra.mxu2 %v273_v24 }
  0x39   : > { %314 = vmatpush.msra.mxu0 %v272_v25  ;;  %744 = vmatpush.msra.mxu2 %v272_v25 }
  0x3a   : > { %315 = vmatmul.f32.vlgmr.msra.gmra.mxu0 %v264_v26  ;;  %318 = vmatmul.f32.vlgmr.msra.gmra.mxu2 %v266_v27 }
  0xa1   : > { %v339_v28 = vpop.f32.mrf.mxu1 }
  0xa9   : > { %v342_v31 = vpop.f32.mrf.mxu1 }
  0xb7   : > { %v316_v29 = vpop.f32.mrf.mxu0 }
  0xb8   : > { %v975_v30 = vadd.f32 %v339_v28, %v316_v29  ;;  %v843_v29 = vmov 1  }
  0xb9   : > { %781 = vset.pattern.permute.xlu2 %v843_v29 }
  0xba   : > { %363 = vrot.lane.b32.xlu2 %v975_v30, %s836_s29  ;;  %355 = vrot.lane.b32.xlu1 %v975_v30, %s837_s30 }
  0xbb   : > { %347 = vrot.lane.b32.xlu0 %v975_v30, %s838_s5 }
  0xbd   : > { %v319_v32 = vpop.f32.mrf.mxu2 }
  0xbe   : > { %v983_v33 = vadd.f32 %v342_v31, %v319_v32 }
  0xc2   : > { %365 = vrot.lane.b32.xlu2 %v983_v33, %s836_s29  ;;  %357 = vrot.lane.b32.xlu1 %v983_v33, %s837_s30 }
  0xc3   : > { %349 = vrot.lane.b32.xlu0 %v983_v33, %s838_s5 }
 0x114   : > { %v364_v37 = vpop.permute.xlu2 %363 }
 0x11c   : > { %v366_v44 = vpop.permute.xlu2 %365 }
 0x12c   : > { %v356_v34 = vpop.permute.xlu1 %355 }
 0x12d   : > { %v348_v35 = vpop.permute.xlu0 %347 }
 0x12e   : > { %v353_v36 = vmax.f32 %v975_v30, %v348_v35 }
 0x130   : > { %v361_v38 = vmax.f32 %v353_v36, %v356_v34 }
 0x132   : > { %v369_v39 = vmax.f32 %v361_v38, %v364_v37  ;;  %v845_v38 = vmov 3  }
 0x134   : > { %391 = vrot.lane.b32.xlu2 %v369_v39, %s839_s6  ;;  %379 = vrot.lane.b32.xlu0 %v369_v39, %s840_s7  ;;  %v358_v42 = vpop.permute.xlu1 %357  ;;  %v371_v7 = vsub.f32 %v975_v30, %v369_v39 }
 0x135   : > { %v350_v40 = vpop.permute.xlu0 %349 }
 0x136   : > { %v354_v41 = vmax.f32 %v983_v33, %v350_v40  ;;  %v373_v9 = vmul.f32 1.442695, %v371_v7 }
 0x138   : > { %v362_v43 = vmax.f32 %v354_v41, %v358_v42 }
 0x13a   : > { %v370_v45 = vmax.f32 %v362_v43, %v366_v44 }
 0x13c   : > { %405 = vrot.lane.b32.xlu2 %v370_v45, %s841_s8  ;;  %393 = vrot.lane.b32.xlu0 %v370_v45, %s839_s6  ;;  %v372_v6 = vsub.f32 %v983_v33, %v370_v45 }
 0x13d   : > { %381 = vrot.lane.b32.xlu1 %v370_v45, %s840_s7 }
 0x13e   : > { %v375_v8 = vmul.f32 1.442695, %v372_v6 }
 0x145   : > { %403 = vrot.lane.b32.xlu1 %v369_v39, %s841_s8 }
 0x18e   : > { %v392_v46 = vpop.permute.xlu2 %391 }
 0x18f   : > { %v397_v47 = vsub.f32 %v975_v30, %v392_v46  ;;  %v722_v46 = vld [vmem:[%s1097_s3 + $0x1] ss:$4 sm:$0x3] }
 0x191   : > { %v399_v48 = vmul.f32 1.442695, %v397_v47  ;;  %v723_v47 = vld [vmem:[%s1097_s3 + $0x2] ss:$4 sm:$0x3] }
 0x193   : > { %788 = vpow2.f32 %v399_v48  ;;  %v492_v48 = vperm.slane %v722_v46, 0 }
 0x196   : > { %v406_v49 = vpop.permute.xlu2 %405 }
 0x197   : > { %v410_v50 = vsub.f32 %v983_v33, %v406_v49  ;;  %v493_v49 = vperm.slane %v722_v46, 1 }
 0x199   : > { %v1001_v51 = vpop.eup %788  ;;  %v413_v52 = vmul.f32 1.442695, %v410_v50 }
 0x19a   : > { %427 = vrot.lane.b32.xlu2 %v1001_v51, %s837_s30 }
 0x19b   : > { %790 = vpow2.f32 %v413_v52  ;;  %v525_v52 = vperm.slane %v723_v47, 0 }
 0x1a1   : > { %v1005_v53 = vpop.eup %790 }
 0x1a2   : > { %439 = vrot.lane.b32.xlu2 %v1005_v53, %s836_s29 }
 0x1a6   : > { %v380_v54 = vpop.permute.xlu0 %379 }
 0x1a7   : > { %v385_v55 = vsub.f32 %v975_v30, %v380_v54 }
 0x1a9   : > { %v387_v56 = vmul.f32 1.442695, %v385_v55 }
 0x1ab   : > { %792 = vpow2.f32 %v387_v56 }
 0x1ae   : > { %v394_v57 = vpop.permute.xlu0 %393 }
 0x1af   : > { %v382_v58 = vpop.permute.xlu1 %381  ;;  %v398_v59 = vsub.f32 %v983_v33, %v394_v57 }
 0x1b0   : > { %v386_v60 = vsub.f32 %v983_v33, %v382_v58 }
 0x1b1   : > { %v793_v61 = vpop.eup %792  ;;  %v401_v62 = vmul.f32 1.442695, %v398_v59 }
 0x1b2   : > { %v389_v63 = vmul.f32 1.442695, %v386_v60  ;;  %417 = vrot.lane.b32.xlu0 %v793_v61, %s838_s5  ;;  %v724_v60 = vld [vmem:[%s1097_s3 + $0x3] ss:$4 sm:$0x3] }
 0x1b3   : > { %794 = vpow2.f32 %v401_v62 }
 0x1b4   : > { %796 = vpow2.f32 %v389_v63 }
 0x1b7   : > { %v404_v0 = vpop.permute.xlu1 %403 }
 0x1b8   : > { %v409_v1 = vsub.f32 %v975_v30, %v404_v0  ;;  %v844_v30 = vmov 2  }
 0x1b9   : > { %v1014_v2 = vpop.eup %794 }
 0x1ba   : > { %v797_v3 = vpop.eup %796  ;;  %v411_v4 = vmul.f32 1.442695, %v409_v1  ;;  %429 = vrot.lane.b32.xlu0 %v1014_v2, %s837_s30 }
 0x1bb   : > { %419 = vrot.lane.b32.xlu1 %v797_v3, %s838_s5 }
 0x1bc   : > { %798 = vpow2.f32 %v411_v4  ;;  %v559_v4 = vperm.slane %v724_v60, 1 }
 0x1bd   : > { %800 = vpow2.f32 %v375_v8 }
 0x1be   : > { %802 = vpow2.f32 %v373_v9 }
 0x1c2   : > { %v799_v5 = vpop.eup %798 }
 0x1c3   : > { %437 = vrot.lane.b32.xlu1 %v799_v5, %s836_s29  ;;  %v801_v13 = vpop.eup %800 }
 0x1c4   : > { %v803_v16 = vpop.eup %802 }
 0x1f4   : > { %v428_v11 = vpop.permute.xlu2 %427 }
 0x1fc   : > { %v440_v20 = vpop.permute.xlu2 %439 }
 0x224   : > { %v418_v10 = vpop.permute.xlu0 %417 }
 0x225   : > { %v423_v18 = vadd.f32 %v803_v16, %v418_v10 }
 0x227   : > { %v433_v22 = vadd.f32 %v428_v11, %v423_v18 }
 0x22c   : > { %v430_v17 = vpop.permute.xlu0 %429 }
 0x22d   : > { %v420_v14 = vpop.permute.xlu1 %419 }
 0x22e   : > { %v424_v15 = vadd.f32 %v801_v13, %v420_v14  ;;  %v268_v14 = vld [vmem:[%s1095_s1] sm:$0xff] }
 0x230   : > { %v434_v19 = vadd.f32 %v430_v17, %v424_v15  ;;  %v269_v15 = vld [vmem:[%s1095_s1 + $0x8] sm:$0xff] }
 0x232   : > { %v444_v21 = vadd.f32 %v440_v20, %v434_v19 }
 0x234   : > { %804 = vrcp.f32 %v444_v21 }
 0x235   : > { %v438_v23 = vpop.permute.xlu1 %437 }
 0x236   : > { %v443_v24 = vadd.f32 %v438_v23, %v433_v22 }
 0x238   : > { %806 = vrcp.f32 %v443_v24 }
 0x23a   : > { %v805_v25 = vpop.eup %804 }
 0x23b   : > { %473 = vrot.lane.b32.xlu1 %v805_v25, %s840_s7  ;;  %v448_v27 = vmul.f32 %v805_v25, %v801_v13 }
 0x23e   : > { %v807_v26 = vpop.eup %806 }
 0x23f   : > { %504 = vrot.lane.b32.xlu2 %v807_v26, %s839_s6  ;;  %471 = vrot.lane.b32.xlu0 %v807_v26, %s840_s7  ;;  %v447_v28 = vmul.f32 %v807_v26, %v803_v16 }
 0x243   : > { %537 = vrot.lane.b32.xlu1 %v807_v26, %s841_s8 }
 0x247   : > { %539 = vrot.lane.b32.xlu2 %v805_v25, %s841_s8  ;;  %506 = vrot.lane.b32.xlu0 %v805_v25, %s839_s6 }
 0x24b   : > { %457 = vperm.xlu1 %780, %v448_v27  }
 0x24f   : > { %452 = vperm.xlu0 %779, %v447_v28  }
 0x253   : > { %783 = vset.pattern.permute.xlu1 %v843_v29 }
 0x257   : > { %784 = vset.pattern.permute.xlu0 %v844_v30 }
 0x299   : > { %v505_v37 = vpop.permute.xlu2 %504 }
 0x29a   : > { %v510_v41 = vmul.f32 %v1001_v51, %v505_v37  ;;  %v449_v51 = vld [vmem:[%s1097_s3] ss:$4 sm:$0x3] }
 0x29b   : > { %v461_v56 = vperm.slane %v449_v51, 0  ;;  %v462_v57 = vperm.slane %v449_v51, 1 }
 0x2a1   : > { %v540_v42 = vpop.permute.xlu2 %539 }
 0x2a2   : > { %v544_v43 = vmul.f32 %v1005_v53, %v540_v42  ;;  %v526_v53 = vperm.slane %v723_v47, 1 }
 0x2ad   : > { %v474_v31 = vpop.permute.xlu1 %473 }
 0x2ae   : > { %v478_v32 = vmul.f32 %v797_v3, %v474_v31  ;;  %v558_v3 = vperm.slane %v724_v60, 0  ;;  %v271_v31 = vld [vmem:[%s1095_s1 + $0x18] sm:$0xff] }
 0x2b0   : > { %488 = vperm.xlu1 %783, %v478_v32  }
 0x2b1   : > { %v472_v33 = vpop.permute.xlu0 %471 }
 0x2b2   : > { %v477_v34 = vmul.f32 %v793_v61, %v472_v33 }
 0x2b4   : > { %483 = vperm.xlu2 %781, %v477_v34  }
 0x2b5   : > { %v538_v35 = vpop.permute.xlu1 %537 }
 0x2b6   : > { %v543_v36 = vmul.f32 %v799_v5, %v538_v35 }
 0x2b8   : > { %785 = vset.pattern.permute.xlu1 %v845_v38 }
 0x2b9   : > { %549 = vperm.xlu1 %785, %v543_v36   ;;  %v507_v39 = vpop.permute.xlu0 %506 }
 0x2ba   : > { %v511_v40 = vmul.f32 %v1014_v2, %v507_v39 }
 0x2bc   : > { %782 = vset.pattern.permute.xlu2 %v844_v30  ;;  %521 = vperm.xlu0 %784, %v511_v40   ;;  %v270_v30 = vld [vmem:[%s1095_s1 + $0x10] sm:$0xff] }
 0x2bd   : > { %516 = vperm.xlu2 %782, %v510_v41   ;;  %v458_v44 = vpop.permute.xlu1 %457 }
 0x2be   : > { %v467_v12 = vmul.f32 %v461_v56, %v458_v44  ;;  %v468_v13 = vmul.f32 %v462_v57, %v458_v44 }
 0x2c1   : > { %v453_v55 = vpop.permute.xlu0 %452 }
 0x2c2   : > { %v465_v61 = vmul.f32 %v461_v56, %v453_v55  ;;  %v466_v62 = vmul.f32 %v462_v57, %v453_v55 }
 0x2c4   : > { %787 = vset.pattern.permute.xlu0 %v845_v38 }
 0x2c5   : > { %786 = vset.pattern.permute.xlu2 %v845_v38 }
 0x2c6   : > { %554 = vperm.xlu2 %786, %v544_v43  }
 0x30e   : > { %v484_v45 = vpop.permute.xlu2 %483 }
 0x30f   : > { %v496_v58 = vmul.f32 %v492_v48, %v484_v45  ;;  %v497_v59 = vmul.f32 %v493_v49, %v484_v45 }
 0x311   : > { %v500_v1 = vadd.f32 %v496_v58, %v465_v61  ;;  %v501_v2 = vadd.f32 %v497_v59, %v466_v62  ;;  %v620_v62 = vld [vmem:[%s1098_s4] sm:$0xff] }
 0x317   : > { %v517_v54 = vpop.permute.xlu2 %516 }
 0x318   : > { %v529_v63 = vmul.f32 %v525_v52, %v517_v54  ;;  %v530_v0 = vmul.f32 %v526_v53, %v517_v54 }
 0x31a   : > { %v533_v8 = vadd.f32 %v529_v63, %v500_v1  ;;  %v534_v9 = vadd.f32 %v530_v0, %v501_v2  ;;  %v621_v63 = vld [vmem:[%s1098_s4 + $0x8] sm:$0xff] }
 0x320   : > { %v555_v16 = vpop.permute.xlu2 %554 }
 0x321   : > { %v564_v26 = vmul.f32 %v558_v3, %v555_v16  ;;  %v565_v27 = vmul.f32 %v559_v4, %v555_v16 }
 0x322   : > { %v489_v50 = vpop.permute.xlu1 %488 }
 0x323   : > { %v498_v5 = vmul.f32 %v492_v48, %v489_v50  ;;  %v499_v6 = vmul.f32 %v493_v49, %v489_v50 }
 0x325   : > { %v502_v20 = vadd.f32 %v498_v5, %v467_v12  ;;  %v503_v21 = vadd.f32 %v499_v6, %v468_v13 }
 0x32b   : > { %v550_v7 = vpop.permute.xlu1 %549 }
 0x32c   : > { %v562_v10 = vmul.f32 %v558_v3, %v550_v7  ;;  %v563_v11 = vmul.f32 %v559_v4, %v550_v7  ;;  %v622_v7 = vld [vmem:[%s1098_s4 + $0x10] sm:$0xff] }
 0x32e   : > { %v566_v17 = vadd.f32 %v562_v10, %v533_v8  ;;  %v567_v18 = vadd.f32 %v563_v11, %v534_v9  ;;  %v522_v19 = vpop.permute.xlu0 %521  ;;  %v623_v8 = vld [vmem:[%s1098_s4 + $0x18] sm:$0xff] }
 0x32f   : > { %v531_v22 = vmul.f32 %v525_v52, %v522_v19  ;;  %v532_v23 = vmul.f32 %v526_v53, %v522_v19 }
 0x330   : > { %v570_v24 = vmul.f32 %v566_v17, %v268_v14  ;;  %v571_v25 = vmul.f32 %v567_v18, %v269_v15 }
 0x331   : > { %v535_v28 = vadd.f32 %v531_v22, %v502_v20  ;;  %v536_v29 = vadd.f32 %v532_v23, %v503_v21 }
 0x332   : > { %v574_v32 = vadd.f32 %v570_v24, %v268_v14  ;;  %v575_v33 = vadd.f32 %v571_v25, %v269_v15 }
 0x333   : > { %v568_v34 = vadd.f32 %v564_v26, %v535_v28  ;;  %v569_v35 = vadd.f32 %v565_v27, %v536_v29 }
 0x334   : > { %v578_v36 = vmul.f32 %v574_v32, %v574_v32  ;;  %v579_v37 = vmul.f32 %v575_v33, %v575_v33 }
 0x335   : > { %v572_v38 = vmul.f32 %v568_v34, %v270_v30  ;;  %v573_v39 = vmul.f32 %v569_v35, %v271_v31 }
 0x336   : > { %v582_v40 = vsel %vm292_vm1, %v579_v37, 0.0 }
 0x337   : > { %v583_v41 = vadd.f32 %v582_v40, %v578_v36  ;;  %v576_v42 = vadd.f32 %v572_v38, %v270_v30  ;;  %v577_v43 = vadd.f32 %v573_v39, %v271_v31 }
 0x339   : > { %584 = vadd.xlane.f32.xlu1 %v583_v41  ;;  %v580_v44 = vmul.f32 %v576_v42, %v576_v42  ;;  %v581_v45 = vmul.f32 %v577_v43, %v577_v43 }
 0x33b   : > { %v586_v46 = vsel %vm292_vm1, %v581_v45, 0.0 }
 0x33c   : > { %v587_v47 = vadd.f32 %v586_v46, %v580_v44 }
 0x33e   : > { %588 = vadd.xlane.f32.xlu2 %v587_v47 }
 0x3ac   : > { %v585_v48 = vpop.xlane.xlu1 %584 }
 0x3ad   : > { %v590_v49 = vmax.f32 %v585_v48, 1e-24 }
 0x3af   : > { %808 = vrsqrt.f32 %v590_v49  ;;  %vm598_vm3 = vweird.f32 %v590_v49 }
 0x3b1   : > { %v589_v50 = vpop.xlane.xlu2 %588 }
 0x3b2   : > { %v591_v51 = vmax.f32 %v589_v50, 1e-24 }
 0x3b4   : > { %810 = vrsqrt.f32 %v591_v51  ;;  %vm608_vm6 = vweird.f32 %v591_v51 }
 0x3b5   : > { %v809_v52 = vpop.eup %808 }
 0x3b6   : > { %v593_v53 = vmul.f32 %v809_v52, %v590_v49  ;;  %vm599_vm2 = vweird.f32 %v809_v52 }
 0x3b7   : > { %vm600_vm4 = vmor %vm598_vm3, %vm599_vm2 }
 0x3b8   : > { %v594_v54 = vmul.f32 %v809_v52, %v593_v53 }
 0x3ba   : > { %v811_v55 = vpop.eup %810  ;;  %v595_v56 = vmul.f32 0.5, %v594_v54 }
 0x3bb   : > { %v603_v57 = vmul.f32 %v811_v55, %v591_v51  ;;  %vm609_vm5 = vweird.f32 %v811_v55 }
 0x3bc   : > { %v596_v58 = vsub.f32 1.5, %v595_v56  ;;  %vm610_vm7 = vmor %vm608_vm6, %vm609_vm5 }
 0x3bd   : > { %v604_v59 = vmul.f32 %v811_v55, %v603_v57 }
 0x3be   : > { %v597_v60 = vmul.f32 %v809_v52, %v596_v58 }
 0x3bf   : > { %v605_v61 = vmul.f32 0.5, %v604_v59 }
 0x3c0   : > { %v601_v0 = vsel %vm600_vm4, %v809_v52, %v597_v60 }
 0x3c1   : > { %v612_v1 = vmul.f32 %v601_v0, %v574_v32  ;;  %v613_v2 = vmul.f32 %v601_v0, %v575_v33  ;;  %v606_v3 = vsub.f32 1.5, %v605_v61 }
 0x3c3   : > { %616 = vst [vmem:[#allocation2] sm:$0xff] %v612_v1  ;;  %v624_v4 = vadd.f32 %v620_v62, %v612_v1  ;;  %v625_v5 = vadd.f32 %v621_v63, %v613_v2  ;;  %v607_v6 = vmul.f32 %v811_v55, %v606_v3 }
 0x3c4   : > { %617 = vst.msk [vmem:[#allocation2 + $0x8] sm:$0xff] %vm292_vm1, %v613_v2 }
 0x3c5   : > { %628 = vst [vmem:[%s1098_s4] sm:$0xff] %v624_v4  ;;  %v611_v9 = vsel %vm610_vm7, %v811_v55, %v607_v6 }
 0x3c6   : > { %629 = vst.msk [vmem:[%s1098_s4 + $0x8] sm:$0xff] %vm292_vm1, %v625_v5  ;;  %v614_v10 = vmul.f32 %v611_v9, %v576_v42  ;;  %v615_v11 = vmul.f32 %v611_v9, %v577_v43 }
 0x3c8   : > { %618 = vst [vmem:[#allocation2 + $0x10] sm:$0xff] %v614_v10  ;;  %v626_v12 = vadd.f32 %v622_v7, %v614_v10  ;;  %v627_v13 = vadd.f32 %v623_v8, %v615_v11 }
 0x3c9   : > { %619 = vst.msk [vmem:[#allocation2 + $0x18] sm:$0xff] %vm292_vm1, %v615_v11 }
 0x3ca   : > { %630 = vst [vmem:[%s1098_s4 + $0x10] sm:$0xff] %v626_v12 }
 0x3cb   : > { %631 = vst.msk [vmem:[%s1098_s4 + $0x18] sm:$0xff] %vm292_vm1, %v627_v13 }
 0x3cc PF: > { %s14_s17 = sadd.s32 1, %s834_s17   ;;  %s1099_s15 = smov %s830_s16 }
 0x3cd   : > { %p11_p5 = scmp.ge.s32.totalorder %s14_s17, 4   ;;  %s1100_s16 = smov %s1102_s18 }
 0x3cf   :  { %13 = sbr.rel (!%p11_p5) target bundleno = 2 (0x2), region = 76 }

// kernel: recommender_forward.11
= control target key start
LH: loop header
LB: loop body
LE: loop exit
PB: predicated region body
PF: predicated region fallthrough
CT: control target
= control target key end

     0   :  { %s221_s0 = inlined_call_operand.vmem [shape: f32[4,160], index: 0, kind: input, shape index: {}]   ;;  %s222_s1 = inlined_call_operand.vmem [shape: f32[4,160], index: 1, kind: input, shape index: {}]   ;;  %s223_s2 = inlined_call_operand.vmem [shape: f32[4,160], index: 2, kind: input, shape index: {}]   ;;  %s224_s3 = inlined_call_operand.vmem [shape: f32[4], index: 3, kind: output, shape index: {}]  }
   0x1   :  { %v15_v0 = vld [vmem:[%s221_s0] sm:$0xff] }
   0x2   :  { %v16_v1 = vld [vmem:[%s222_s1] sm:$0xff] }
   0x3   :  { %v18_v2 = vmul.f32 %v16_v1, %v15_v0 }
   0x4   :  { %8 = vsyncpa [#allocation3], 0  ;;  %v17_v3 = vld [vmem:[%s223_s2] sm:$0xff]  ;;  %vm25_vm0 = vcmask 1043456   ;;  %vm27_vm1 = vcmask 257024   ;;  %v73_v10 = vmul.f32 %v15_v0, %v15_v0  ;;  %v94_v16 = vmul.f32 %v16_v1, %v16_v1  ;;  %s141_s18 = sshll.u32 %s224_s3, 4  ;;  %s142_s18 = int_to_ptr.vmem [resolvable:$true] %s141_s18 }
   0x5   :  { %20 = vst [vmem:[#allocation1] ss:$2 sm:$0xff] %v18_v2  ;;  %v32_v4 = vmul.f32 %v17_v3, %v15_v0  ;;  %v115_v19 = vmul.f32 %v17_v3, %v17_v3  ;;  %vm60_vm3 = vcmask 3072   ;;  %s178_s22 = smov [#allocation2]  }
   0xc   :  { %v21_v5 = vld.sshfl [vmem:[#allocation1] sm:$0xff pattern:$0x75316420]  ;;  %v22_v6 = vld.sshfl [vmem:[#allocation1 + $0x8] sm:$0xff pattern:$0x75316420] }
   0xd   :  { %v26_v7 = vsel %vm25_vm0, %v21_v5, 0.0  ;;  %v28_v8 = vsel %vm27_vm1, %v22_v6, 0.0  ;;  %34 = vst [vmem:[#allocation1] ss:$2 sm:$0xff] %v32_v4 }
   0xe   :  { %v29_v9 = vadd.f32 %v28_v8, %v26_v7 }
  0x10   :  { %30 = vadd.xlane.f32.xlu0 %v29_v9 }
  0x14   :  { %v35_v11 = vld.sshfl [vmem:[#allocation1] sm:$0xff pattern:$0x75316420]  ;;  %v36_v12 = vld.sshfl [vmem:[#allocation1 + $0x8] sm:$0xff pattern:$0x75316420] }
  0x15   :  { %v39_v13 = vsel %vm25_vm0, %v35_v11, 0.0  ;;  %v40_v14 = vsel %vm27_vm1, %v36_v12, 0.0  ;;  %75 = vst [vmem:[#allocation1] ss:$2 sm:$0xff] %v73_v10 }
  0x16   :  { %v41_v15 = vadd.f32 %v40_v14, %v39_v13 }
  0x18   :  { %42 = vadd.xlane.f32.xlu0 %v41_v15 }
  0x1c   :  { %v76_v17 = vld.sshfl [vmem:[#allocation1] sm:$0xff pattern:$0x75316420]  ;;  %v77_v18 = vld.sshfl [vmem:[#allocation1 + $0x8] sm:$0xff pattern:$0x75316420] }
  0x1d   :  { %96 = vst [vmem:[#allocation1] ss:$2 sm:$0xff] %v94_v16  ;;  %v80_v48 = vsel %vm25_vm0, %v76_v17, 0.0  ;;  %v81_v49 = vsel %vm27_vm1, %v77_v18, 0.0 }
  0x1e   :  { %v82_v50 = vadd.f32 %v81_v49, %v80_v48 }
  0x24   :  { %v97_v20 = vld.sshfl [vmem:[#allocation1] sm:$0xff pattern:$0x75316420]  ;;  %v98_v21 = vld.sshfl [vmem:[#allocation1 + $0x8] sm:$0xff pattern:$0x75316420] }
  0x25   :  { %v101_v22 = vsel %vm25_vm0, %v97_v20, 0.0  ;;  %v102_v23 = vsel %vm27_vm1, %v98_v21, 0.0  ;;  %117 = vst [vmem:[#allocation1] ss:$2 sm:$0xff] %v115_v19 }
  0x26   :  { %v103_v24 = vadd.f32 %v102_v23, %v101_v22 }
  0x28   :  { %104 = vadd.xlane.f32.xlu2 %v103_v24 }
  0x2c   :  { %v118_v26 = vld.sshfl [vmem:[#allocation1] sm:$0xff pattern:$0x75316420]  ;;  %v119_v27 = vld.sshfl [vmem:[#allocation1 + $0x8] sm:$0xff pattern:$0x75316420] }
  0x2d   :  { %v122_v28 = vsel %vm25_vm0, %v118_v26, 0.0  ;;  %v123_v29 = vsel %vm27_vm1, %v119_v27, 0.0 }
  0x2e   :  { %v124_v30 = vadd.f32 %v123_v29, %v122_v28 }
  0x30   :  { %125 = vadd.xlane.f32.xlu2 %v124_v30 }
  0x83   :  { %v31_v25 = vpop.xlane.xlu0 %30 }
  0x8b   :  { %v43_v31 = vpop.xlane.xlu0 %42 }
  0x8c   :  { %v44_v32 = vsub.f32 %v31_v25, %v43_v31 }
  0x8e   :  { %v46_v33 = vand.u32 2147483647, %v44_v32  ;;  %v45_v44 = vmin.f32 %v44_v32, 0.0 }
  0x90   :  { %v47_v34 = vsub.f32 0.0, %v46_v33 }
  0x92   :  { %v48_v35 = vmul.f32 1.442695, %v47_v34 }
  0x94   :  { %160 = vpow2.f32 %v48_v35 }
  0x9a   :  { %v161_v36 = vpop.eup %160 }
  0x9b   :  { %v50_v37 = vadd.f32 1.0, %v161_v36  ;;  %v53_v38 = vmul.f32 -0.5, %v161_v36  ;;  %v56_v40 = vand.u32 2147483647, %v161_v36  ;;  %v105_v51 = vpop.xlane.xlu2 %104 }
  0x9c   :  { %v106_v53 = vrot.slane %v105_v51, 4 }
  0x9d   :  { %162 = vlog2.f32 %v50_v37  ;;  %v54_v39 = vadd.f32 1.0, %v53_v38  ;;  %vm57_vm2 = vcmp.lt.f32.partialorder %v56_v40, 0.0004427343 }
  0x9e   :  { %v107_v58 = vadd.f32 %v106_v53, %v105_v51 }
  0x9f   :  { %v55_v43 = vmul.f32 %v161_v36, %v54_v39 }
  0xa0   :  { %v108_v62 = vrot.slane %v107_v58, 2 }
  0xa2   :  { %v109_v5 = vadd.f32 %v108_v62, %v107_v58 }
  0xa3   :  { %v163_v41 = vpop.eup %162  ;;  %v126_v52 = vpop.xlane.xlu2 %125 }
  0xa4   :  { %v52_v42 = vmul.f32 0.6931472, %v163_v41  ;;  %v127_v56 = vrot.slane %v126_v52, 4  ;;  %v110_v9 = vrot.slane %v109_v5, 1 }
  0xa6   :  { %v58_v45 = vsel %vm57_vm2, %v55_v43, %v52_v42  ;;  %v128_v60 = vadd.f32 %v127_v56, %v126_v52  ;;  %v111_v13 = vadd.f32 %v110_v9, %v109_v5 }
  0xa7   :  { %v59_v46 = vsub.f32 %v45_v44, %v58_v45 }
  0xa8   :  { %v129_v0 = vrot.slane %v128_v60, 2 }
  0xa9   :  { %v61_v47 = vsel %vm60_vm3, %v59_v46, 0.0 }
  0xaa   :  { %62 = vadd.xlane.f32.xlu1 %v61_v47  ;;  %v130_v6 = vadd.f32 %v129_v0, %v128_v60 }
  0xac   :  { %v131_v11 = vrot.slane %v130_v6, 1 }
  0xae   :  { %v132_v14 = vadd.f32 %v131_v11, %v130_v6 }
  0xb2   :  { %83 = vadd.xlane.f32.xlu1 %v82_v50 }
 0x11d   :  { %v63_v54 = vpop.xlane.xlu1 %62 }
 0x11e   :  { %v64_v55 = vrot.slane %v63_v54, 4 }
 0x120   :  { %v65_v57 = vadd.f32 %v64_v55, %v63_v54 }
 0x122   :  { %v66_v59 = vrot.slane %v65_v57, 2 }
 0x124   :  { %v67_v61 = vadd.f32 %v66_v59, %v65_v57 }
 0x125   :  { %v84_v63 = vpop.xlane.xlu1 %83 }
 0x126   :  { %v85_v1 = vrot.slane %v84_v63, 4  ;;  %v68_v2 = vrot.slane %v67_v61, 1 }
 0x128   :  { %v86_v3 = vadd.f32 %v85_v1, %v84_v63  ;;  %v69_v4 = vadd.f32 %v68_v2, %v67_v61 }
 0x12a   :  { %v87_v7 = vrot.slane %v86_v3, 2  ;;  %151 = vpush %v69_v4 }
 0x12c   :  { %v88_v8 = vadd.f32 %v87_v7, %v86_v3 }
 0x12e   :  { %v89_v10 = vrot.slane %v88_v8, 1 }
 0x130   :  { %v90_v12 = vadd.f32 %v89_v10, %v88_v8 }
 0x132   :  { %153 = vpush %v90_v12 }
 0x133   :  { %155 = vpush %v111_v13 }
 0x134   :  { %157 = vpush %v132_v14 }
 0x15b   :  { %s152_s0 = spop %151 }
 0x15c   :  { %72 = sst [smem:[#allocation2]] %s152_s0 }
 0x163   :  { %s154_s19 = spop %153 }
 0x164   :  { %93 = sst [smem:[#allocation2 + $0x1]] %s154_s19  ;;  %s156_s20 = spop %155 }
 0x165   :  { %114 = sst [smem:[#allocation2 + $0x2]] %s156_s20  ;;  %s158_s21 = spop %157 }
 0x166   :  { %135 = sst [smem:[#allocation2 + $0x3]] %s158_s21 }
 0x167   :  { %144 = dma.smem_to_vmem %s178_s22, 16, %s142_s18, [#allocation3]  }
 0x168   :  { %176 = dma.done.wait [#allocation3], 16  }
 0x169   :  { %177 = vsyncadd [#allocation3], 4294967280 }
 0x16a   :  { %149 = sfence }
 0x16b   :  { %150 = vsyncpa [#allocation3], 1 }

</bundles_post_ra>
